<compile_context>
chip_gen: v7x
topology: tpu7x:2x2x1
jax: 0.10.0
libtpu: 0.0.40
codegen_flags: <defaults>
</compile_context>

<pallas_src>
import functools

import jax
import jax.numpy as jnp
from jax import lax
from jax.experimental import pallas as pl
from jax.experimental.pallas import tpu as pltpu

ALPHA = 0.1          # APPNP teleport probability (canonical default)
EPS = 1e-5           # BatchNorm eps
LANE = 128           # TPU lane width
SUBLANE = 8          # f32 sublane count


def _round_up(x, m):
    return (x + m - 1) // m * m


def _vmem_tile_bytes(rows, cols, itemsize):
    """Approx VMEM footprint of a 2-D buffer incl. sublane/lane padding."""
    return _round_up(rows, 2 * SUBLANE) * _round_up(cols, LANE) * itemsize


# ------------------------------ fused kernel ------------------------------ #

def _appnp_kernel(h0_ref, adj_ref, w_out_ref, b_out_ref, o_ref, h_ref,
                  *, num_layers):
    """Entire APPNP propagation + output_fc in ONE grid step (grid=(1,)).

    Inputs (all VMEM-resident, constant index maps):
      h0_ref    [Np, Hp]  f32   relu(input_fc(BN(x))); pad rows are exactly zero
      adj_ref   [Np, Np]  bf16  sym-normalized adjacency (zero-padded)
      w_out_ref [Hp, Cp]  bf16  output_fc weight
      b_out_ref [1 , Cp]  f32   output_fc bias
    Output:
      o_ref     [Np, Cp]  f32   logits
    Scratch:
      h_ref     [Np, Hp]  bf16  current hidden state
    """
    h_ref[...] = h0_ref[...].astype(jnp.bfloat16)

    def body(_, carry):
        # acc = adj @ h  (bf16 MXU, f32 accumulate)
        ah = jnp.dot(adj_ref[...], h_ref[...],
                     preferred_element_type=jnp.float32)
        h_new = (1.0 - ALPHA) * ah + ALPHA * h0_ref[...]
        h_ref[...] = h_new.astype(jnp.bfloat16)
        return carry

    # Short fixed trip count -> unroll for LLO scheduler visibility.
    lax.fori_loop(0, num_layers, body, 0, unroll=True)

    # output_fc in bf16 (f32 accumulate) — lane-dense [Np, Cp] store.
    o_ref[...] = (jnp.dot(h_ref[...], w_out_ref[...],
                          preferred_element_type=jnp.float32)
                  + b_out_ref[...])


# ------------------------------ wrapper ------------------------------------ #

def appnp_forward(params, x, adj, num_layers):
    """Forward pass matching the PyTorch APPNP module (dropout p=0)."""
    assert num_layers >= 1
    n, _ = x.shape
    h_dim = params["w_in"].shape[1]
    c_dim = params["w_out"].shape[1]

    # ---- BatchNorm1d(affine=False) + input_fc + relu in plain XLA (perf review:
    # removes ragged K=16 matmul + lane-padded x buffer from the kernel).
    # TODO(synk): PyTorch .eval() would use running stats; batch stats are used here
    #             (training-style BN, dropout p=0) to keep the previous numerics.
    mean = jnp.mean(x, axis=0)
    var = jnp.mean((x - mean) ** 2, axis=0)
    xn = (x - mean) / jnp.sqrt(var + EPS)
    h0 = jnp.maximum(xn @ params["w_in"] + params["b_in"], 0.0)          # [N, H]

    # ---- pad to TPU-friendly shapes (lane-dense hidden/output dims, N to 128).
    np_ = _round_up(n, LANE)
    hp = _round_up(h_dim, LANE)
    cp = _round_up(c_dim, LANE)

    # Pad rows of h0 are zero, adj pad rows/cols are zero -> pad rows stay exactly
    # zero through every propagation step; slicing [:n] at the end is exact.
    h0_p = jnp.pad(h0, ((0, np_ - n), (0, hp - h_dim)))
    adj_p = jnp.pad(adj, ((0, np_ - n), (0, np_ - n))).astype(jnp.bfloat16)
    w_out_p = jnp.pad(params["w_out"],
                      ((0, hp - h_dim), (0, cp - c_dim))).astype(jnp.bfloat16)
    b_out_p = jnp.pad(params["b_out"], ((0, 0), (0, cp - c_dim)))

    # ---- VMEM budget: double-buffer allocations for pipelined operands + scratch,
    # with lane/sublane padding accounted; generous compiler headroom; clamp at
    # 48 MiB (safe on v7x's 64 MiB/TC, well under v5e/v6e's 128 MiB).
    vmem_bytes = (
        2 * _vmem_tile_bytes(np_, hp, 4)       # h0 (f32)
        + 2 * _vmem_tile_bytes(np_, np_, 2)    # adj (bf16, resident)
        + 2 * _vmem_tile_bytes(hp, cp, 2)      # w_out (bf16)
        + 2 * _vmem_tile_bytes(1, cp, 4)       # b_out
        + 2 * _vmem_tile_bytes(np_, cp, 4)     # logits output buffer
        + _vmem_tile_bytes(np_, hp, 2)         # h scratch (bf16)
    )
    vmem_limit = int(min(vmem_bytes + (16 << 20), 48 << 20))

    kernel = functools.partial(_appnp_kernel, num_layers=num_layers)

    out_p = pl.pallas_call(
        kernel,
        out_shape=jax.ShapeDtypeStruct((np_, cp), jnp.float32),
        grid_spec=pltpu.PrefetchScalarGridSpec(
            num_scalar_prefetch=0,
            grid=(1,),
            in_specs=[
                pl.BlockSpec((np_, hp), lambda i: (0, 0)),    # h0   (resident)
                pl.BlockSpec((np_, np_), lambda i: (0, 0)),   # adj  (resident)
                pl.BlockSpec((hp, cp), lambda i: (0, 0)),     # w_out
                pl.BlockSpec((1, cp), lambda i: (0, 0)),      # b_out
            ],
            out_specs=pl.BlockSpec((np_, cp), lambda i: (0, 0)),
            scratch_shapes=[
                pltpu.VMEM((np_, hp), jnp.bfloat16),          # h (current state)
            ],
        ),
        compiler_params=pltpu.CompilerParams(
            dimension_semantics=("arbitrary",),
            vmem_limit_bytes=vmem_limit,
        ),
    )(h0_p, adj_p, w_out_p, b_out_p)

    return out_p[:n, :c_dim]


# ------------------------------ reference ---------------------------------- #

def appnp_reference(params, x, adj, num_layers):
    """Pure-JAX reference mirroring the kernel math (incl. bf16 h/adj/w_out)."""
    mean = jnp.mean(x, axis=0)
    var = jnp.mean((x - mean) ** 2, axis=0)
    xn = (x - mean) / jnp.sqrt(var + EPS)
    h0 = jnp.maximum(xn @ params["w_in"] + params["b_in"], 0.0)
    h = h0.astype(jnp.bfloat16)
    adj_b = adj.astype(jnp.bfloat16)
    for _ in range(num_layers):
        ah = jnp.dot(adj_b, h, preferred_element_type=jnp.float32)
        h = ((1.0 - ALPHA) * ah + ALPHA * h0).astype(jnp.bfloat16)
    return (jnp.dot(h, params["w_out"].astype(jnp.bfloat16),
                    preferred_element_type=jnp.float32)
            + params["b_out"])


# ------------------------------ setup / main -------------------------------- #

def _linear_init(key, fan_in, fan_out):
    """PyTorch nn.Linear default init: U(-1/sqrt(fan_in), 1/sqrt(fan_in))."""
    kw, kb = jax.random.split(key)
    bound = 1.0 / jnp.sqrt(fan_in)
    w = jax.random.uniform(kw, (fan_in, fan_out), jnp.float32, -bound, bound)
    b = jax.random.uniform(kb, (1, fan_out), jnp.float32, -bound, bound)
    return w, b


def make_adjacency(key, n):
    """Random symmetric normalized adjacency with self-loops: D^-1/2 (A+I) D^-1/2."""
    a = (jax.random.uniform(key, (n, n)) < 0.1).astype(jnp.float32)
    a = jnp.maximum(a, a.T)
    a = a + jnp.eye(n, dtype=jnp.float32)
    deg = jnp.sum(a, axis=1)
    d_inv_sqrt = 1.0 / jnp.sqrt(deg)
    return a * d_inv_sqrt[:, None] * d_inv_sqrt[None, :]


if __name__ == "__main__":
    N, F, H, C = 384, 16, 32, 8     # nodes, features_dim, hidden_dim, num_classes
    NUM_LAYERS = 3

    key = jax.random.PRNGKey(0)
    kx, kadj, kin, kout = jax.random.split(key, 4)

    x = jax.random.normal(kx, (N, F), dtype=jnp.float32)
    adj = make_adjacency(kadj, N)

    w_in, b_in = _linear_init(kin, F, H)
    w_out, b_out = _linear_init(kout, H, C)
    params = {"w_in": w_in, "b_in": b_in, "w_out": w_out, "b_out": b_out}

    out = appnp_forward(params, x, adj, NUM_LAYERS)
    out = jax.block_until_ready(out)

    ref = jax.block_until_ready(appnp_reference(params, x, adj, NUM_LAYERS))

    assert out.shape == (N, C), out.shape
    assert jnp.all(jnp.isfinite(out)), "non-finite output"
    max_err = float(jnp.max(jnp.abs(out - ref)))
    assert max_err < 2e-2, f"kernel/reference mismatch: max abs err {max_err}"
    print("KERNEL_OK")
</pallas_src>

<mosaic_0001>
module attributes {stable_mosaic.version = 11 : i64} {
  func.func @_appnp_kernel(%arg0: i32, %arg1: memref<384x128xf32, #tpu.memory_space<vmem>>, %arg2: memref<384x384xbf16, #tpu.memory_space<vmem>>, %arg3: memref<128x128xbf16, #tpu.memory_space<vmem>>, %arg4: memref<1x128xf32, #tpu.memory_space<vmem>>, %arg5: memref<384x128xf32, #tpu.memory_space<vmem>>, %arg6: memref<384x128xbf16, #tpu.memory_space<vmem>>) attributes {dimension_semantics = [#tpu.dimension_semantics<arbitrary>], iteration_bounds = array<i64: 1>, scalar_prefetch = 0 : i64, scratch_operands = 1 : i64, tpu.core_type = #tpu.core_type<tc>, window_params = [{pipeline_mode = #tpu.pipeline_mode<synchronous>, transform_indices = @transform_0, window_bounds = array<i64: 384, 128>}, {pipeline_mode = #tpu.pipeline_mode<synchronous>, transform_indices = @transform_1, window_bounds = array<i64: 384, 384>}, {pipeline_mode = #tpu.pipeline_mode<synchronous>, transform_indices = @transform_2, window_bounds = array<i64: 128, 128>}, {pipeline_mode = #tpu.pipeline_mode<synchronous>, transform_indices = @transform_3, window_bounds = array<i64: 1, 128>}, {pipeline_mode = #tpu.pipeline_mode<synchronous>, transform_indices = @transform_4, window_bounds = array<i64: 384, 128>}]} {
    %c0 = arith.constant 0 : index
    %c0_0 = arith.constant 0 : index
    %0 = vector.load %arg1[%c0, %c0_0] : memref<384x128xf32, #tpu.memory_space<vmem>>, vector<384x128xf32>
    %1 = arith.truncf %0 : vector<384x128xf32> to vector<384x128xbf16>
    %c0_1 = arith.constant 0 : index
    %c0_2 = arith.constant 0 : index
    %2 = vector.load %arg6[%c0_1, %c0_2] : memref<384x128xbf16, #tpu.memory_space<vmem>>, vector<384x128xbf16>
    tpu.vector_store %arg6[%c0_1, %c0_2], %1 {strides = array<i32>} : memref<384x128xbf16, #tpu.memory_space<vmem>>, vector<384x128xbf16>,
    %c0_i32 = arith.constant 0 : i32
    %c0_3 = arith.constant 0 : index
    %c0_4 = arith.constant 0 : index
    %3 = vector.load %arg2[%c0_3, %c0_4] : memref<384x384xbf16, #tpu.memory_space<vmem>>, vector<384x384xbf16>
    %c0_5 = arith.constant 0 : index
    %c0_6 = arith.constant 0 : index
    %4 = vector.load %arg6[%c0_5, %c0_6] : memref<384x128xbf16, #tpu.memory_space<vmem>>, vector<384x128xbf16>
    %cst = arith.constant dense<0.000000e+00> : vector<384x128xf32>
    %5 = tpu.matmul %3, %4, %cst {dimension_numbers = #tpu.dot_dimension_numbers<[1], [0], [0], [1], [0, 0, 1, 1], [], []>} : vector<384x384xbf16>, vector<384x128xbf16>, vector<384x128xf32> -> vector<384x128xf32>
    %cst_7 = arith.constant 0.899999976 : f32
    %6 = vector.broadcast %cst_7 : f32 to vector<384x128xf32>
    %7 = arith.mulf %6, %5 : vector<384x128xf32>
    %c0_8 = arith.constant 0 : index
    %c0_9 = arith.constant 0 : index
    %8 = vector.load %arg1[%c0_8, %c0_9] : memref<384x128xf32, #tpu.memory_space<vmem>>, vector<384x128xf32>
    %cst_10 = arith.constant 1.000000e-01 : f32
    %9 = vector.broadcast %cst_10 : f32 to vector<384x128xf32>
    %10 = arith.mulf %9, %8 : vector<384x128xf32>
    %11 = arith.addf %7, %10 : vector<384x128xf32>
    %12 = arith.truncf %11 : vector<384x128xf32> to vector<384x128xbf16>
    %c0_11 = arith.constant 0 : index
    %c0_12 = arith.constant 0 : index
    %13 = vector.load %arg6[%c0_11, %c0_12] : memref<384x128xbf16, #tpu.memory_space<vmem>>, vector<384x128xbf16>
    tpu.vector_store %arg6[%c0_11, %c0_12], %12 {strides = array<i32>} : memref<384x128xbf16, #tpu.memory_space<vmem>>, vector<384x128xbf16>,
    %c1_i32 = arith.constant 1 : i32
    %c0_13 = arith.constant 0 : index
    %c0_14 = arith.constant 0 : index
    %14 = vector.load %arg2[%c0_13, %c0_14] : memref<384x384xbf16, #tpu.memory_space<vmem>>, vector<384x384xbf16>
    %c0_15 = arith.constant 0 : index
    %c0_16 = arith.constant 0 : index
    %15 = vector.load %arg6[%c0_15, %c0_16] : memref<384x128xbf16, #tpu.memory_space<vmem>>, vector<384x128xbf16>
    %cst_17 = arith.constant dense<0.000000e+00> : vector<384x128xf32>
    %16 = tpu.matmul %14, %15, %cst_17 {dimension_numbers = #tpu.dot_dimension_numbers<[1], [0], [0], [1], [0, 0, 1, 1], [], []>} : vector<384x384xbf16>, vector<384x128xbf16>, vector<384x128xf32> -> vector<384x128xf32>
    %cst_18 = arith.constant 0.899999976 : f32
    %17 = vector.broadcast %cst_18 : f32 to vector<384x128xf32>
    %18 = arith.mulf %17, %16 : vector<384x128xf32>
    %c0_19 = arith.constant 0 : index
    %c0_20 = arith.constant 0 : index
    %19 = vector.load %arg1[%c0_19, %c0_20] : memref<384x128xf32, #tpu.memory_space<vmem>>, vector<384x128xf32>
    %cst_21 = arith.constant 1.000000e-01 : f32
    %20 = vector.broadcast %cst_21 : f32 to vector<384x128xf32>
    %21 = arith.mulf %20, %19 : vector<384x128xf32>
    %22 = arith.addf %18, %21 : vector<384x128xf32>
    %23 = arith.truncf %22 : vector<384x128xf32> to vector<384x128xbf16>
    %c0_22 = arith.constant 0 : index
    %c0_23 = arith.constant 0 : index
    %24 = vector.load %arg6[%c0_22, %c0_23] : memref<384x128xbf16, #tpu.memory_space<vmem>>, vector<384x128xbf16>
    tpu.vector_store %arg6[%c0_22, %c0_23], %23 {strides = array<i32>} : memref<384x128xbf16, #tpu.memory_space<vmem>>, vector<384x128xbf16>,
    %c2_i32 = arith.constant 2 : i32
    %c0_24 = arith.constant 0 : index
    %c0_25 = arith.constant 0 : index
    %25 = vector.load %arg2[%c0_24, %c0_25] : memref<384x384xbf16, #tpu.memory_space<vmem>>, vector<384x384xbf16>
    %c0_26 = arith.constant 0 : index
    %c0_27 = arith.constant 0 : index
    %26 = vector.load %arg6[%c0_26, %c0_27] : memref<384x128xbf16, #tpu.memory_space<vmem>>, vector<384x128xbf16>
    %cst_28 = arith.constant dense<0.000000e+00> : vector<384x128xf32>
    %27 = tpu.matmul %25, %26, %cst_28 {dimension_numbers = #tpu.dot_dimension_numbers<[1], [0], [0], [1], [0, 0, 1, 1], [], []>} : vector<384x384xbf16>, vector<384x128xbf16>, vector<384x128xf32> -> vector<384x128xf32>
    %cst_29 = arith.constant 0.899999976 : f32
    %28 = vector.broadcast %cst_29 : f32 to vector<384x128xf32>
    %29 = arith.mulf %28, %27 : vector<384x128xf32>
    %c0_30 = arith.constant 0 : index
    %c0_31 = arith.constant 0 : index
    %30 = vector.load %arg1[%c0_30, %c0_31] : memref<384x128xf32, #tpu.memory_space<vmem>>, vector<384x128xf32>
    %cst_32 = arith.constant 1.000000e-01 : f32
    %31 = vector.broadcast %cst_32 : f32 to vector<384x128xf32>
    %32 = arith.mulf %31, %30 : vector<384x128xf32>
    %33 = arith.addf %29, %32 : vector<384x128xf32>
    %34 = arith.truncf %33 : vector<384x128xf32> to vector<384x128xbf16>
    %c0_33 = arith.constant 0 : index
    %c0_34 = arith.constant 0 : index
    %35 = vector.load %arg6[%c0_33, %c0_34] : memref<384x128xbf16, #tpu.memory_space<vmem>>, vector<384x128xbf16>
    tpu.vector_store %arg6[%c0_33, %c0_34], %34 {strides = array<i32>} : memref<384x128xbf16, #tpu.memory_space<vmem>>, vector<384x128xbf16>,
    %c0_35 = arith.constant 0 : index
    %c0_36 = arith.constant 0 : index
    %36 = vector.load %arg6[%c0_35, %c0_36] : memref<384x128xbf16, #tpu.memory_space<vmem>>, vector<384x128xbf16>
    %c0_37 = arith.constant 0 : index
    %c0_38 = arith.constant 0 : index
    %37 = vector.load %arg3[%c0_37, %c0_38] : memref<128x128xbf16, #tpu.memory_space<vmem>>, vector<128x128xbf16>
    %cst_39 = arith.constant dense<0.000000e+00> : vector<384x128xf32>
    %38 = tpu.matmul %36, %37, %cst_39 {dimension_numbers = #tpu.dot_dimension_numbers<[1], [0], [0], [1], [0, 0, 1, 1], [], []>} : vector<384x128xbf16>, vector<128x128xbf16>, vector<384x128xf32> -> vector<384x128xf32>
    %c0_40 = arith.constant 0 : index
    %c0_41 = arith.constant 0 : index
    %39 = vector.load %arg4[%c0_40, %c0_41] : memref<1x128xf32, #tpu.memory_space<vmem>>, vector<1x128xf32>
    %40 = vector.broadcast %39 : vector<1x128xf32> to vector<384x128xf32>
    %41 = arith.addf %38, %40 : vector<384x128xf32>
    %c0_42 = arith.constant 0 : index
    %c0_43 = arith.constant 0 : index
    %42 = vector.load %arg5[%c0_42, %c0_43] : memref<384x128xf32, #tpu.memory_space<vmem>>, vector<384x128xf32>
    tpu.vector_store %arg5[%c0_42, %c0_43], %41 {strides = array<i32>} : memref<384x128xf32, #tpu.memory_space<vmem>>, vector<384x128xf32>,
    return
  }
  func.func @transform_0(%arg0: i32) -> (i32, i32) {
    %c0_i32 = arith.constant 0 : i32
    %c0_i32_0 = arith.constant 0 : i32
    %c0_i32_1 = arith.constant 0 : i32
    return %c0_i32, %c0_i32_0 : i32, i32
  }
  func.func @transform_1(%arg0: i32) -> (i32, i32) {
    %c0_i32 = arith.constant 0 : i32
    %c0_i32_0 = arith.constant 0 : i32
    %c0_i32_1 = arith.constant 0 : i32
    return %c0_i32, %c0_i32_0 : i32, i32
  }
  func.func @transform_2(%arg0: i32) -> (i32, i32) {
    %c0_i32 = arith.constant 0 : i32
    %c0_i32_0 = arith.constant 0 : i32
    %c0_i32_1 = arith.constant 0 : i32
    return %c0_i32, %c0_i32_0 : i32, i32
  }
  func.func @transform_3(%arg0: i32) -> (i32, i32) {
    %c0_i32 = arith.constant 0 : i32
    %c0_i32_0 = arith.constant 0 : i32
    %c0_i32_1 = arith.constant 0 : i32
    return %c0_i32, %c0_i32_0 : i32, i32
  }
  func.func @transform_4(%arg0: i32) -> (i32, i32) {
    %c0_i32 = arith.constant 0 : i32
    %c0_i32_0 = arith.constant 0 : i32
    %c0_i32_1 = arith.constant 0 : i32
    return %c0_i32, %c0_i32_0 : i32, i32
  }
}

</mosaic_0001>

<bundles_post_ra>
// kernel: tpu_custom_call.1
= control target key start
LH: loop header
LB: loop body
LE: loop exit
PB: predicated region body
PF: predicated region fallthrough
CT: control target
= control target key end

     0   :  { %9 = vsyncpa [#allocation4], 0  ;;  %s5618_s0 = inlined_call_operand.hbm [shape: f32[384,128], index: 0, kind: input, shape index: {}]   ;;  %s5619_s1 = inlined_call_operand.hbm [shape: bf16[384,384], index: 1, kind: input, shape index: {}]   ;;  %s5620_s2 = inlined_call_operand.hbm [shape: bf16[128,128], index: 2, kind: input, shape index: {}]   ;;  %s5621_s3 = inlined_call_operand.vmem [shape: f32[1,128], index: 3, kind: input, shape index: {}]   ;;  %s5622_s4 = inlined_call_operand.hbm [shape: f32[384,128], index: 4, kind: output, shape index: {}]  }
   0x1   :  { %10 = vsyncpa [#allocation7], 0 }
   0x2   :  { %11 = vsyncpa [#allocation5], 0  ;;  %s5175_s15 = smov [#allocation6]   ;;  %s5081_s19 = scalar_lea.hbm %s5619_s1, 9216 }
   0x3   :  { %s29_s16 = sshll.u32 %s5175_s15, 4  ;;  %p5082_p0 = scmp.ne.s32.totalorder %s5619_s1, %s5081_s19  ;;  %s30_s16 = int_to_ptr.vmem [resolvable:$true] %s29_s16 }
   0x4   :  { %p5085_p1 = scmp.lt.u32.totalorder %s5081_s19, %s5619_s1 }
   0x6   :  { %p5087_p2 = pnand %p5085_p1, %p5082_p0 }
   0x8   :  { %5090 = shalt.err (!%p5087_p2)
}
   0x9   :  { %s5091_s24 = scalar_lea.vmem %s30_s16, 9216  ;;  %p5096_p4 = scmp.lt.s32.totalorder %s30_s16, %s30_s16 }
   0xa   :  { %p5092_p3 = scmp.ne.s32.totalorder %s30_s16, %s5091_s24  ;;  %p5097_p5 = scmp.lt.s32.totalorder %s5091_s24, %s5091_s24 }
   0xc   :  { %p5098_p6 = por %p5097_p5, %p5096_p4 }
   0xe   :  { %p5099_p7 = pnand %p5098_p6, %p5092_p3 }
  0x10   :  { %5102 = shalt.err (!%p5099_p7)
}
  0x11   :  { %s5176_s25 = smov 192   ;;  %s5177_s26 = smov 12  }
  0x12   :  { %35 = dma.hbm_to_vmem [thread:$0]  %s5619_s1, 9216, %s30_s16, [#allocation7], %s5176_s25, %s5176_s25, %s5177_s26  }
  0x13   :  { %s5178_s29 = smov [#allocation3]   ;;  %s5103_s7 = scalar_lea.hbm %s5618_s0, 6144 }
  0x14   :  { %s17_s30 = sshll.u32 %s5178_s29, 4  ;;  %p5104_p8 = scmp.ne.s32.totalorder %s5618_s0, %s5103_s7  ;;  %s18_s30 = int_to_ptr.vmem [resolvable:$true] %s17_s30 }
  0x15   :  { %p5107_p9 = scmp.lt.u32.totalorder %s5103_s7, %s5618_s0 }
  0x17   :  { %p5109_p10 = pnand %p5107_p9, %p5104_p8 }
  0x19   :  { %5112 = shalt.err (!%p5109_p10)
}
  0x1a   :  { %s5113_s12 = scalar_lea.vmem %s18_s30, 6144  ;;  %p5118_p12 = scmp.lt.s32.totalorder %s18_s30, %s18_s30 }
  0x1b   :  { %p5114_p11 = scmp.ne.s32.totalorder %s18_s30, %s5113_s12  ;;  %p5119_p13 = scmp.lt.s32.totalorder %s5113_s12, %s5113_s12 }
  0x1d   :  { %p5120_p0 = por %p5119_p13, %p5118_p12 }
  0x1f   :  { %p5121_p1 = pnand %p5120_p0, %p5114_p11 }
  0x21   :  { %5124 = shalt.err (!%p5121_p1)
}
  0x22   :  { %s5179_s1 = smov 128   ;;  %s5180_s13 = smov 8  }
  0x23   :  { %23 = dma.hbm_to_vmem [thread:$0]  %s5618_s0, 6144, %s18_s30, [#allocation4], %s5179_s1, %s5179_s1, %s5180_s13  }
  0x24   :  { %s5181_s16 = smov [#allocation8]   ;;  %s5125_s20 = scalar_lea.hbm %s5620_s2, 1024 }
  0x25   :  { %s41_s17 = sshll.u32 %s5181_s16, 4  ;;  %p5126_p2 = scmp.ne.s32.totalorder %s5620_s2, %s5125_s20  ;;  %s42_s17 = int_to_ptr.vmem [resolvable:$true] %s41_s17 }
  0x26   :  { %p5129_p3 = scmp.lt.u32.totalorder %s5125_s20, %s5620_s2 }
  0x28   :  { %p5131_p4 = pnand %p5129_p3, %p5126_p2 }
  0x2a   :  { %5134 = shalt.err (!%p5131_p4)
}
  0x2b   :  { %s5135_s25 = scalar_lea.vmem %s42_s17, 1024  ;;  %p5140_p6 = scmp.lt.s32.totalorder %s42_s17, %s42_s17 }
  0x2c   :  { %p5136_p5 = scmp.ne.s32.totalorder %s42_s17, %s5135_s25  ;;  %p5141_p7 = scmp.lt.s32.totalorder %s5135_s25, %s5135_s25 }
  0x2e   :  { %p5142_p8 = por %p5141_p7, %p5140_p6 }
  0x30   :  { %p5143_p9 = pnand %p5142_p8, %p5136_p5 }
  0x32   :  { %5146 = shalt.err (!%p5143_p9)
}
  0x33   :  { %s5182_s0 = smov 64   ;;  %s5183_s26 = smov 4  }
  0x34   :  { %47 = dma.hbm_to_vmem [thread:$0]  %s5620_s2, 1024, %s42_s17, [#allocation7], %s5182_s0, %s5182_s0, %s5183_s26  }
  0x35   :  { %5169 = dma.done.wait [#allocation4], 6144  }
  0x36   :  { %5170 = vsyncadd [#allocation4], 4294961152 }
  0x37   :  { %5171 = dma.done.wait [#allocation7], 10240  }
  0x38   :  { %5172 = vsyncadd [#allocation7], 4294957056  ;;  %v5184_v0 = vmov 0   ;;  %v60_v1 = vld [vmem:[#allocation3] sm:$0xff]  ;;  %v61_v2 = vld [vmem:[#allocation3 + $0x8] sm:$0xff] }
  0x39   :  { %660 = vmatprep.subr.bf16.mxu0 %v5184_v0  ;;  %v62_v3 = vld [vmem:[#allocation3 + $0x10] sm:$0xff]  ;;  %v108_v4 = vpack.c.bf16 %v61_v2, %v60_v1  ;;  %v63_v5 = vld [vmem:[#allocation3 + $0x18] sm:$0xff]  ;;  %v64_v7 = vld [vmem:[#allocation3 + $0x20] sm:$0xff] }
  0x3a   :  { %v109_v6 = vpack.c.bf16 %v63_v5, %v62_v3  ;;  %v65_v8 = vld [vmem:[#allocation3 + $0x28] sm:$0xff]  ;;  %v92_v9 = vld [vmem:[#allocation3 + $0x100] sm:$0xff]  ;;  %v94_v12 = vld [vmem:[#allocation3 + $0x110] sm:$0xff] }
  0x3b   :  { %661 = vmatpush1.bf16.msra.mxu0 %v108_v4  ;;  %v93_v10 = vld [vmem:[#allocation3 + $0x108] sm:$0xff]  ;;  %v110_v13 = vpack.c.bf16 %v65_v8, %v64_v7  ;;  %v66_v14 = vld [vmem:[#allocation3 + $0x30] sm:$0xff]  ;;  %v95_v15 = vld [vmem:[#allocation3 + $0x118] sm:$0xff] }
  0x3c   :  { %662 = vmatprep.subr.bf16.mxu0 %v5184_v0  ;;  %v124_v11 = vpack.c.bf16 %v93_v10, %v92_v9  ;;  %v67_v16 = vld [vmem:[#allocation3 + $0x38] sm:$0xff]  ;;  %v125_v17 = vpack.c.bf16 %v95_v15, %v94_v12  ;;  %v96_v18 = vld [vmem:[#allocation3 + $0x120] sm:$0xff]  ;;  %v97_v19 = vld [vmem:[#allocation3 + $0x128] sm:$0xff] }
  0x3d   :  { %v126_v20 = vpack.c.bf16 %v97_v19, %v96_v18  ;;  %v111_v21 = vpack.c.bf16 %v67_v16, %v66_v14  ;;  %v98_v22 = vld [vmem:[#allocation3 + $0x130] sm:$0xff]  ;;  %v99_v23 = vld [vmem:[#allocation3 + $0x138] sm:$0xff]  ;;  %v68_v24 = vld [vmem:[#allocation3 + $0x40] sm:$0xff] }
  0x3e   :  { %4477 = vmatprep.subr.bf16.mxu1 %v124_v11  ;;  %v69_v25 = vld [vmem:[#allocation3 + $0x48] sm:$0xff]  ;;  %v70_v26 = vld [vmem:[#allocation3 + $0x50] sm:$0xff]  ;;  %v127_v27 = vpack.c.bf16 %v99_v23, %v98_v22  ;;  %v71_v29 = vld [vmem:[#allocation3 + $0x58] sm:$0xff] }
  0x3f   :  { %663 = vmatpush1.bf16.msra.mxu0 %v109_v6  ;;  %4478 = vmatpush3.bf16.msra.mxu1 %v124_v11  ;;  %v112_v28 = vpack.c.bf16 %v69_v25, %v68_v24  ;;  %v100_v30 = vld [vmem:[#allocation3 + $0x140] sm:$0xff]  ;;  %v101_v31 = vld [vmem:[#allocation3 + $0x148] sm:$0xff]  ;;  %v102_v33 = vld [vmem:[#allocation3 + $0x150] sm:$0xff]  ;;  %v113_v36 = vpack.c.bf16 %v71_v29, %v70_v26 }
  0x40   :  { %664 = vmatprep.subr.bf16.mxu0 %v5184_v0  ;;  %4479 = vmatprep.subr.bf16.mxu1 %v125_v17  ;;  %v4760_v32 = vld [vmem:[#allocation6 + $0x8] ss:$12 sps:$4 sm:$0xff]   ;;  %v128_v34 = vpack.c.bf16 %v101_v31, %v100_v30  ;;  %v4763_v35 = vld [vmem:[#allocation6 + $0x4] ss:$12 sps:$4 sm:$0xff]   ;;  %v103_v37 = vld [vmem:[#allocation3 + $0x158] sm:$0xff] }
  0x41   :  { %4493 = vmatprep.mubr.bf16.mxu1 %v4760_v32  ;;  %v72_v38 = vld [vmem:[#allocation3 + $0x60] sm:$0xff]  ;;  %v73_v39 = vld [vmem:[#allocation3 + $0x68] sm:$0xff]  ;;  %692 = vmatprep.mubr.bf16.mxu0 %v4763_v35  ;;  %v74_v40 = vld [vmem:[#allocation3 + $0x70] sm:$0xff]  ;;  %v129_v41 = vpack.c.bf16 %v103_v37, %v102_v33 }
  0x42   :  { %v114_v42 = vpack.c.bf16 %v73_v39, %v72_v38  ;;  %v104_v43 = vld [vmem:[#allocation3 + $0x160] sm:$0xff]  ;;  %v105_v44 = vld [vmem:[#allocation3 + $0x168] sm:$0xff]  ;;  %v75_v45 = vld [vmem:[#allocation3 + $0x78] sm:$0xff] }
  0x43   :  { %665 = vmatpush1.bf16.msra.mxu0 %v110_v13  ;;  %4480 = vmatpush3.bf16.msra.mxu1 %v125_v17  ;;  %v130_v46 = vpack.c.bf16 %v105_v44, %v104_v43  ;;  %v106_v47 = vld [vmem:[#allocation3 + $0x170] sm:$0xff]  ;;  %v115_v48 = vpack.c.bf16 %v75_v45, %v74_v40  ;;  %v107_v49 = vld [vmem:[#allocation3 + $0x178] sm:$0xff]  ;;  %v76_v50 = vld [vmem:[#allocation3 + $0x80] sm:$0xff] }
  0x44   :  { %666 = vmatprep.subr.bf16.mxu0 %v5184_v0  ;;  %4481 = vmatprep.subr.bf16.mxu1 %v126_v20  ;;  %v77_v51 = vld [vmem:[#allocation3 + $0x88] sm:$0xff]  ;;  %v131_v52 = vpack.c.bf16 %v107_v49, %v106_v47  ;;  %v78_v54 = vld [vmem:[#allocation3 + $0x90] sm:$0xff]  ;;  %v79_v55 = vld [vmem:[#allocation3 + $0x98] sm:$0xff] }
  0x45   :  { %v116_v53 = vpack.c.bf16 %v77_v51, %v76_v50  ;;  %v80_v56 = vld [vmem:[#allocation3 + $0xa0] sm:$0xff]  ;;  %v117_v57 = vpack.c.bf16 %v79_v55, %v78_v54  ;;  %v81_v58 = vld [vmem:[#allocation3 + $0xa8] sm:$0xff]  ;;  %v82_v62 = vld [vmem:[#allocation3 + $0xb0] sm:$0xff] }
  0x46   :  { %v4764_v59 = vld [vmem:[#allocation6 + $0x20] ss:$12 sps:$4 sm:$0xff]   ;;  %v4768_v60 = vld [vmem:[#allocation6 + $0x38] ss:$12 sps:$4 sm:$0xff]   ;;  %v118_v61 = vpack.c.bf16 %v81_v58, %v80_v56  ;;  %v4771_v4 = vld [vmem:[#allocation6 + $0x50] ss:$12 sps:$4 sm:$0xff]  }
  0x47   :  { %667 = vmatpush1.bf16.msra.mxu0 %v111_v21  ;;  %4482 = vmatpush3.bf16.msra.mxu1 %v126_v20  ;;  %v83_v63 = vld [vmem:[#allocation3 + $0xb8] sm:$0xff]  ;;  %v84_v2 = vld [vmem:[#allocation3 + $0xc0] sm:$0xff]  ;;  %v85_v3 = vld [vmem:[#allocation3 + $0xc8] sm:$0xff] }
  0x48   :  { %668 = vmatprep.subr.bf16.mxu0 %v5184_v0  ;;  %4483 = vmatprep.subr.bf16.mxu1 %v127_v27  ;;  %v119_v1 = vpack.c.bf16 %v83_v63, %v82_v62  ;;  %v4776_v5 = vld [vmem:[#allocation6 + $0x68] ss:$12 sps:$4 sm:$0xff]   ;;  %v120_v6 = vpack.c.bf16 %v85_v3, %v84_v2  ;;  %v87_v8 = vld [vmem:[#allocation3 + $0xd8] sm:$0xff]  ;;  %v88_v10 = vld [vmem:[#allocation3 + $0xe0] sm:$0xff] }
  0x49   :  { %v86_v7 = vld [vmem:[#allocation3 + $0xd0] sm:$0xff]  ;;  %v89_v11 = vld [vmem:[#allocation3 + $0xe8] sm:$0xff]  ;;  %v4784_v13 = vld [vmem:[#allocation6 + $0x98] ss:$12 sps:$4 sm:$0xff]  }
  0x4a   :  { %v121_v9 = vpack.c.bf16 %v87_v8, %v86_v7  ;;  %v4779_v12 = vld [vmem:[#allocation6 + $0x80] ss:$12 sps:$4 sm:$0xff]   ;;  %v90_v14 = vld [vmem:[#allocation3 + $0xf0] sm:$0xff]  ;;  %v91_v15 = vld [vmem:[#allocation3 + $0xf8] sm:$0xff]  ;;  %v122_v16 = vpack.c.bf16 %v89_v11, %v88_v10 }
  0x4b   :  { %669 = vmatpush1.bf16.msra.mxu0 %v112_v28  ;;  %4484 = vmatpush3.bf16.msra.mxu1 %v127_v27  ;;  %v4787_v17 = vld [vmem:[#allocation6 + $0xb0] ss:$12 sps:$4 sm:$0xff]   ;;  %v123_v18 = vpack.c.bf16 %v91_v15, %v90_v14  ;;  %v4792_v19 = vld [vmem:[#allocation6 + $0xc8] ss:$12 sps:$4 sm:$0xff]   ;;  %v4761_v20 = vld [vmem:[#allocation6] ss:$12 sps:$4 sm:$0xff]  }
  0x4c   :  { %670 = vmatprep.subr.bf16.mxu0 %v5184_v0  ;;  %4485 = vmatprep.subr.bf16.mxu1 %v128_v34  ;;  %v4765_v21 = vld [vmem:[#allocation6 + $0x1c] ss:$12 sps:$4 sm:$0xff]   ;;  %v4795_v22 = vld [vmem:[#allocation6 + $0xe0] ss:$12 sps:$4 sm:$0xff]   ;;  %v4800_v23 = vld [vmem:[#allocation6 + $0xf8] ss:$12 sps:$4 sm:$0xff]  }
  0x4d   :  { %v4767_v24 = vld [vmem:[#allocation6 + $0x18] ss:$12 sps:$4 sm:$0xff]   ;;  %v4769_v25 = vld [vmem:[#allocation6 + $0x34] ss:$12 sps:$4 sm:$0xff]   ;;  %v4803_v26 = vld [vmem:[#allocation6 + $0x110] ss:$12 sps:$4 sm:$0xff]  }
  0x4e   :  { %v4808_v27 = vld [vmem:[#allocation6 + $0x128] ss:$12 sps:$4 sm:$0xff]   ;;  %v4772_v28 = vld [vmem:[#allocation6 + $0x30] ss:$12 sps:$4 sm:$0xff]   ;;  %v4773_v29 = vld [vmem:[#allocation6 + $0x4c] ss:$12 sps:$4 sm:$0xff]  }
  0x4f   :  { %671 = vmatpush1.bf16.msra.mxu0 %v113_v36  ;;  %4486 = vmatpush3.bf16.msra.mxu1 %v128_v34  ;;  %v4811_v30 = vld [vmem:[#allocation6 + $0x140] ss:$12 sps:$4 sm:$0xff]   ;;  %v4816_v31 = vld [vmem:[#allocation6 + $0x158] ss:$12 sps:$4 sm:$0xff]   ;;  %v4775_v32 = vld [vmem:[#allocation6 + $0x48] ss:$12 sps:$4 sm:$0xff]  }
  0x50   :  { %672 = vmatprep.subr.bf16.mxu0 %v5184_v0  ;;  %4487 = vmatprep.subr.bf16.mxu1 %v129_v41  ;;  %v4777_v33 = vld [vmem:[#allocation6 + $0x64] ss:$12 sps:$4 sm:$0xff]   ;;  %v4824_v35 = vld [vmem:[#allocation6 + $0x188] ss:$12 sps:$4 sm:$0xff]   ;;  %v4780_v36 = vld [vmem:[#allocation6 + $0x60] ss:$12 sps:$4 sm:$0xff]  }
  0x51   :  { %v4819_v34 = vld [vmem:[#allocation6 + $0x170] ss:$12 sps:$4 sm:$0xff]   ;;  %v4825_v38 = vld [vmem:[#allocation6 + $0x1a0] ss:$12 sps:$4 sm:$0xff]   ;;  %v4834_v39 = vld [vmem:[#allocation6 + $0x1b8] ss:$12 sps:$4 sm:$0xff]  }
  0x52   :  { %v4781_v37 = vld [vmem:[#allocation6 + $0x7c] ss:$12 sps:$4 sm:$0xff]   ;;  %v4783_v40 = vld [vmem:[#allocation6 + $0x78] ss:$12 sps:$4 sm:$0xff]   ;;  %v4796_v51 = vld [vmem:[#allocation6 + $0xc0] ss:$12 sps:$4 sm:$0xff]  }
  0x53   :  { %673 = vmatpush1.bf16.msra.mxu0 %v114_v42  ;;  %4488 = vmatpush3.bf16.msra.mxu1 %v129_v41  ;;  %v4785_v41 = vld [vmem:[#allocation6 + $0x94] ss:$12 sps:$4 sm:$0xff]   ;;  %v4836_v42 = vld [vmem:[#allocation6 + $0x1d0] ss:$12 sps:$4 sm:$0xff]   ;;  %v4789_v45 = vld [vmem:[#allocation6 + $0xac] ss:$12 sps:$4 sm:$0xff]  }
  0x54   :  { %674 = vmatprep.subr.bf16.mxu0 %v5184_v0  ;;  %4489 = vmatprep.subr.bf16.mxu1 %v130_v46  ;;  %v4842_v43 = vld [vmem:[#allocation6 + $0x1e8] ss:$12 sps:$4 sm:$0xff]   ;;  %v4788_v44 = vld [vmem:[#allocation6 + $0x90] ss:$12 sps:$4 sm:$0xff]   ;;  %v4850_v47 = vld [vmem:[#allocation6 + $0x218] ss:$12 sps:$4 sm:$0xff]  }
  0x55   :  { %v4793_v49 = vld [vmem:[#allocation6 + $0xc4] ss:$12 sps:$4 sm:$0xff]   ;;  %v4801_v54 = vld [vmem:[#allocation6 + $0xf4] ss:$12 sps:$4 sm:$0xff]   ;;  %v4805_v56 = vld [vmem:[#allocation6 + $0x10c] ss:$12 sps:$4 sm:$0xff]  }
  0x56   :  { %v4852_v50 = vld [vmem:[#allocation6 + $0x230] ss:$12 sps:$4 sm:$0xff]   ;;  %v4817_v62 = vld [vmem:[#allocation6 + $0x154] ss:$12 sps:$4 sm:$0xff]   ;;  %v4847_v14 = vld [vmem:[#allocation6 + $0x1f8] ss:$12 sps:$4 sm:$0xff]  }
  0x57   :  { %675 = vmatpush1.bf16.msra.mxu0 %v115_v48  ;;  %4490 = vmatpush3.bf16.msra.mxu1 %v130_v46  ;;  %v4844_v46 = vld [vmem:[#allocation6 + $0x200] ss:$12 sps:$4 sm:$0xff]   ;;  %v4791_v48 = vld [vmem:[#allocation6 + $0xa8] ss:$12 sps:$4 sm:$0xff]   ;;  %v4804_v55 = vld [vmem:[#allocation6 + $0xf0] ss:$12 sps:$4 sm:$0xff]  }
  0x58   :  { %676 = vmatprep.subr.bf16.mxu0 %v5184_v0  ;;  %4491 = vmatprep.subr.bf16.mxu1 %v131_v52  ;;  %v4809_v58 = vld [vmem:[#allocation6 + $0x124] ss:$12 sps:$4 sm:$0xff]   ;;  %v4823_v2 = vld [vmem:[#allocation6 + $0x168] ss:$12 sps:$4 sm:$0xff]  }
  0x59   :  { %v4820_v63 = vld [vmem:[#allocation6 + $0x150] ss:$12 sps:$4 sm:$0xff]   ;;  %v4832_v7 = vld [vmem:[#allocation6 + $0x1b4] ss:$12 sps:$4 sm:$0xff]  }
  0x5a   :  { %v4826_v3 = vld [vmem:[#allocation6 + $0x184] ss:$12 sps:$4 sm:$0xff]   ;;  %v4839_v10 = vld [vmem:[#allocation6 + $0x1c8] ss:$12 sps:$4 sm:$0xff]  }
  0x5b   :  { %677 = vmatpush1.bf16.msra.mxu0 %v116_v53  ;;  %4492 = vmatpush3.bf16.msra.mxu1 %v131_v52  ;;  %v4797_v52 = vld [vmem:[#allocation6 + $0xdc] ss:$12 sps:$4 sm:$0xff]   ;;  %v4799_v53 = vld [vmem:[#allocation6 + $0xd8] ss:$12 sps:$4 sm:$0xff]   ;;  %v4848_v15 = vld [vmem:[#allocation6 + $0x214] ss:$12 sps:$4 sm:$0xff]  }
  0x5c   :  { %678 = vmatprep.subr.bf16.mxu0 %v5184_v0  ;;  %1854 = vmatprep.subr.bf16.mxu1 %v5184_v0  ;;  %v4835_v8 = vld [vmem:[#allocation6 + $0x1b0] ss:$12 sps:$4 sm:$0xff]  }
  0x5d   :  { %v4840_v11 = vld [vmem:[#allocation6 + $0x1e4] ss:$12 sps:$4 sm:$0xff]  }
  0x5e   :  { %4494 = vmatmul.mubr.bf16.vlgmr.msra.gmra.mrb[0].mxu1 %v4764_v59  ;;  %v4812_v59 = vld [vmem:[#allocation6 + $0x120] ss:$12 sps:$4 sm:$0xff]  }
  0x5f   :  { %679 = vmatpush1.bf16.msra.mxu0 %v117_v57  ;;  %4497 = vmatprep.mubr.bf16.mxu1 %v4768_v60  ;;  %v4807_v57 = vld [vmem:[#allocation6 + $0x108] ss:$12 sps:$4 sm:$0xff]  }
  0x60   :  { %680 = vmatprep.subr.bf16.mxu0 %v5184_v0  ;;  %v4813_v60 = vld [vmem:[#allocation6 + $0x13c] ss:$12 sps:$4 sm:$0xff]  }
  0x63   :  { %681 = vmatpush1.bf16.msra.mxu0 %v118_v61  ;;  %v4815_v61 = vld [vmem:[#allocation6 + $0x138] ss:$12 sps:$4 sm:$0xff]  }
  0x64   :  { %682 = vmatprep.subr.bf16.mxu0 %v5184_v0 }
  0x66   :  { %4498 = vmatmul.mubr.bf16.gmra.mrb[4].mxu1 %v4771_v4  ;;  %v4828_v4 = vld [vmem:[#allocation6 + $0x180] ss:$12 sps:$4 sm:$0xff]  }
  0x67   :  { %683 = vmatpush1.bf16.msra.mxu0 %v119_v1  ;;  %4501 = vmatprep.mubr.bf16.mxu1 %v4776_v5  ;;  %v4821_v1 = vld [vmem:[#allocation6 + $0x16c] ss:$12 sps:$4 sm:$0xff]   ;;  %v4829_v5 = vld [vmem:[#allocation6 + $0x19c] ss:$12 sps:$4 sm:$0xff]  }
  0x68   :  { %684 = vmatprep.subr.bf16.mxu0 %v5184_v0 }
  0x6b   :  { %685 = vmatpush1.bf16.msra.mxu0 %v120_v6  ;;  %v4831_v6 = vld [vmem:[#allocation6 + $0x198] ss:$12 sps:$4 sm:$0xff]  }
  0x6c   :  { %686 = vmatprep.subr.bf16.mxu0 %v5184_v0 }
  0x6e   :  { %4502 = vmatmul.mubr.bf16.gmra.mrb[8].mxu1 %v4779_v12  ;;  %v4843_v12 = vld [vmem:[#allocation6 + $0x1e0] ss:$12 sps:$4 sm:$0xff]  }
  0x6f   :  { %687 = vmatpush1.bf16.msra.mxu0 %v121_v9  ;;  %4505 = vmatprep.mubr.bf16.mxu1 %v4784_v13  ;;  %v4837_v9 = vld [vmem:[#allocation6 + $0x1cc] ss:$12 sps:$4 sm:$0xff]   ;;  %v4845_v13 = vld [vmem:[#allocation6 + $0x1fc] ss:$12 sps:$4 sm:$0xff]  }
  0x70   :  { %688 = vmatprep.subr.bf16.mxu0 %v5184_v0 }
  0x73   :  { %689 = vmatpush1.bf16.msra.mxu0 %v122_v16  ;;  %v4851_v16 = vld [vmem:[#allocation6 + $0x210] ss:$12 sps:$4 sm:$0xff]  }
  0x74   :  { %690 = vmatprep.subr.bf16.mxu0 %v5184_v0 }
  0x76   :  { %4506 = vmatmul.mubr.bf16.gmra.mrb[12].mxu1 %v4787_v17  ;;  %v4853_v17 = vld [vmem:[#allocation6 + $0x22c] ss:$12 sps:$4 sm:$0xff]  }
  0x77   :  { %691 = vmatpush1.bf16.msra.mxu0 %v123_v18  ;;  %4509 = vmatprep.mubr.bf16.mxu1 %v4792_v19  ;;  %v4855_v18 = vld [vmem:[#allocation6 + $0x228] ss:$12 sps:$4 sm:$0xff]  }
  0x7a   :  { %693 = vmatmul.mubr.bf16.vlgmr.msra.gmra.mrb[0].mxu0 %v4761_v20 }
  0x7b   :  { %700 = vmatprep.mubr.bf16.mxu0 %v4765_v21 }
  0x7e   :  { %4510 = vmatmul.mubr.bf16.gmra.mrb[16].mxu1 %v4795_v22 }
  0x7f   :  { %4513 = vmatprep.mubr.bf16.mxu1 %v4800_v23 }
  0x82   :  { %701 = vmatmul.mubr.bf16.gmra.mrb[4].mxu0 %v4767_v24 }
  0x83   :  { %708 = vmatprep.mubr.bf16.mxu0 %v4769_v25 }
  0x86   :  { %4514 = vmatmul.mubr.bf16.gmra.mrb[20].mxu1 %v4803_v26 }
  0x87   :  { %4517 = vmatprep.mubr.bf16.mxu1 %v4808_v27 }
  0x8a   :  { %709 = vmatmul.mubr.bf16.gmra.mrb[8].mxu0 %v4772_v28 }
  0x8b   :  { %716 = vmatprep.mubr.bf16.mxu0 %v4773_v29 }
  0x8e   :  { %4518 = vmatmul.mubr.bf16.gmra.mrb[24].mxu1 %v4811_v30 }
  0x8f   :  { %4521 = vmatprep.mubr.bf16.mxu1 %v4816_v31 }
  0x92   :  { %717 = vmatmul.mubr.bf16.gmra.mrb[12].mxu0 %v4775_v32 }
  0x93   :  { %724 = vmatprep.mubr.bf16.mxu0 %v4777_v33 }
  0x96   :  { %4522 = vmatmul.mubr.bf16.gmra.mrb[28].mxu1 %v4819_v34 }
  0x97   :  { %4525 = vmatprep.mubr.bf16.mxu1 %v4824_v35 }
  0x9a   :  { %725 = vmatmul.mubr.bf16.gmra.mrb[16].mxu0 %v4780_v36 }
  0x9b   :  { %732 = vmatprep.mubr.bf16.mxu0 %v4781_v37 }
  0x9e   :  { %4526 = vmatmul.mubr.bf16.gmra.mrb[32].mxu1 %v4825_v38  ;;  %v5056_v38 = vld [vmem:[#allocation3] sm:$0xff] }
  0x9f   :  { %4529 = vmatprep.mubr.bf16.mxu1 %v4834_v39  ;;  %v1206_v39 = vmul.f32 0.1, %v5056_v38 }
  0xa2   :  { %733 = vmatmul.mubr.bf16.gmra.mrb[20].mxu0 %v4783_v40 }
  0xa3   :  { %740 = vmatprep.mubr.bf16.mxu0 %v4785_v41 }
  0xa6   :  { %4530 = vmatmul.mubr.bf16.gmra.mrb[36].mxu1 %v4836_v42 }
  0xa7   :  { %4533 = vmatprep.mubr.bf16.mxu1 %v4842_v43  ;;  %v5057_v43 = vld [vmem:[#allocation3 + $0x8] sm:$0xff] }
  0xaa   :  { %741 = vmatmul.mubr.bf16.gmra.mrb[24].mxu0 %v4788_v44  ;;  %v1207_v44 = vmul.f32 0.1, %v5057_v43  ;;  %v5062_v43 = vld [vmem:[#allocation3 + $0x30] sm:$0xff] }
  0xab   :  { %748 = vmatprep.mubr.bf16.mxu0 %v4789_v45 }
  0xae   :  { %4534 = vmatmul.mubr.bf16.gmra.mrb[40].mxu1 %v4844_v46  ;;  %v4858_v46 = vld [vmem:[#allocation6 + $0x4] ss:$12 sps:$4 sm:$0xff]  }
  0xaf   :  { %4537 = vmatprep.mubr.bf16.mxu1 %v4850_v47 }
  0xb2   :  { %749 = vmatmul.mubr.bf16.gmra.mrb[28].mxu0 %v4791_v48 }
  0xb3   :  { %756 = vmatprep.mubr.bf16.mxu0 %v4793_v49 }
  0xb6   :  { %4538 = vmatmul.mubr.bf16.gmra.mrb[44].mxu1 %v4852_v50 }
  0xb7   :  { %1886 = vmatprep.mubr.bf16.mxu1 %v4858_v46 }
  0xba   :  { %757 = vmatmul.mubr.bf16.gmra.mrb[32].mxu0 %v4796_v51 }
  0xbb   :  { %764 = vmatprep.mubr.bf16.mxu0 %v4797_v52 }
  0xc2   :  { %765 = vmatmul.mubr.bf16.gmra.mrb[36].mxu0 %v4799_v53 }
  0xc3   :  { %772 = vmatprep.mubr.bf16.mxu0 %v4801_v54 }
  0xca   :  { %773 = vmatmul.mubr.bf16.gmra.mrb[40].mxu0 %v4804_v55 }
  0xcb   :  { %780 = vmatprep.mubr.bf16.mxu0 %v4805_v56 }
  0xd2   :  { %781 = vmatmul.mubr.bf16.gmra.mrb[44].mxu0 %v4807_v57 }
  0xd3   :  { %788 = vmatprep.mubr.bf16.mxu0 %v4809_v58  ;;  %v5058_v58 = vld [vmem:[#allocation3 + $0x10] sm:$0xff] }
  0xda   :  { %789 = vmatmul.mubr.bf16.gmra.mrb[48].mxu0 %v4812_v59  ;;  %v1208_v59 = vmul.f32 0.1, %v5058_v58 }
  0xdb   :  { %796 = vmatprep.mubr.bf16.mxu0 %v4813_v60 }
  0xe2   :  { %797 = vmatmul.mubr.bf16.gmra.mrb[52].mxu0 %v4815_v61 }
  0xe3   :  { %804 = vmatprep.mubr.bf16.mxu0 %v4817_v62 }
  0xea   :  { %805 = vmatmul.mubr.bf16.gmra.mrb[56].mxu0 %v4820_v63  ;;  %v5059_v63 = vld [vmem:[#allocation3 + $0x18] sm:$0xff] }
  0xeb   :  { %812 = vmatprep.mubr.bf16.mxu0 %v4821_v1  ;;  %v1209_v1 = vmul.f32 0.1, %v5059_v63 }
  0xf2   :  { %813 = vmatmul.mubr.bf16.gmra.mrb[60].mxu0 %v4823_v2 }
  0xf3   :  { %820 = vmatprep.mubr.bf16.mxu0 %v4826_v3 }
  0xfa   :  { %821 = vmatmul.mubr.bf16.gmra.mrb[64].mxu0 %v4828_v4 }
  0xfb   :  { %828 = vmatprep.mubr.bf16.mxu0 %v4829_v5 }
 0x102   :  { %829 = vmatmul.mubr.bf16.gmra.mrb[68].mxu0 %v4831_v6 }
 0x103   :  { %836 = vmatprep.mubr.bf16.mxu0 %v4832_v7 }
 0x10a   :  { %837 = vmatmul.mubr.bf16.gmra.mrb[72].mxu0 %v4835_v8 }
 0x10b   :  { %844 = vmatprep.mubr.bf16.mxu0 %v4837_v9 }
 0x112   :  { %845 = vmatmul.mubr.bf16.gmra.mrb[76].mxu0 %v4839_v10 }
 0x113   :  { %852 = vmatprep.mubr.bf16.mxu0 %v4840_v11 }
 0x11a   :  { %853 = vmatmul.mubr.bf16.gmra.mrb[80].mxu0 %v4843_v12 }
 0x11b   :  { %860 = vmatprep.mubr.bf16.mxu0 %v4845_v13 }
 0x122   :  { %861 = vmatmul.mubr.bf16.gmra.mrb[84].mxu0 %v4847_v14  ;;  %v5060_v14 = vld [vmem:[#allocation3 + $0x20] sm:$0xff] }
 0x123   :  { %868 = vmatprep.mubr.bf16.mxu0 %v4848_v15  ;;  %v1210_v15 = vmul.f32 0.1, %v5060_v14 }
 0x12a   :  { %869 = vmatmul.mubr.bf16.gmra.mrb[88].mxu0 %v4851_v16 }
 0x12b   :  { %876 = vmatprep.mubr.bf16.mxu0 %v4853_v17 }
 0x131   :  { %v4495_v19 = vpop.f32.mrb[0].mxu1 }
 0x132   :  { %877 = vmatmul.mubr.bf16.gmra.mrb[92].mxu0 %v4855_v18  ;;  %v919_v20 = vpop.f32.mrb[1].mxu1 }
 0x133   :  { %v4496_v21 = vpop.f32.mrb[2].mxu1 }
 0x134   :  { %v922_v22 = vpop.f32.mrb[3].mxu1 }
 0x139   :  { %v5267_v23 = vpop.f32.mrb[4].mxu1 }
 0x13a   :  { %v935_v24 = vpop.f32.mrb[5].mxu1 }
 0x13b   :  { %v5269_v25 = vpop.f32.mrb[6].mxu1 }
 0x13c   :  { %v938_v26 = vpop.f32.mrb[7].mxu1 }
 0x141   :  { %v5271_v27 = vpop.f32.mrb[8].mxu1 }
 0x142   :  { %v5273_v28 = vpop.f32.mrb[9].mxu1 }
 0x143   :  { %v5275_v29 = vpop.f32.mrb[10].mxu1 }
 0x144   :  { %v5277_v30 = vpop.f32.mrb[11].mxu1 }
 0x149   :  { %v5279_v31 = vpop.f32.mrb[12].mxu1 }
 0x14a   :  { %v5281_v32 = vpop.f32.mrb[13].mxu1 }
 0x14b   :  { %v5283_v34 = vpop.f32.mrb[14].mxu1 }
 0x14c   :  { %v5285_v37 = vpop.f32.mrb[15].mxu1 }
 0x14d   :  { %v694_v33 = vpop.f32.mrb[0].mxu0 }
 0x14e   :  { %v920_v35 = vadd.f32 %v919_v20, %v694_v33  ;;  %v696_v36 = vpop.f32.mrb[1].mxu0 }
 0x14f   :  { %v697_v40 = vpop.f32.mrb[2].mxu0 }
 0x150   :  { %v1110_v41 = vmul.f32 0.9, %v920_v35  ;;  %v923_v42 = vadd.f32 %v922_v22, %v697_v40  ;;  %v699_v45 = vpop.f32.mrb[3].mxu0 }
 0x151   :  { %v5287_v48 = vpop.f32.mrb[16].mxu1 }
 0x152   :  { %v1111_v47 = vmul.f32 0.9, %v923_v42  ;;  %v1254_v49 = vadd.f32 %v1206_v39, %v1110_v41  ;;  %v5289_v51 = vpop.f32.mrb[17].mxu1 }
 0x153   :  { %v5291_v53 = vpop.f32.mrb[18].mxu1 }
 0x154   :  { %v1255_v50 = vadd.f32 %v1207_v44, %v1111_v47  ;;  %v5293_v57 = vpop.f32.mrb[19].mxu1  ;;  %v1212_v44 = vmul.f32 0.1, %v5062_v43 }
 0x155   :  { %v702_v52 = vpop.f32.mrb[4].mxu0 }
 0x156   :  { %v1302_v54 = vpack.c.bf16 %v1255_v50, %v1254_v49  ;;  %v928_v55 = vadd.f32 %v4495_v19, %v702_v52  ;;  %v704_v56 = vpop.f32.mrb[5].mxu0  ;;  %v5061_v19 = vld [vmem:[#allocation3 + $0x28] sm:$0xff]  ;;  %v5063_v49 = vld [vmem:[#allocation3 + $0x38] sm:$0xff] }
 0x157   :  { %v705_v60 = vpop.f32.mrb[6].mxu0  ;;  %v1211_v20 = vmul.f32 0.1, %v5061_v19  ;;  %v1213_v50 = vmul.f32 0.1, %v5063_v49 }
 0x158   :  { %v1112_v61 = vmul.f32 0.9, %v928_v55  ;;  %v931_v62 = vadd.f32 %v4496_v21, %v705_v60  ;;  %v707_v2 = vpop.f32.mrb[7].mxu0  ;;  %1855 = vmatpush1.bf16.msra.mxu1 %v1302_v54 }
 0x159   :  { %1856 = vmatprep.subr.bf16.mxu1 %v5184_v0  ;;  %v5296_v4 = vpop.f32.mrb[20].mxu1 }
 0x15a   :  { %v1113_v3 = vmul.f32 0.9, %v931_v62  ;;  %v1256_v5 = vadd.f32 %v1208_v59, %v1112_v61  ;;  %v5298_v7 = vpop.f32.mrb[21].mxu1 }
 0x15b   :  { %v5300_v9 = vpop.f32.mrb[22].mxu1 }
 0x15c   :  { %v1257_v6 = vadd.f32 %v1209_v1, %v1113_v3  ;;  %v5302_v13 = vpop.f32.mrb[23].mxu1  ;;  %v5064_v1 = vld [vmem:[#allocation3 + $0x40] sm:$0xff] }
 0x15d   :  { %v710_v8 = vpop.f32.mrb[8].mxu0  ;;  %v1214_v2 = vmul.f32 0.1, %v5064_v1  ;;  %v5069_v1 = vld [vmem:[#allocation3 + $0x68] sm:$0xff] }
 0x15e   :  { %v1303_v10 = vpack.c.bf16 %v1257_v6, %v1256_v5  ;;  %v936_v11 = vadd.f32 %v935_v24, %v710_v8  ;;  %v712_v12 = vpop.f32.mrb[9].mxu0  ;;  %v5065_v8 = vld [vmem:[#allocation3 + $0x48] sm:$0xff] }
 0x15f   :  { %v713_v16 = vpop.f32.mrb[10].mxu0 }
 0x160   :  { %v1114_v17 = vmul.f32 0.9, %v936_v11  ;;  %v939_v18 = vadd.f32 %v938_v26, %v713_v16  ;;  %v715_v21 = vpop.f32.mrb[11].mxu0  ;;  %1857 = vmatpush1.bf16.msra.mxu1 %v1303_v10  ;;  %v1215_v10 = vmul.f32 0.1, %v5065_v8 }
 0x161   :  { %1858 = vmatprep.subr.bf16.mxu1 %v5184_v0  ;;  %v5305_v33 = vpop.f32.mrb[24].mxu1 }
 0x162   :  { %v1115_v22 = vmul.f32 0.9, %v939_v18  ;;  %v1258_v35 = vadd.f32 %v1210_v15, %v1114_v17  ;;  %v5307_v24 = vpop.f32.mrb[25].mxu1 }
 0x163   :  { %v5309_v39 = vpop.f32.mrb[26].mxu1 }
 0x164   :  { %v1259_v36 = vadd.f32 %v1211_v20, %v1115_v22  ;;  %v5312_v42 = vpop.f32.mrb[27].mxu1  ;;  %v5066_v22 = vld [vmem:[#allocation3 + $0x50] sm:$0xff] }
 0x165   :  { %v718_v38 = vpop.f32.mrb[12].mxu0 }
 0x166   :  { %v1304_v40 = vpack.c.bf16 %v1259_v36, %v1258_v35  ;;  %v944_v41 = vadd.f32 %v5267_v23, %v718_v38  ;;  %v720_v26 = vpop.f32.mrb[13].mxu0  ;;  %v1216_v35 = vmul.f32 0.1, %v5066_v22 }
 0x167   :  { %v721_v45 = vpop.f32.mrb[14].mxu0 }
 0x168   :  { %v1116_v46 = vmul.f32 0.9, %v944_v41  ;;  %v947_v47 = vadd.f32 %v5269_v25, %v721_v45  ;;  %v723_v52 = vpop.f32.mrb[15].mxu0  ;;  %1859 = vmatpush1.bf16.msra.mxu1 %v1304_v40  ;;  %v5067_v41 = vld [vmem:[#allocation3 + $0x58] sm:$0xff] }
 0x169   :  { %1860 = vmatprep.subr.bf16.mxu1 %v5184_v0  ;;  %v5316_v55 = vpop.f32.mrb[28].mxu1  ;;  %v1217_v26 = vmul.f32 0.1, %v5067_v41 }
 0x16a   :  { %v1117_v54 = vmul.f32 0.9, %v947_v47  ;;  %v1260_v56 = vadd.f32 %v1212_v44, %v1116_v46  ;;  %v5318_v58 = vpop.f32.mrb[29].mxu1 }
 0x16b   :  { %v5320_v60 = vpop.f32.mrb[30].mxu1 }
 0x16c   :  { %v1261_v23 = vadd.f32 %v1213_v50, %v1117_v54  ;;  %v5323_v63 = vpop.f32.mrb[31].mxu1 }
 0x16d   :  { %v726_v59 = vpop.f32.mrb[16].mxu0 }
 0x16e   :  { %v1305_v61 = vpack.c.bf16 %v1261_v23, %v1260_v56  ;;  %v952_v62 = vadd.f32 %v5273_v28, %v726_v59  ;;  %v728_v25 = vpop.f32.mrb[17].mxu0  ;;  %v5068_v23 = vld [vmem:[#allocation3 + $0x60] sm:$0xff] }
 0x16f   :  { %v729_v3 = vpop.f32.mrb[18].mxu0  ;;  %v1218_v59 = vmul.f32 0.1, %v5068_v23 }
 0x170   :  { %v1118_v5 = vmul.f32 0.9, %v952_v62  ;;  %v955_v6 = vadd.f32 %v5277_v30, %v729_v3  ;;  %v731_v11 = vpop.f32.mrb[19].mxu0  ;;  %1861 = vmatpush1.bf16.msra.mxu1 %v1305_v61 }
 0x171   :  { %1862 = vmatprep.subr.bf16.mxu1 %v5184_v0  ;;  %v5327_v14 = vpop.f32.mrb[32].mxu1 }
 0x172   :  { %v1119_v12 = vmul.f32 0.9, %v955_v6  ;;  %v1262_v15 = vadd.f32 %v1214_v2, %v1118_v5  ;;  %v5329_v16 = vpop.f32.mrb[33].mxu1  ;;  %v1219_v2 = vmul.f32 0.1, %v5069_v1 }
 0x173   :  { %v5331_v18 = vpop.f32.mrb[34].mxu1 }
 0x174   :  { %v1263_v28 = vadd.f32 %v1215_v10, %v1119_v12  ;;  %v5334_v21 = vpop.f32.mrb[35].mxu1 }
 0x175   :  { %v734_v17 = vpop.f32.mrb[20].mxu0 }
 0x176   :  { %v1306_v19 = vpack.c.bf16 %v1263_v28, %v1262_v15  ;;  %v960_v20 = vadd.f32 %v5271_v27, %v734_v17  ;;  %v736_v30 = vpop.f32.mrb[21].mxu0 }
 0x177   :  { %v737_v36 = vpop.f32.mrb[22].mxu0 }
 0x178   :  { %v1120_v38 = vmul.f32 0.9, %v960_v20  ;;  %v963_v40 = vadd.f32 %v5275_v29, %v737_v36  ;;  %v739_v43 = vpop.f32.mrb[23].mxu0  ;;  %1863 = vmatpush1.bf16.msra.mxu1 %v1306_v19  ;;  %v5070_v19 = vld [vmem:[#allocation3 + $0x70] sm:$0xff]  ;;  %v5071_v36 = vld [vmem:[#allocation3 + $0x78] sm:$0xff] }
 0x179   :  { %1864 = vmatprep.subr.bf16.mxu1 %v5184_v0  ;;  %v5338_v45 = vpop.f32.mrb[36].mxu1  ;;  %v1220_v20 = vmul.f32 0.1, %v5070_v19 }
 0x17a   :  { %v1121_v44 = vmul.f32 0.9, %v963_v40  ;;  %v1264_v46 = vadd.f32 %v1216_v35, %v1120_v38  ;;  %v5340_v47 = vpop.f32.mrb[37].mxu1  ;;  %v1221_v38 = vmul.f32 0.1, %v5071_v36 }
 0x17b   :  { %v5342_v50 = vpop.f32.mrb[38].mxu1 }
 0x17c   :  { %v1265_v27 = vadd.f32 %v1217_v26, %v1121_v44  ;;  %v5345_v56 = vpop.f32.mrb[39].mxu1 }
 0x17d   :  { %v742_v49 = vpop.f32.mrb[24].mxu0 }
 0x17e   :  { %v1307_v52 = vpack.c.bf16 %v1265_v27, %v1264_v46  ;;  %v968_v54 = vadd.f32 %v5281_v32, %v742_v49  ;;  %v744_v29 = vpop.f32.mrb[25].mxu0 }
 0x17f   :  { %v745_v61 = vpop.f32.mrb[26].mxu0  ;;  %v5072_v29 = vld [vmem:[#allocation3 + $0x80] sm:$0xff] }
 0x180   :  { %v1122_v62 = vmul.f32 0.9, %v968_v54  ;;  %v971_v25 = vadd.f32 %v5285_v37, %v745_v61  ;;  %v747_v3 = vpop.f32.mrb[27].mxu0  ;;  %1865 = vmatpush1.bf16.msra.mxu1 %v1307_v52  ;;  %v1222_v23 = vmul.f32 0.1, %v5072_v29 }
 0x181   :  { %1866 = vmatprep.subr.bf16.mxu1 %v5184_v0  ;;  %v5349_v6 = vpop.f32.mrb[40].mxu1  ;;  %v4859_v3 = vld [vmem:[#allocation6 + $0x8] ss:$12 sps:$4 sm:$0xff]  }
 0x182   :  { %v1123_v5 = vmul.f32 0.9, %v971_v25  ;;  %v1266_v8 = vadd.f32 %v1218_v59, %v1122_v62  ;;  %v5351_v10 = vpop.f32.mrb[41].mxu1  ;;  %v5073_v25 = vld [vmem:[#allocation3 + $0x88] sm:$0xff]  ;;  %4557 = vmatprep.mubr.bf16.mxu0 %v4859_v3 }
 0x183   :  { %v5353_v12 = vpop.f32.mrb[42].mxu1  ;;  %v1223_v1 = vmul.f32 0.1, %v5073_v25 }
 0x184   :  { %v1267_v32 = vadd.f32 %v1219_v2, %v1123_v5  ;;  %v5356_v17 = vpop.f32.mrb[43].mxu1 }
 0x185   :  { %v750_v11 = vpop.f32.mrb[28].mxu0 }
 0x186   :  { %v1308_v15 = vpack.c.bf16 %v1267_v32, %v1266_v8  ;;  %v976_v28 = vadd.f32 %v5279_v31, %v750_v11  ;;  %v752_v37 = vpop.f32.mrb[29].mxu0 }
 0x187   :  { %v753_v30 = vpop.f32.mrb[30].mxu0  ;;  %v5074_v37 = vld [vmem:[#allocation3 + $0x90] sm:$0xff] }
 0x188   :  { %v1124_v22 = vmul.f32 0.9, %v976_v28  ;;  %v979_v35 = vadd.f32 %v5283_v34, %v753_v30  ;;  %v755_v40 = vpop.f32.mrb[31].mxu0  ;;  %1867 = vmatpush1.bf16.msra.mxu1 %v1308_v15  ;;  %v1224_v19 = vmul.f32 0.1, %v5074_v37 }
 0x189   :  { %1868 = vmatprep.subr.bf16.mxu1 %v5184_v0  ;;  %v5360_v26 = vpop.f32.mrb[44].mxu1 }
 0x18a   :  { %v1125_v41 = vmul.f32 0.9, %v979_v35  ;;  %v1268_v43 = vadd.f32 %v1220_v20, %v1124_v22  ;;  %v5362_v44 = vpop.f32.mrb[45].mxu1  ;;  %v5075_v22 = vld [vmem:[#allocation3 + $0x98] sm:$0xff] }
 0x18b   :  { %v5364_v27 = vpop.f32.mrb[46].mxu1  ;;  %v1225_v35 = vmul.f32 0.1, %v5075_v22  ;;  %v1183_v22 = vld [vmem:[#allocation3 + $0xc8] sm:$0xff] }
 0x18c   :  { %v1269_v31 = vadd.f32 %v1221_v38, %v1125_v41  ;;  %v5367_v54 = vpop.f32.mrb[47].mxu1 }
 0x18d   :  { %v758_v46 = vpop.f32.mrb[32].mxu0 }
 0x18e   :  { %v1309_v49 = vpack.c.bf16 %v1269_v31, %v1268_v43  ;;  %v984_v52 = vadd.f32 %v5289_v51, %v758_v46  ;;  %v760_v34 = vpop.f32.mrb[33].mxu0 }
 0x18f   :  { %v761_v59 = vpop.f32.mrb[34].mxu0 }
 0x190   :  { %v1126_v61 = vmul.f32 0.9, %v984_v52  ;;  %v987_v62 = vadd.f32 %v5293_v57, %v761_v59  ;;  %v763_v2 = vpop.f32.mrb[35].mxu0  ;;  %1869 = vmatpush1.bf16.msra.mxu1 %v1309_v49  ;;  %v5076_v49 = vld [vmem:[#allocation3 + $0xa0] sm:$0xff] }
 0x191   :  { %1870 = vmatprep.subr.bf16.mxu1 %v5184_v0  ;;  %v1226_v52 = vmul.f32 0.1, %v5076_v49 }
 0x192   :  { %v1127_v5 = vmul.f32 0.9, %v987_v62  ;;  %v1270_v8 = vadd.f32 %v1222_v23, %v1126_v61  ;;  %v5077_v23 = vld [vmem:[#allocation3 + $0xa8] sm:$0xff] }
 0x193   :  { %v1227_v59 = vmul.f32 0.1, %v5077_v23 }
 0x194   :  { %v1271_v51 = vadd.f32 %v1223_v1, %v1127_v5 }
 0x195   :  { %v766_v32 = vpop.f32.mrb[36].mxu0 }
 0x196   :  { %v1310_v11 = vpack.c.bf16 %v1271_v51, %v1270_v8  ;;  %v992_v15 = vadd.f32 %v5287_v48, %v766_v32  ;;  %v768_v28 = vpop.f32.mrb[37].mxu0  ;;  %v5078_v8 = vld [vmem:[#allocation3 + $0xb0] sm:$0xff] }
 0x197   :  { %v769_v20 = vpop.f32.mrb[38].mxu0  ;;  %v1228_v51 = vmul.f32 0.1, %v5078_v8  ;;  %v1186_v8 = vld [vmem:[#allocation3 + $0xe0] sm:$0xff] }
 0x198   :  { %v1128_v57 = vmul.f32 0.9, %v992_v15  ;;  %v995_v30 = vadd.f32 %v5291_v53, %v769_v20  ;;  %v771_v36 = vpop.f32.mrb[39].mxu0  ;;  %1871 = vmatpush1.bf16.msra.mxu1 %v1310_v11  ;;  %v5079_v15 = vld [vmem:[#allocation3 + $0xb8] sm:$0xff] }
 0x199   :  { %1872 = vmatprep.subr.bf16.mxu1 %v5184_v0  ;;  %v1229_v28 = vmul.f32 0.1, %v5079_v15  ;;  %v1234_v15 = vmul.f32 0.1, %v1186_v8 }
 0x19a   :  { %v1129_v38 = vmul.f32 0.9, %v995_v30  ;;  %v1272_v40 = vadd.f32 %v1224_v19, %v1128_v57 }
 0x19c   :  { %v1273_v41 = vadd.f32 %v1225_v35, %v1129_v38  ;;  %v5080_v38 = vld [vmem:[#allocation3 + $0xc0] sm:$0xff] }
 0x19d   :  { %v774_v43 = vpop.f32.mrb[40].mxu0 }
 0x19e   :  { %v1311_v31 = vpack.c.bf16 %v1273_v41, %v1272_v40  ;;  %v1000_v48 = vadd.f32 %v5298_v7, %v774_v43  ;;  %v776_v46 = vpop.f32.mrb[41].mxu0  ;;  %v1230_v40 = vmul.f32 0.1, %v5080_v38 }
 0x19f   :  { %v777_v34 = vpop.f32.mrb[42].mxu0 }
 0x1a0   :  { %v1130_v29 = vmul.f32 0.9, %v1000_v48  ;;  %v1003_v53 = vadd.f32 %v5302_v13, %v777_v34  ;;  %v779_v61 = vpop.f32.mrb[43].mxu0  ;;  %1873 = vmatpush1.bf16.msra.mxu1 %v1311_v31  ;;  %v1231_v31 = vmul.f32 0.1, %v1183_v22  ;;  %v1184_v34 = vld [vmem:[#allocation3 + $0xd0] sm:$0xff] }
 0x1a1   :  { %1874 = vmatprep.subr.bf16.mxu1 %v5184_v0  ;;  %v1232_v61 = vmul.f32 0.1, %v1184_v34 }
 0x1a2   :  { %v1131_v62 = vmul.f32 0.9, %v1003_v53  ;;  %v1274_v25 = vadd.f32 %v1226_v52, %v1130_v29  ;;  %v1185_v53 = vld [vmem:[#allocation3 + $0xd8] sm:$0xff] }
 0x1a4   :  { %v1275_v1 = vadd.f32 %v1227_v59, %v1131_v62 }
 0x1a5   :  { %v782_v2 = vpop.f32.mrb[44].mxu0 }
 0x1a6   :  { %v1312_v3 = vpack.c.bf16 %v1275_v1, %v1274_v25  ;;  %v1008_v7 = vadd.f32 %v5296_v4, %v782_v2  ;;  %v784_v5 = vpop.f32.mrb[45].mxu0  ;;  %v1233_v1 = vmul.f32 0.1, %v1185_v53 }
 0x1a7   :  { %v785_v32 = vpop.f32.mrb[46].mxu0 }
 0x1a8   :  { %v1132_v11 = vmul.f32 0.9, %v1008_v7  ;;  %v1011_v13 = vadd.f32 %v5300_v9, %v785_v32  ;;  %v787_v37 = vpop.f32.mrb[47].mxu0  ;;  %1875 = vmatpush1.bf16.msra.mxu1 %v1312_v3  ;;  %v1187_v32 = vld [vmem:[#allocation3 + $0xe8] sm:$0xff] }
 0x1a9   :  { %1876 = vmatprep.subr.bf16.mxu1 %v5184_v0 }
 0x1aa   :  { %v1133_v19 = vmul.f32 0.9, %v1011_v13  ;;  %v1276_v20 = vadd.f32 %v1228_v51, %v1132_v11 }
 0x1ac   :  { %v1277_v57 = vadd.f32 %v1229_v28, %v1133_v19  ;;  %v1235_v19 = vmul.f32 0.1, %v1187_v32 }
 0x1ad   :  { %v790_v30 = vpop.f32.mrb[48].mxu0 }
 0x1ae   :  { %v1313_v35 = vpack.c.bf16 %v1277_v57, %v1276_v20  ;;  %v1016_v4 = vadd.f32 %v5307_v24, %v790_v30  ;;  %v792_v36 = vpop.f32.mrb[49].mxu0 }
 0x1af   :  { %v793_v41 = vpop.f32.mrb[50].mxu0  ;;  %v1189_v36 = vld [vmem:[#allocation3 + $0xf8] sm:$0xff] }
 0x1b0   :  { %v1134_v43 = vmul.f32 0.9, %v1016_v4  ;;  %v1019_v9 = vadd.f32 %v5312_v42, %v793_v41  ;;  %v795_v48 = vpop.f32.mrb[51].mxu0  ;;  %1877 = vmatpush1.bf16.msra.mxu1 %v1313_v35  ;;  %v1188_v35 = vld [vmem:[#allocation3 + $0xf0] sm:$0xff] }
 0x1b1   :  { %1878 = vmatprep.subr.bf16.mxu1 %v5184_v0  ;;  %v1236_v41 = vmul.f32 0.1, %v1188_v35 }
 0x1b2   :  { %v1135_v46 = vmul.f32 0.9, %v1019_v9  ;;  %v1278_v49 = vadd.f32 %v1230_v40, %v1134_v43 }
 0x1b4   :  { %v1279_v52 = vadd.f32 %v1231_v31, %v1135_v46  ;;  %v1237_v31 = vmul.f32 0.1, %v1189_v36 }
 0x1b5   :  { %v798_v29 = vpop.f32.mrb[52].mxu0 }
 0x1b6   :  { %v1314_v23 = vpack.c.bf16 %v1279_v52, %v1278_v49  ;;  %v1024_v24 = vadd.f32 %v5305_v33, %v798_v29  ;;  %v800_v59 = vpop.f32.mrb[53].mxu0  ;;  %v1190_v49 = vld [vmem:[#allocation3 + $0x100] sm:$0xff]  ;;  %v1191_v29 = vld [vmem:[#allocation3 + $0x108] sm:$0xff] }
 0x1b7   :  { %v801_v62 = vpop.f32.mrb[54].mxu0 }
 0x1b8   :  { %v1136_v25 = vmul.f32 0.9, %v1024_v24  ;;  %v1027_v42 = vadd.f32 %v5309_v39, %v801_v62  ;;  %v803_v2 = vpop.f32.mrb[55].mxu0  ;;  %1879 = vmatpush1.bf16.msra.mxu1 %v1314_v23  ;;  %v1238_v24 = vmul.f32 0.1, %v1190_v49  ;;  %v1196_v49 = vld [vmem:[#allocation3 + $0x130] sm:$0xff] }
 0x1b9   :  { %1880 = vmatprep.subr.bf16.mxu1 %v5184_v0  ;;  %v1239_v62 = vmul.f32 0.1, %v1191_v29  ;;  %v4861_v2 = vld [vmem:[#allocation6 + $0x1c] ss:$12 sps:$4 sm:$0xff]  }
 0x1ba   :  { %v1137_v3 = vmul.f32 0.9, %v1027_v42  ;;  %v1280_v7 = vadd.f32 %v1232_v61, %v1136_v25  ;;  %v4856_v25 = vld [vmem:[#allocation6] ss:$12 sps:$4 sm:$0xff]   ;;  %v1197_v29 = vld [vmem:[#allocation3 + $0x138] sm:$0xff] }
 0x1bc   :  { %v1281_v5 = vadd.f32 %v1233_v1, %v1137_v3 }
 0x1bd   :  { %v806_v51 = vpop.f32.mrb[56].mxu0 }
 0x1be   :  { %v1315_v11 = vpack.c.bf16 %v1281_v5, %v1280_v7  ;;  %v1032_v33 = vadd.f32 %v5318_v58, %v806_v51  ;;  %v808_v13 = vpop.f32.mrb[57].mxu0  ;;  %v1192_v7 = vld [vmem:[#allocation3 + $0x110] sm:$0xff]  ;;  %v1193_v51 = vld [vmem:[#allocation3 + $0x118] sm:$0xff] }
 0x1bf   :  { %v809_v28 = vpop.f32.mrb[58].mxu0 }
 0x1c0   :  { %v1138_v37 = vmul.f32 0.9, %v1032_v33  ;;  %v1035_v39 = vadd.f32 %v5323_v63, %v809_v28  ;;  %v811_v20 = vpop.f32.mrb[59].mxu0  ;;  %1881 = vmatpush1.bf16.msra.mxu1 %v1315_v11  ;;  %v1240_v11 = vmul.f32 0.1, %v1192_v7 }
 0x1c1   :  { %1882 = vmatprep.subr.bf16.mxu1 %v5184_v0  ;;  %v4863_v28 = vld [vmem:[#allocation6 + $0x18] ss:$12 sps:$4 sm:$0xff]   ;;  %v4864_v20 = vld [vmem:[#allocation6 + $0x34] ss:$12 sps:$4 sm:$0xff]  }
 0x1c2   :  { %v1139_v57 = vmul.f32 0.9, %v1035_v39  ;;  %v1282_v30 = vadd.f32 %v1234_v15, %v1138_v37 }
 0x1c4   :  { %v1283_v22 = vadd.f32 %v1235_v19, %v1139_v57 }
 0x1c5   :  { %v814_v4 = vpop.f32.mrb[60].mxu0 }
 0x1c6   :  { %v1316_v38 = vpack.c.bf16 %v1283_v22, %v1282_v30  ;;  %v1040_v58 = vadd.f32 %v5316_v55, %v814_v4  ;;  %v816_v40 = vpop.f32.mrb[61].mxu0  ;;  %v1194_v30 = vld [vmem:[#allocation3 + $0x120] sm:$0xff]  ;;  %v1195_v4 = vld [vmem:[#allocation3 + $0x128] sm:$0xff] }
 0x1c7   :  { %v817_v43 = vpop.f32.mrb[62].mxu0 }
 0x1c8   :  { %v1140_v9 = vmul.f32 0.9, %v1040_v58  ;;  %v1043_v63 = vadd.f32 %v5320_v60, %v817_v43  ;;  %v819_v48 = vpop.f32.mrb[63].mxu0  ;;  %1883 = vmatpush1.bf16.msra.mxu1 %v1316_v38  ;;  %v1242_v38 = vmul.f32 0.1, %v1194_v30 }
 0x1c9   :  { %1884 = vmatprep.subr.bf16.mxu1 %v5184_v0  ;;  %v1243_v43 = vmul.f32 0.1, %v1195_v4  ;;  %v4869_v48 = vld [vmem:[#allocation6 + $0x4c] ss:$12 sps:$4 sm:$0xff]  }
 0x1ca   :  { %v1141_v46 = vmul.f32 0.9, %v1043_v63  ;;  %v1284_v52 = vadd.f32 %v1236_v41, %v1140_v9 }
 0x1cc   :  { %v1285_v34 = vadd.f32 %v1237_v31, %v1141_v46 }
 0x1cd   :  { %v822_v53 = vpop.f32.mrb[64].mxu0 }
 0x1ce   :  { %v1317_v23 = vpack.c.bf16 %v1285_v34, %v1284_v52  ;;  %v1048_v55 = vadd.f32 %v5329_v16, %v822_v53  ;;  %v824_v59 = vpop.f32.mrb[65].mxu0 }
 0x1cf   :  { %v825_v61 = vpop.f32.mrb[66].mxu0 }
 0x1d0   :  { %v1142_v60 = vmul.f32 0.9, %v1048_v55  ;;  %v1051_v42 = vadd.f32 %v5334_v21, %v825_v61  ;;  %v827_v1 = vpop.f32.mrb[67].mxu0  ;;  %1885 = vmatpush1.bf16.msra.mxu1 %v1317_v23  ;;  %v1241_v21 = vmul.f32 0.1, %v1193_v51 }
 0x1d1   :  { %3048 = vmatprep.subr.bf16.mxu1 %v5184_v0  ;;  %v1244_v23 = vmul.f32 0.1, %v1196_v49  ;;  %v1245_v61 = vmul.f32 0.1, %v1197_v29 }
 0x1d2   :  { %v1143_v3 = vmul.f32 0.9, %v1051_v42  ;;  %v1286_v5 = vadd.f32 %v1238_v24, %v1142_v60  ;;  %v4872_v42 = vld [vmem:[#allocation6 + $0x64] ss:$12 sps:$4 sm:$0xff]  }
 0x1d3   :  { %1887 = vmatmul.mubr.bf16.vlgmr.msra.gmra.mrb[48].mxu1 %v4856_v25 }
 0x1d4   :  { %v1287_v8 = vadd.f32 %v1239_v62, %v1143_v3  ;;  %1894 = vmatprep.mubr.bf16.mxu1 %v4861_v2  ;;  %v1198_v2 = vld [vmem:[#allocation3 + $0x140] sm:$0xff] }
 0x1d5   :  { %v830_v16 = vpop.f32.mrb[68].mxu0  ;;  %v1246_v51 = vmul.f32 0.1, %v1198_v2 }
 0x1d6   :  { %v1056_v32 = vadd.f32 %v5327_v14, %v830_v16  ;;  %v832_v33 = vpop.f32.mrb[69].mxu0  ;;  %v1318_v13 = vpack.c.bf16 %v1287_v8, %v1286_v5  ;;  %v1199_v5 = vld [vmem:[#allocation3 + $0x148] sm:$0xff] }
 0x1d7   :  { %v833_v15 = vpop.f32.mrb[70].mxu0  ;;  %v1247_v33 = vmul.f32 0.1, %v1199_v5 }
 0x1d8   :  { %v1144_v37 = vmul.f32 0.9, %v1056_v32  ;;  %v1059_v39 = vadd.f32 %v5331_v18, %v833_v15  ;;  %4541 = vmatprep.subr.bf16.mxu0 %v1318_v13  ;;  %v835_v19 = vpop.f32.mrb[71].mxu0  ;;  %v4866_v18 = vld [vmem:[#allocation6 + $0x30] ss:$12 sps:$4 sm:$0xff]  }
 0x1d9   :  { %4542 = vmatpush3.bf16.msra.mxu0 %v1318_v13 }
 0x1da   :  { %v1145_v57 = vmul.f32 0.9, %v1059_v39  ;;  %v1288_v22 = vadd.f32 %v1240_v11, %v1144_v37  ;;  %v1200_v39 = vld [vmem:[#allocation3 + $0x150] sm:$0xff] }
 0x1db   :  { %1895 = vmatmul.mubr.bf16.gmra.mrb[52].mxu1 %v4863_v28  ;;  %v4876_v28 = vld [vmem:[#allocation6 + $0x7c] ss:$12 sps:$4 sm:$0xff]  }
 0x1dc   :  { %v1289_v35 = vadd.f32 %v1241_v21, %v1145_v57  ;;  %1902 = vmatprep.mubr.bf16.mxu1 %v4864_v20  ;;  %v1201_v57 = vld [vmem:[#allocation3 + $0x158] sm:$0xff] }
 0x1dd   :  { %v838_v14 = vpop.f32.mrb[72].mxu0 }
 0x1de   :  { %v1064_v36 = vadd.f32 %v5340_v47, %v838_v14  ;;  %v840_v58 = vpop.f32.mrb[73].mxu0  ;;  %v1319_v40 = vpack.c.bf16 %v1289_v35, %v1288_v22  ;;  %v1248_v22 = vmul.f32 0.1, %v1200_v39  ;;  %v4878_v39 = vld [vmem:[#allocation6 + $0x80] ss:$12 sps:$4 sm:$0xff]  }
 0x1df   :  { %v841_v41 = vpop.f32.mrb[74].mxu0 }
 0x1e0   :  { %v1146_v9 = vmul.f32 0.9, %v1064_v36  ;;  %v1067_v63 = vadd.f32 %v5345_v56, %v841_v41  ;;  %4543 = vmatprep.subr.bf16.mxu0 %v1319_v40  ;;  %v843_v31 = vpop.f32.mrb[75].mxu0  ;;  %v4871_v56 = vld [vmem:[#allocation6 + $0x48] ss:$12 sps:$4 sm:$0xff]  }
 0x1e1   :  { %4544 = vmatpush3.bf16.msra.mxu0 %v1319_v40  ;;  %v1249_v36 = vmul.f32 0.1, %v1201_v57  ;;  %v4880_v41 = vld [vmem:[#allocation6 + $0x94] ss:$12 sps:$4 sm:$0xff]   ;;  %v1203_v31 = vld [vmem:[#allocation3 + $0x168] sm:$0xff] }
 0x1e2   :  { %v1147_v46 = vmul.f32 0.9, %v1067_v63  ;;  %v1290_v52 = vadd.f32 %v1242_v38, %v1146_v9  ;;  %v1251_v29 = vmul.f32 0.1, %v1203_v31  ;;  %v4901_v57 = vld [vmem:[#allocation6 + $0x108] ss:$12 sps:$4 sm:$0xff]  }
 0x1e3   :  { %1903 = vmatmul.mubr.bf16.gmra.mrb[56].mxu1 %v4866_v18  ;;  %v1202_v18 = vld [vmem:[#allocation3 + $0x160] sm:$0xff] }
 0x1e4   :  { %v1291_v34 = vadd.f32 %v1243_v43, %v1147_v46  ;;  %1910 = vmatprep.mubr.bf16.mxu1 %v4869_v48  ;;  %v1250_v46 = vmul.f32 0.1, %v1202_v18  ;;  %v4922_v18 = vld [vmem:[#allocation6 + $0x140] ss:$12 sps:$4 sm:$0xff]   ;;  %v4916_v31 = vld [vmem:[#allocation6 + $0x184] ss:$12 sps:$4 sm:$0xff]  }
 0x1e5   :  { %v846_v47 = vpop.f32.mrb[76].mxu0 }
 0x1e6   :  { %v1072_v53 = vadd.f32 %v5338_v45, %v846_v47  ;;  %v848_v55 = vpop.f32.mrb[77].mxu0  ;;  %v1320_v24 = vpack.c.bf16 %v1291_v34, %v1290_v52 }
 0x1e7   :  { %v849_v59 = vpop.f32.mrb[78].mxu0  ;;  %v4883_v55 = vld [vmem:[#allocation6 + $0xac] ss:$12 sps:$4 sm:$0xff]  }
 0x1e8   :  { %v1148_v62 = vmul.f32 0.9, %v1072_v53  ;;  %v1075_v25 = vadd.f32 %v5342_v50, %v849_v59  ;;  %v851_v60 = vpop.f32.mrb[79].mxu0  ;;  %4545 = vmatprep.subr.bf16.mxu0 %v1320_v24  ;;  %v4874_v50 = vld [vmem:[#allocation6 + $0x60] ss:$12 sps:$4 sm:$0xff]   ;;  %v1204_v59 = vld [vmem:[#allocation3 + $0x170] sm:$0xff] }
 0x1e9   :  { %4546 = vmatpush3.bf16.msra.mxu0 %v1320_v24  ;;  %v1252_v60 = vmul.f32 0.1, %v1204_v59  ;;  %v4947_v59 = vld [vmem:[#allocation6 + $0x218] ss:$12 sps:$4 sm:$0xff]  }
 0x1ea   :  { %v1149_v1 = vmul.f32 0.9, %v1075_v25  ;;  %v1292_v3 = vadd.f32 %v1244_v23, %v1148_v62  ;;  %v1205_v62 = vld [vmem:[#allocation3 + $0x178] sm:$0xff] }
 0x1eb   :  { %1911 = vmatmul.mubr.bf16.gmra.mrb[60].mxu1 %v4871_v56 }
 0x1ec   :  { %v1293_v7 = vadd.f32 %v1245_v61, %v1149_v1  ;;  %1918 = vmatprep.mubr.bf16.mxu1 %v4872_v42 }
 0x1ed   :  { %v854_v45 = vpop.f32.mrb[80].mxu0 }
 0x1ee   :  { %v1080_v8 = vadd.f32 %v5351_v10, %v854_v45  ;;  %v856_v16 = vpop.f32.mrb[81].mxu0  ;;  %v1321_v32 = vpack.c.bf16 %v1293_v7, %v1292_v3  ;;  %v1253_v3 = vmul.f32 0.1, %v1205_v62  ;;  %v4948_v62 = vld [vmem:[#allocation6 + $0x230] ss:$12 sps:$4 sm:$0xff]  }
 0x1ef   :  { %v857_v11 = vpop.f32.mrb[82].mxu0 }
 0x1f0   :  { %v1150_v13 = vmul.f32 0.9, %v1080_v8  ;;  %v1083_v15 = vadd.f32 %v5356_v17, %v857_v11  ;;  %v859_v21 = vpop.f32.mrb[83].mxu0  ;;  %4547 = vmatprep.subr.bf16.mxu0 %v1321_v32  ;;  %v4879_v17 = vld [vmem:[#allocation6 + $0x78] ss:$12 sps:$4 sm:$0xff]  }
 0x1f1   :  { %4548 = vmatpush3.bf16.msra.mxu0 %v1321_v32  ;;  %v4887_v8 = vld [vmem:[#allocation6 + $0xc4] ss:$12 sps:$4 sm:$0xff]   ;;  %v4894_v21 = vld [vmem:[#allocation6 + $0xf4] ss:$12 sps:$4 sm:$0xff]  }
 0x1f2   :  { %v1151_v37 = vmul.f32 0.9, %v1083_v15  ;;  %v1294_v19 = vadd.f32 %v1246_v51, %v1150_v13  ;;  %v4867_v13 = vld [vmem:[#allocation6 + $0x38] ss:$12 sps:$4 sm:$0xff]   ;;  %v4868_v15 = vld [vmem:[#allocation6 + $0x50] ss:$12 sps:$4 sm:$0xff]  }
 0x1f3   :  { %1919 = vmatmul.mubr.bf16.gmra.mrb[64].mxu1 %v4874_v50  ;;  %v4891_v50 = vld [vmem:[#allocation6 + $0xdc] ss:$12 sps:$4 sm:$0xff]  }
 0x1f4   :  { %v1295_v20 = vadd.f32 %v1247_v33, %v1151_v37  ;;  %1926 = vmatprep.mubr.bf16.mxu1 %v4876_v28  ;;  %v4860_v33 = vld [vmem:[#allocation6 + $0x20] ss:$12 sps:$4 sm:$0xff]   ;;  %v4875_v28 = vld [vmem:[#allocation6 + $0x68] ss:$12 sps:$4 sm:$0xff]   ;;  %v4896_v37 = vld [vmem:[#allocation6 + $0xf0] ss:$12 sps:$4 sm:$0xff]  }
 0x1f5   :  { %v862_v10 = vpop.f32.mrb[84].mxu0 }
 0x1f6   :  { %v1088_v30 = vadd.f32 %v5349_v6, %v862_v10  ;;  %v864_v35 = vpop.f32.mrb[85].mxu0  ;;  %v1322_v4 = vpack.c.bf16 %v1295_v20, %v1294_v19  ;;  %v4898_v19 = vld [vmem:[#allocation6 + $0x10c] ss:$12 sps:$4 sm:$0xff]   ;;  %v4889_v10 = vld [vmem:[#allocation6 + $0xb0] ss:$12 sps:$4 sm:$0xff]  }
 0x1f7   :  { %v865_v14 = vpop.f32.mrb[86].mxu0  ;;  %v4886_v20 = vld [vmem:[#allocation6 + $0x98] ss:$12 sps:$4 sm:$0xff]   ;;  %v4904_v35 = vld [vmem:[#allocation6 + $0x120] ss:$12 sps:$4 sm:$0xff]  }
 0x1f8   :  { %v1152_v38 = vmul.f32 0.9, %v1088_v30  ;;  %v1091_v58 = vadd.f32 %v5353_v12, %v865_v14  ;;  %v867_v40 = vpop.f32.mrb[87].mxu0  ;;  %4549 = vmatprep.subr.bf16.mxu0 %v1322_v4  ;;  %v4882_v12 = vld [vmem:[#allocation6 + $0x90] ss:$12 sps:$4 sm:$0xff]  }
 0x1f9   :  { %4550 = vmatpush3.bf16.msra.mxu0 %v1322_v4  ;;  %v4902_v30 = vld [vmem:[#allocation6 + $0x124] ss:$12 sps:$4 sm:$0xff]   ;;  %v4900_v4 = vld [vmem:[#allocation6 + $0xe0] ss:$12 sps:$4 sm:$0xff]   ;;  %v4905_v14 = vld [vmem:[#allocation6 + $0x13c] ss:$12 sps:$4 sm:$0xff]  }
 0x1fa   :  { %v1153_v43 = vmul.f32 0.9, %v1091_v58  ;;  %v1296_v9 = vadd.f32 %v1248_v22, %v1152_v38  ;;  %v4897_v22 = vld [vmem:[#allocation6 + $0xc8] ss:$12 sps:$4 sm:$0xff]   ;;  %v4911_v58 = vld [vmem:[#allocation6 + $0x110] ss:$12 sps:$4 sm:$0xff]  }
 0x1fb   :  { %1927 = vmatmul.mubr.bf16.gmra.mrb[68].mxu1 %v4879_v17  ;;  %v4907_v17 = vld [vmem:[#allocation6 + $0x138] ss:$12 sps:$4 sm:$0xff]   ;;  %v4909_v38 = vld [vmem:[#allocation6 + $0x154] ss:$12 sps:$4 sm:$0xff]  }
 0x1fc   :  { %v1297_v63 = vadd.f32 %v1249_v36, %v1153_v43  ;;  %1934 = vmatprep.mubr.bf16.mxu1 %v4880_v41  ;;  %v4908_v36 = vld [vmem:[#allocation6 + $0xf8] ss:$12 sps:$4 sm:$0xff]   ;;  %v4919_v40 = vld [vmem:[#allocation6 + $0x128] ss:$12 sps:$4 sm:$0xff]   ;;  %v4912_v41 = vld [vmem:[#allocation6 + $0x150] ss:$12 sps:$4 sm:$0xff]  }
 0x1fd   :  { %v870_v6 = vpop.f32.mrb[88].mxu0  ;;  %v4913_v43 = vld [vmem:[#allocation6 + $0x16c] ss:$12 sps:$4 sm:$0xff]  }
 0x1fe   :  { %v1096_v48 = vadd.f32 %v5362_v44, %v870_v6  ;;  %v872_v49 = vpop.f32.mrb[89].mxu0  ;;  %v1323_v52 = vpack.c.bf16 %v1297_v63, %v1296_v9  ;;  %v4927_v9 = vld [vmem:[#allocation6 + $0x158] ss:$12 sps:$4 sm:$0xff]   ;;  %v4915_v63 = vld [vmem:[#allocation6 + $0x168] ss:$12 sps:$4 sm:$0xff]  }
 0x1ff   :  { %v873_v34 = vpop.f32.mrb[90].mxu0  ;;  %v4928_v6 = vld [vmem:[#allocation6 + $0x170] ss:$12 sps:$4 sm:$0xff]  }
 0x200   :  { %v1154_v47 = vmul.f32 0.9, %v1096_v48  ;;  %v1099_v53 = vadd.f32 %v5367_v54, %v873_v34  ;;  %v875_v23 = vpop.f32.mrb[91].mxu0  ;;  %4551 = vmatprep.subr.bf16.mxu0 %v1323_v52  ;;  %v4885_v54 = vld [vmem:[#allocation6 + $0xa8] ss:$12 sps:$4 sm:$0xff]  }
 0x201   :  { %4552 = vmatpush3.bf16.msra.mxu0 %v1323_v52  ;;  %v4932_v48 = vld [vmem:[#allocation6 + $0x188] ss:$12 sps:$4 sm:$0xff]   ;;  %v4933_v52 = vld [vmem:[#allocation6 + $0x1a0] ss:$12 sps:$4 sm:$0xff]   ;;  %v4937_v34 = vld [vmem:[#allocation6 + $0x1b8] ss:$12 sps:$4 sm:$0xff]  }
 0x202   :  { %v1155_v24 = vmul.f32 0.9, %v1099_v53  ;;  %v1298_v61 = vadd.f32 %v1250_v46, %v1154_v47  ;;  %v4918_v46 = vld [vmem:[#allocation6 + $0x180] ss:$12 sps:$4 sm:$0xff]   ;;  %v4920_v49 = vld [vmem:[#allocation6 + $0x19c] ss:$12 sps:$4 sm:$0xff]  }
 0x203   :  { %1935 = vmatmul.mubr.bf16.gmra.mrb[72].mxu1 %v4882_v12  ;;  %v4924_v12 = vld [vmem:[#allocation6 + $0x1b4] ss:$12 sps:$4 sm:$0xff]   ;;  %v4938_v47 = vld [vmem:[#allocation6 + $0x1d0] ss:$12 sps:$4 sm:$0xff]  }
 0x204   :  { %v1299_v56 = vadd.f32 %v1251_v29, %v1155_v24  ;;  %1942 = vmatprep.mubr.bf16.mxu1 %v4883_v55  ;;  %v4923_v29 = vld [vmem:[#allocation6 + $0x198] ss:$12 sps:$4 sm:$0xff]   ;;  %v4942_v53 = vld [vmem:[#allocation6 + $0x1e8] ss:$12 sps:$4 sm:$0xff]   ;;  %v4926_v23 = vld [vmem:[#allocation6 + $0x1b0] ss:$12 sps:$4 sm:$0xff]  }
 0x205   :  { %v878_v44 = vpop.f32.mrb[92].mxu0  ;;  %v4929_v55 = vld [vmem:[#allocation6 + $0x1cc] ss:$12 sps:$4 sm:$0xff]  }
 0x206   :  { %v1104_v25 = vadd.f32 %v5360_v26, %v878_v44  ;;  %v880_v42 = vpop.f32.mrb[93].mxu0  ;;  %v1324_v1 = vpack.c.bf16 %v1299_v56, %v1298_v61  ;;  %v4890_v26 = vld [vmem:[#allocation6 + $0xc0] ss:$12 sps:$4 sm:$0xff]   ;;  %v4931_v61 = vld [vmem:[#allocation6 + $0x1c8] ss:$12 sps:$4 sm:$0xff]  }
 0x207   :  { %v881_v2 = vpop.f32.mrb[94].mxu0  ;;  %v4943_v24 = vld [vmem:[#allocation6 + $0x200] ss:$12 sps:$4 sm:$0xff]   ;;  %v4934_v56 = vld [vmem:[#allocation6 + $0x1e4] ss:$12 sps:$4 sm:$0xff]  }
 0x208   :  { %v1156_v7 = vmul.f32 0.9, %v1104_v25  ;;  %v1107_v5 = vadd.f32 %v5364_v27, %v881_v2  ;;  %v883_v45 = vpop.f32.mrb[95].mxu0  ;;  %4553 = vmatprep.subr.bf16.mxu0 %v1324_v1  ;;  %v4893_v27 = vld [vmem:[#allocation6 + $0xd8] ss:$12 sps:$4 sm:$0xff]  }
 0x209   :  { %4554 = vmatpush3.bf16.msra.mxu0 %v1324_v1  ;;  %v4936_v44 = vld [vmem:[#allocation6 + $0x1e0] ss:$12 sps:$4 sm:$0xff]   ;;  %v4939_v25 = vld [vmem:[#allocation6 + $0x1fc] ss:$12 sps:$4 sm:$0xff]  }
 0x20a   :  { %v1157_v51 = vmul.f32 0.9, %v1107_v5  ;;  %v1300_v16 = vadd.f32 %v1252_v60, %v1156_v7  ;;  %v4941_v60 = vld [vmem:[#allocation6 + $0x1f8] ss:$12 sps:$4 sm:$0xff]   ;;  %v4944_v42 = vld [vmem:[#allocation6 + $0x214] ss:$12 sps:$4 sm:$0xff]  }
 0x20b   :  { %1943 = vmatmul.mubr.bf16.gmra.mrb[76].mxu1 %v4885_v54  ;;  %v4946_v1 = vld [vmem:[#allocation6 + $0x210] ss:$12 sps:$4 sm:$0xff]   ;;  %v4949_v2 = vld [vmem:[#allocation6 + $0x22c] ss:$12 sps:$4 sm:$0xff]  }
 0x20c   :  { %v1301_v32 = vadd.f32 %v1253_v3, %v1157_v51  ;;  %1950 = vmatprep.mubr.bf16.mxu1 %v4887_v8  ;;  %v4951_v3 = vld [vmem:[#allocation6 + $0x228] ss:$12 sps:$4 sm:$0xff]  }
 0x20e   :  { %v1325_v11 = vpack.c.bf16 %v1301_v32, %v1300_v16  ;;  %v4954_v16 = vld [vmem:[#allocation6 + $0x4] ss:$12 sps:$4 sm:$0xff]  }
 0x210   :  { %4555 = vmatprep.subr.bf16.mxu0 %v1325_v11 }
 0x211   :  { %4556 = vmatpush3.bf16.msra.mxu0 %v1325_v11 }
 0x213   :  { %1951 = vmatmul.mubr.bf16.gmra.mrb[80].mxu1 %v4890_v26 }
 0x214   :  { %4558 = vmatmul.mubr.bf16.vlgmr.msra.gmra.mrb[96].mxu0 %v4860_v33  ;;  %1958 = vmatprep.mubr.bf16.mxu1 %v4891_v50 }
 0x215   :  { %4561 = vmatprep.mubr.bf16.mxu0 %v4867_v13 }
 0x21b   :  { %1959 = vmatmul.mubr.bf16.gmra.mrb[84].mxu1 %v4893_v27 }
 0x21c   :  { %4562 = vmatmul.mubr.bf16.gmra.mrb[100].mxu0 %v4868_v15  ;;  %1966 = vmatprep.mubr.bf16.mxu1 %v4894_v21 }
 0x21d   :  { %4565 = vmatprep.mubr.bf16.mxu0 %v4875_v28 }
 0x223   :  { %1967 = vmatmul.mubr.bf16.gmra.mrb[88].mxu1 %v4896_v37 }
 0x224   :  { %4566 = vmatmul.mubr.bf16.gmra.mrb[104].mxu0 %v4878_v39  ;;  %1974 = vmatprep.mubr.bf16.mxu1 %v4898_v19 }
 0x225   :  { %4569 = vmatprep.mubr.bf16.mxu0 %v4886_v20 }
 0x22b   :  { %1975 = vmatmul.mubr.bf16.gmra.mrb[92].mxu1 %v4901_v57 }
 0x22c   :  { %4570 = vmatmul.mubr.bf16.gmra.mrb[108].mxu0 %v4889_v10  ;;  %1982 = vmatprep.mubr.bf16.mxu1 %v4902_v30 }
 0x22d   :  { %4573 = vmatprep.mubr.bf16.mxu0 %v4897_v22 }
 0x233   :  { %1983 = vmatmul.mubr.bf16.gmra.mrb[96].mxu1 %v4904_v35 }
 0x234   :  { %4574 = vmatmul.mubr.bf16.gmra.mrb[112].mxu0 %v4900_v4  ;;  %1990 = vmatprep.mubr.bf16.mxu1 %v4905_v14 }
 0x235   :  { %4577 = vmatprep.mubr.bf16.mxu0 %v4908_v36 }
 0x23b   :  { %1991 = vmatmul.mubr.bf16.gmra.mrb[100].mxu1 %v4907_v17 }
 0x23c   :  { %1998 = vmatprep.mubr.bf16.mxu1 %v4909_v38  ;;  %4578 = vmatmul.mubr.bf16.gmra.mrb[116].mxu0 %v4911_v58 }
 0x23d   :  { %4581 = vmatprep.mubr.bf16.mxu0 %v4919_v40 }
 0x243   :  { %1999 = vmatmul.mubr.bf16.gmra.mrb[104].mxu1 %v4912_v41  ;;  %v2354_v41 = vld [vmem:[#allocation3 + $0x10] sm:$0xff] }
 0x244   :  { %2006 = vmatprep.mubr.bf16.mxu1 %v4913_v43  ;;  %4582 = vmatmul.mubr.bf16.gmra.mrb[120].mxu0 %v4922_v18  ;;  %v2355_v43 = vld [vmem:[#allocation3 + $0x18] sm:$0xff] }
 0x245   :  { %4585 = vmatprep.mubr.bf16.mxu0 %v4927_v9 }
 0x24b   :  { %2007 = vmatmul.mubr.bf16.gmra.mrb[108].mxu1 %v4915_v63 }
 0x24c   :  { %2014 = vmatprep.mubr.bf16.mxu1 %v4916_v31  ;;  %4586 = vmatmul.mubr.bf16.gmra.mrb[124].mxu0 %v4928_v6  ;;  %v2352_v6 = vld [vmem:[#allocation3] sm:$0xff] }
 0x24d   :  { %4589 = vmatprep.mubr.bf16.mxu0 %v4932_v48 }
 0x253   :  { %2015 = vmatmul.mubr.bf16.gmra.mrb[112].mxu1 %v4918_v46  ;;  %v2353_v46 = vld [vmem:[#allocation3 + $0x8] sm:$0xff] }
 0x254   :  { %2022 = vmatprep.mubr.bf16.mxu1 %v4920_v49  ;;  %4590 = vmatmul.mubr.bf16.gmra.mrb[128].mxu0 %v4933_v52 }
 0x255   :  { %4593 = vmatprep.mubr.bf16.mxu0 %v4937_v34  ;;  %v2402_v34 = vmul.f32 0.1, %v2354_v41 }
 0x25b   :  { %2023 = vmatmul.mubr.bf16.gmra.mrb[116].mxu1 %v4923_v29 }
 0x25c   :  { %2030 = vmatprep.mubr.bf16.mxu1 %v4924_v12  ;;  %4594 = vmatmul.mubr.bf16.gmra.mrb[132].mxu0 %v4938_v47  ;;  %v2403_v12 = vmul.f32 0.1, %v2355_v43 }
 0x25d   :  { %4597 = vmatprep.mubr.bf16.mxu0 %v4942_v53 }
 0x263   :  { %2031 = vmatmul.mubr.bf16.gmra.mrb[120].mxu1 %v4926_v23 }
 0x264   :  { %2038 = vmatprep.mubr.bf16.mxu1 %v4929_v55  ;;  %4598 = vmatmul.mubr.bf16.gmra.mrb[136].mxu0 %v4943_v24  ;;  %v4966_v24 = vld [vmem:[#allocation6 + $0x8] ss:$12 sps:$4 sm:$0xff]  }
 0x265   :  { %4601 = vmatprep.mubr.bf16.mxu0 %v4947_v59 }
 0x26b   :  { %2039 = vmatmul.mubr.bf16.gmra.mrb[124].mxu1 %v4931_v61  ;;  %v2400_v61 = vmul.f32 0.1, %v2352_v6 }
 0x26c   :  { %2046 = vmatprep.mubr.bf16.mxu1 %v4934_v56  ;;  %4602 = vmatmul.mubr.bf16.gmra.mrb[140].mxu0 %v4948_v62  ;;  %v2401_v62 = vmul.f32 0.1, %v2353_v46 }
 0x26d   :  { %4621 = vmatprep.mubr.bf16.mxu0 %v4966_v24 }
 0x273   :  { %2047 = vmatmul.mubr.bf16.gmra.mrb[128].mxu1 %v4936_v44 }
 0x274   :  { %2054 = vmatprep.mubr.bf16.mxu1 %v4939_v25 }
 0x27b   :  { %2055 = vmatmul.mubr.bf16.gmra.mrb[132].mxu1 %v4941_v60 }
 0x27c   :  { %2062 = vmatprep.mubr.bf16.mxu1 %v4944_v42 }
 0x283   :  { %2063 = vmatmul.mubr.bf16.gmra.mrb[136].mxu1 %v4946_v1  ;;  %v2358_v1 = vld [vmem:[#allocation3 + $0x30] sm:$0xff] }
 0x284   :  { %2070 = vmatprep.mubr.bf16.mxu1 %v4949_v2 }
 0x28b   :  { %2071 = vmatmul.mubr.bf16.gmra.mrb[140].mxu1 %v4951_v3 }
 0x28c   :  { %3080 = vmatprep.mubr.bf16.mxu1 %v4954_v16 }
 0x2a6   :  { %v1888_v54 = vpop.f32.mrb[48].mxu1 }
 0x2a7   :  { %v1890_v7 = vpop.f32.mrb[49].mxu1 }
 0x2a8   :  { %v1891_v5 = vpop.f32.mrb[50].mxu1 }
 0x2a9   :  { %v1893_v45 = vpop.f32.mrb[51].mxu1 }
 0x2aa   :  { %v2359_v45 = vld [vmem:[#allocation3 + $0x38] sm:$0xff] }
 0x2ae   :  { %v1896_v8 = vpop.f32.mrb[52].mxu1 }
 0x2af   :  { %v1898_v51 = vpop.f32.mrb[53].mxu1 }
 0x2b0   :  { %v1899_v32 = vpop.f32.mrb[54].mxu1 }
 0x2b1   :  { %v1901_v11 = vpop.f32.mrb[55].mxu1 }
 0x2b2   :  { %v2357_v11 = vld [vmem:[#allocation3 + $0x28] sm:$0xff] }
 0x2b3   :  { %v2405_v43 = vmul.f32 0.1, %v2357_v11  ;;  %v2367_v11 = vld [vmem:[#allocation3 + $0x78] sm:$0xff] }
 0x2b6   :  { %v5409_v26 = vpop.f32.mrb[56].mxu1 }
 0x2b7   :  { %v1906_v33 = vpop.f32.mrb[57].mxu1 }
 0x2b8   :  { %v5411_v50 = vpop.f32.mrb[58].mxu1 }
 0x2b9   :  { %v1909_v13 = vpop.f32.mrb[59].mxu1 }
 0x2be   :  { %v1912_v27 = vpop.f32.mrb[60].mxu1 }
 0x2bf   :  { %v1914_v15 = vpop.f32.mrb[61].mxu1 }
 0x2c0   :  { %v5413_v21 = vpop.f32.mrb[62].mxu1 }
 0x2c1   :  { %v1917_v28 = vpop.f32.mrb[63].mxu1 }
 0x2c6   :  { %v5415_v37 = vpop.f32.mrb[64].mxu1 }
 0x2c7   :  { %v1922_v39 = vpop.f32.mrb[65].mxu1 }
 0x2c8   :  { %v5417_v19 = vpop.f32.mrb[66].mxu1  ;;  %v2406_v39 = vmul.f32 0.1, %v2358_v1 }
 0x2c9   :  { %v1925_v20 = vpop.f32.mrb[67].mxu1 }
 0x2ce   :  { %v5419_v57 = vpop.f32.mrb[68].mxu1 }
 0x2cf   :  { %v1930_v10 = vpop.f32.mrb[69].mxu1 }
 0x2d0   :  { %v5421_v30 = vpop.f32.mrb[70].mxu1 }
 0x2d1   :  { %v1933_v22 = vpop.f32.mrb[71].mxu1 }
 0x2d6   :  { %v5423_v35 = vpop.f32.mrb[72].mxu1 }
 0x2d7   :  { %v1938_v4 = vpop.f32.mrb[73].mxu1 }
 0x2d8   :  { %v5425_v14 = vpop.f32.mrb[74].mxu1 }
 0x2d9   :  { %v1941_v36 = vpop.f32.mrb[75].mxu1 }
 0x2da   :  { %v2407_v36 = vmul.f32 0.1, %v2359_v45 }
 0x2de   :  { %v5427_v17 = vpop.f32.mrb[76].mxu1 }
 0x2df   :  { %v1946_v38 = vpop.f32.mrb[77].mxu1 }
 0x2e0   :  { %v5429_v58 = vpop.f32.mrb[78].mxu1 }
 0x2e1   :  { %v1949_v40 = vpop.f32.mrb[79].mxu1 }
 0x2e6   :  { %v5431_v18 = vpop.f32.mrb[80].mxu1 }
 0x2e7   :  { %v4559_v9 = vpop.f32.mrb[96].mxu0  ;;  %v1954_v63 = vpop.f32.mrb[81].mxu1 }
 0x2e8   :  { %v2113_v31 = vpop.f32.mrb[97].mxu0  ;;  %v2122_v48 = vadd.f32 %v4559_v9, %v1896_v8  ;;  %v5433_v49 = vpop.f32.mrb[82].mxu1 }
 0x2e9   :  { %v2114_v52 = vadd.f32 %v2113_v31, %v1888_v54  ;;  %v4560_v29 = vpop.f32.mrb[98].mxu0  ;;  %v1957_v47 = vpop.f32.mrb[83].mxu1  ;;  %v2362_v31 = vld [vmem:[#allocation3 + $0x50] sm:$0xff] }
 0x2ea   :  { %v2306_v53 = vmul.f32 0.9, %v2122_v48  ;;  %v2116_v23 = vpop.f32.mrb[99].mxu0  ;;  %v2125_v55 = vadd.f32 %v4560_v29, %v1899_v32  ;;  %v2356_v32 = vld [vmem:[#allocation3 + $0x20] sm:$0xff]  ;;  %v2361_v47 = vld [vmem:[#allocation3 + $0x48] sm:$0xff] }
 0x2eb   :  { %v2304_v59 = vmul.f32 0.9, %v2114_v52  ;;  %v2117_v56 = vadd.f32 %v2116_v23, %v1891_v5  ;;  %v2404_v40 = vmul.f32 0.1, %v2356_v32  ;;  %v2363_v52 = vld [vmem:[#allocation3 + $0x58] sm:$0xff] }
 0x2ec   :  { %v2307_v44 = vmul.f32 0.9, %v2125_v55  ;;  %v2450_v60 = vadd.f32 %v2402_v34, %v2306_v53 }
 0x2ed   :  { %v2305_v25 = vmul.f32 0.9, %v2117_v56  ;;  %v2448_v3 = vadd.f32 %v2400_v61, %v2304_v59  ;;  %v2410_v61 = vmul.f32 0.1, %v2362_v31 }
 0x2ee   :  { %v2451_v42 = vadd.f32 %v2403_v12, %v2307_v44  ;;  %v5435_v2 = vpop.f32.mrb[84].mxu1  ;;  %v2360_v12 = vld [vmem:[#allocation3 + $0x40] sm:$0xff] }
 0x2ef   :  { %v2449_v54 = vadd.f32 %v2401_v62, %v2305_v25  ;;  %v4563_v7 = vpop.f32.mrb[100].mxu0  ;;  %v1962_v8 = vpop.f32.mrb[85].mxu1  ;;  %v2408_v1 = vmul.f32 0.1, %v2360_v12 }
 0x2f0   :  { %v2497_v51 = vpack.c.bf16 %v2451_v42, %v2450_v60  ;;  %v2129_v16 = vpop.f32.mrb[101].mxu0  ;;  %v2138_v33 = vadd.f32 %v4563_v7, %v1912_v27  ;;  %v5437_v5 = vpop.f32.mrb[86].mxu1  ;;  %v2411_v60 = vmul.f32 0.1, %v2363_v52  ;;  %v2366_v8 = vld [vmem:[#allocation3 + $0x70] sm:$0xff] }
 0x2f1   :  { %v2496_v13 = vpack.c.bf16 %v2449_v54, %v2448_v3  ;;  %v2130_v15 = vadd.f32 %v2129_v16, %v5409_v26  ;;  %v4564_v28 = vpop.f32.mrb[102].mxu0  ;;  %v1965_v20 = vpop.f32.mrb[87].mxu1  ;;  %v2409_v54 = vmul.f32 0.1, %v2361_v47 }
 0x2f2   :  { %v2132_v10 = vpop.f32.mrb[103].mxu0  ;;  %v2310_v22 = vmul.f32 0.9, %v2138_v33  ;;  %v2141_v4 = vadd.f32 %v4564_v28, %v5413_v21  ;;  %v2365_v28 = vld [vmem:[#allocation3 + $0x68] sm:$0xff] }
 0x2f3   :  { %3049 = vmatpush1.bf16.msra.mxu1 %v2496_v13  ;;  %v2308_v38 = vmul.f32 0.9, %v2130_v15  ;;  %v2133_v41 = vadd.f32 %v2132_v10, %v5411_v50  ;;  %v2364_v15 = vld [vmem:[#allocation3 + $0x60] sm:$0xff]  ;;  %v2413_v31 = vmul.f32 0.1, %v2365_v28  ;;  %v2373_v28 = vld [vmem:[#allocation3 + $0xa8] sm:$0xff] }
 0x2f4   :  { %3050 = vmatprep.subr.bf16.mxu1 %v5184_v0  ;;  %v2311_v27 = vmul.f32 0.9, %v2141_v4  ;;  %v2454_v63 = vadd.f32 %v2406_v39, %v2310_v22 }
 0x2f5   :  { %v2309_v9 = vmul.f32 0.9, %v2133_v41  ;;  %v2452_v48 = vadd.f32 %v2404_v40, %v2308_v38 }
 0x2f6   :  { %v2455_v26 = vadd.f32 %v2407_v36, %v2311_v27  ;;  %v5443_v6 = vpop.f32.mrb[88].mxu1  ;;  %v2414_v36 = vmul.f32 0.1, %v2366_v8  ;;  %v2415_v27 = vmul.f32 0.1, %v2367_v11 }
 0x2f7   :  { %3051 = vmatpush1.bf16.msra.mxu1 %v2497_v51  ;;  %v2453_v46 = vadd.f32 %v2405_v43, %v2309_v9  ;;  %v4567_v21 = vpop.f32.mrb[104].mxu0  ;;  %v1970_v34 = vpop.f32.mrb[89].mxu1 }
 0x2f8   :  { %v2499_v29 = vpack.c.bf16 %v2455_v26, %v2454_v63  ;;  %3052 = vmatprep.subr.bf16.mxu1 %v5184_v0  ;;  %v2145_v50 = vpop.f32.mrb[105].mxu0  ;;  %v2154_v53 = vadd.f32 %v4567_v21, %v5419_v57  ;;  %v5447_v23 = vpop.f32.mrb[90].mxu1  ;;  %v2412_v63 = vmul.f32 0.1, %v2364_v15  ;;  %v2370_v21 = vld [vmem:[#allocation3 + $0x90] sm:$0xff] }
 0x2f9   :  { %v2498_v55 = vpack.c.bf16 %v2453_v46, %v2452_v48  ;;  %v2146_v24 = vadd.f32 %v2145_v50, %v5415_v37  ;;  %v4568_v59 = vpop.f32.mrb[106].mxu0  ;;  %v1973_v56 = vpop.f32.mrb[91].mxu1  ;;  %v2371_v50 = vld [vmem:[#allocation3 + $0x98] sm:$0xff] }
 0x2fa   :  { %v2148_v62 = vpop.f32.mrb[107].mxu0  ;;  %v2314_v44 = vmul.f32 0.9, %v2154_v53  ;;  %v2157_v25 = vadd.f32 %v4568_v59, %v5421_v30  ;;  %v2368_v53 = vld [vmem:[#allocation3 + $0x80] sm:$0xff] }
 0x2fb   :  { %3053 = vmatpush1.bf16.msra.mxu1 %v2498_v55  ;;  %v2312_v42 = vmul.f32 0.9, %v2146_v24  ;;  %v2149_v3 = vadd.f32 %v2148_v62, %v5417_v19  ;;  %v2369_v55 = vld [vmem:[#allocation3 + $0x88] sm:$0xff] }
 0x2fc   :  { %3054 = vmatprep.subr.bf16.mxu1 %v5184_v0  ;;  %v2315_v57 = vmul.f32 0.9, %v2157_v25  ;;  %v2458_v45 = vadd.f32 %v2410_v61, %v2314_v44  ;;  %v2418_v44 = vmul.f32 0.1, %v2370_v21 }
 0x2fd   :  { %v2313_v7 = vmul.f32 0.9, %v2149_v3  ;;  %v2456_v16 = vadd.f32 %v2408_v1, %v2312_v42  ;;  %v2419_v3 = vmul.f32 0.1, %v2371_v50 }
 0x2fe   :  { %v2459_v37 = vadd.f32 %v2411_v60, %v2315_v57  ;;  %v5453_v51 = vpop.f32.mrb[92].mxu1  ;;  %v2416_v57 = vmul.f32 0.1, %v2368_v53 }
 0x2ff   :  { %3055 = vmatpush1.bf16.msra.mxu1 %v2499_v29  ;;  %v2457_v32 = vadd.f32 %v2409_v54, %v2313_v7  ;;  %v4571_v30 = vpop.f32.mrb[108].mxu0  ;;  %v1978_v33 = vpop.f32.mrb[93].mxu1 }
 0x300   :  { %v2501_v13 = vpack.c.bf16 %v2459_v37, %v2458_v45  ;;  %3056 = vmatprep.subr.bf16.mxu1 %v5184_v0  ;;  %v2161_v19 = vpop.f32.mrb[109].mxu0  ;;  %v2170_v39 = vadd.f32 %v4571_v30, %v5427_v17  ;;  %v5457_v20 = vpop.f32.mrb[94].mxu1  ;;  %v2417_v45 = vmul.f32 0.1, %v2369_v55 }
 0x301   :  { %v2500_v10 = vpack.c.bf16 %v2457_v32, %v2456_v16  ;;  %v2162_v22 = vadd.f32 %v2161_v19, %v5423_v35  ;;  %v4572_v4 = vpop.f32.mrb[110].mxu0  ;;  %v1981_v38 = vpop.f32.mrb[95].mxu1  ;;  %v2374_v16 = vld [vmem:[#allocation3 + $0xb0] sm:$0xff] }
 0x302   :  { %v2164_v40 = vpop.f32.mrb[111].mxu0  ;;  %v2318_v41 = vmul.f32 0.9, %v2170_v39  ;;  %v2173_v43 = vadd.f32 %v4572_v4, %v5429_v58  ;;  %v2422_v38 = vmul.f32 0.1, %v2374_v16 }
 0x303   :  { %3057 = vmatpush1.bf16.msra.mxu1 %v2500_v10  ;;  %v2316_v9 = vmul.f32 0.9, %v2162_v22  ;;  %v2165_v26 = vadd.f32 %v2164_v40, %v5425_v14 }
 0x304   :  { %3058 = vmatprep.subr.bf16.mxu1 %v5184_v0  ;;  %v2319_v17 = vmul.f32 0.9, %v2173_v43  ;;  %v2462_v46 = vadd.f32 %v2414_v36, %v2318_v41 }
 0x305   :  { %v2317_v48 = vmul.f32 0.9, %v2165_v26  ;;  %v2460_v34 = vadd.f32 %v2412_v63, %v2316_v9 }
 0x306   :  { %v2463_v35 = vadd.f32 %v2415_v27, %v2319_v17  ;;  %v5463_v52 = vpop.f32.mrb[96].mxu1  ;;  %v2421_v17 = vmul.f32 0.1, %v2373_v28 }
 0x307   :  { %3059 = vmatpush1.bf16.msra.mxu1 %v2501_v13  ;;  %v2461_v29 = vadd.f32 %v2413_v31, %v2317_v48  ;;  %v4575_v58 = vpop.f32.mrb[112].mxu0  ;;  %v1986_v12 = vpop.f32.mrb[97].mxu1 }
 0x308   :  { %v2503_v47 = vpack.c.bf16 %v2463_v35, %v2462_v46  ;;  %3060 = vmatprep.subr.bf16.mxu1 %v5184_v0  ;;  %v2177_v14 = vpop.f32.mrb[113].mxu0  ;;  %v2186_v24 = vadd.f32 %v4575_v58, %v5435_v2  ;;  %v5467_v59 = vpop.f32.mrb[98].mxu1  ;;  %v2378_v35 = vld [vmem:[#allocation3 + $0xd0] sm:$0xff] }
 0x309   :  { %v2502_v61 = vpack.c.bf16 %v2461_v29, %v2460_v34  ;;  %v2178_v56 = vadd.f32 %v2177_v14, %v5431_v18  ;;  %v4576_v62 = vpop.f32.mrb[114].mxu0  ;;  %v1989_v25 = vpop.f32.mrb[99].mxu1  ;;  %v2377_v14 = vld [vmem:[#allocation3 + $0xc8] sm:$0xff] }
 0x30a   :  { %v2180_v60 = vpop.f32.mrb[115].mxu0  ;;  %v2322_v42 = vmul.f32 0.9, %v2186_v24  ;;  %v2189_v1 = vadd.f32 %v4576_v62, %v5437_v5  ;;  %v2375_v5 = vld [vmem:[#allocation3 + $0xb8] sm:$0xff]  ;;  %v2426_v62 = vmul.f32 0.1, %v2378_v35 }
 0x30b   :  { %3061 = vmatpush1.bf16.msra.mxu1 %v2502_v61  ;;  %v2320_v54 = vmul.f32 0.9, %v2178_v56  ;;  %v2181_v7 = vadd.f32 %v2180_v60, %v5433_v49  ;;  %v2372_v49 = vld [vmem:[#allocation3 + $0xa0] sm:$0xff]  ;;  %v2423_v9 = vmul.f32 0.1, %v2375_v5 }
 0x30c   :  { %3062 = vmatprep.subr.bf16.mxu1 %v5184_v0  ;;  %v2323_v2 = vmul.f32 0.9, %v2189_v1  ;;  %v2466_v8 = vadd.f32 %v2418_v44, %v2322_v42  ;;  %v2420_v26 = vmul.f32 0.1, %v2372_v49 }
 0x30d   :  { %v2321_v37 = vmul.f32 0.9, %v2181_v7  ;;  %v2464_v30 = vadd.f32 %v2416_v57, %v2320_v54  ;;  %v2425_v7 = vmul.f32 0.1, %v2377_v14 }
 0x30e   :  { %v2467_v18 = vadd.f32 %v2419_v3, %v2323_v2  ;;  %v1992_v32 = vpop.f32.mrb[100].mxu1 }
 0x30f   :  { %3063 = vmatpush1.bf16.msra.mxu1 %v2503_v47  ;;  %v2465_v11 = vadd.f32 %v2417_v45, %v2321_v37  ;;  %v4579_v33 = vpop.f32.mrb[116].mxu0  ;;  %v1994_v13 = vpop.f32.mrb[101].mxu1 }
 0x310   :  { %v2505_v19 = vpack.c.bf16 %v2467_v18, %v2466_v8  ;;  %3064 = vmatprep.subr.bf16.mxu1 %v5184_v0  ;;  %v2193_v15 = vpop.f32.mrb[117].mxu0  ;;  %v2202_v39 = vadd.f32 %v4579_v33, %v5453_v51  ;;  %v1995_v10 = vpop.f32.mrb[102].mxu1  ;;  %v2382_v18 = vld [vmem:[#allocation3 + $0xf0] sm:$0xff]  ;;  %v2383_v33 = vld [vmem:[#allocation3 + $0xf8] sm:$0xff] }
 0x311   :  { %v2504_v22 = vpack.c.bf16 %v2465_v11, %v2464_v30  ;;  %v2194_v4 = vadd.f32 %v2193_v15, %v5443_v6  ;;  %v4580_v36 = vpop.f32.mrb[118].mxu0  ;;  %v1997_v40 = vpop.f32.mrb[103].mxu1 }
 0x312   :  { %v2196_v41 = vpop.f32.mrb[119].mxu0  ;;  %v2326_v43 = vmul.f32 0.9, %v2202_v39  ;;  %v2205_v27 = vadd.f32 %v4580_v36, %v5457_v20  ;;  %v2379_v20 = vld [vmem:[#allocation3 + $0xd8] sm:$0xff] }
 0x313   :  { %3065 = vmatpush1.bf16.msra.mxu1 %v2504_v22  ;;  %v2324_v63 = vmul.f32 0.9, %v2194_v4  ;;  %v2197_v31 = vadd.f32 %v2196_v41, %v5447_v23  ;;  %v2376_v23 = vld [vmem:[#allocation3 + $0xc0] sm:$0xff]  ;;  %v2427_v1 = vmul.f32 0.1, %v2379_v20 }
 0x314   :  { %3066 = vmatprep.subr.bf16.mxu1 %v5184_v0  ;;  %v2327_v51 = vmul.f32 0.9, %v2205_v27  ;;  %v2470_v46 = vadd.f32 %v2422_v38, %v2326_v43  ;;  %v2424_v54 = vmul.f32 0.1, %v2376_v23  ;;  %v2430_v22 = vmul.f32 0.1, %v2382_v18 }
 0x315   :  { %v2325_v48 = vmul.f32 0.9, %v2197_v31  ;;  %v2468_v34 = vadd.f32 %v2420_v26, %v2324_v63  ;;  %v2431_v41 = vmul.f32 0.1, %v2383_v33 }
 0x316   :  { %v2471_v6 = vadd.f32 %v2423_v9, %v2327_v51  ;;  %v2000_v21 = vpop.f32.mrb[104].mxu1 }
 0x317   :  { %3067 = vmatpush1.bf16.msra.mxu1 %v2505_v19  ;;  %v2469_v29 = vadd.f32 %v2421_v17, %v2325_v48  ;;  %v4583_v58 = vpop.f32.mrb[120].mxu0  ;;  %v2002_v50 = vpop.f32.mrb[105].mxu1  ;;  %v2381_v19 = vld [vmem:[#allocation3 + $0xe8] sm:$0xff] }
 0x318   :  { %v2507_v12 = vpack.c.bf16 %v2471_v6, %v2470_v46  ;;  %3068 = vmatprep.subr.bf16.mxu1 %v5184_v0  ;;  %v2209_v47 = vpop.f32.mrb[121].mxu0  ;;  %v2218_v53 = vadd.f32 %v4583_v58, %v1992_v32  ;;  %v2003_v55 = vpop.f32.mrb[106].mxu1  ;;  %v2429_v63 = vmul.f32 0.1, %v2381_v19  ;;  %v2384_v46 = vld [vmem:[#allocation3 + $0x100] sm:$0xff]  ;;  %v2385_v50 = vld [vmem:[#allocation3 + $0x108] sm:$0xff] }
 0x319   :  { %v2506_v24 = vpack.c.bf16 %v2469_v29, %v2468_v34  ;;  %v2210_v61 = vadd.f32 %v2209_v47, %v5463_v52  ;;  %v4584_v56 = vpop.f32.mrb[122].mxu0  ;;  %v2005_v44 = vpop.f32.mrb[107].mxu1  ;;  %v2432_v23 = vmul.f32 0.1, %v2384_v46 }
 0x31a   :  { %v2212_v25 = vpop.f32.mrb[123].mxu0  ;;  %v2330_v60 = vmul.f32 0.9, %v2218_v53  ;;  %v2221_v42 = vadd.f32 %v4584_v56, %v1995_v10  ;;  %v2433_v56 = vmul.f32 0.1, %v2385_v50 }
 0x31b   :  { %3069 = vmatpush1.bf16.msra.mxu1 %v2506_v24  ;;  %v2328_v3 = vmul.f32 0.9, %v2210_v61  ;;  %v2213_v57 = vadd.f32 %v2212_v25, %v5467_v59  ;;  %v2380_v59 = vld [vmem:[#allocation3 + $0xe0] sm:$0xff]  ;;  %v4961_v50 = vld [vmem:[#allocation6 + $0x4c] ss:$12 sps:$4 sm:$0xff]  }
 0x31c   :  { %3070 = vmatprep.subr.bf16.mxu1 %v5184_v0  ;;  %v2331_v45 = vmul.f32 0.9, %v2221_v42  ;;  %v2474_v37 = vadd.f32 %v2426_v62, %v2330_v60  ;;  %v2428_v27 = vmul.f32 0.1, %v2380_v59  ;;  %v2386_v62 = vld [vmem:[#allocation3 + $0x110] sm:$0xff]  ;;  %v2387_v42 = vld [vmem:[#allocation3 + $0x118] sm:$0xff] }
 0x31d   :  { %v2329_v2 = vmul.f32 0.9, %v2213_v57  ;;  %v2472_v16 = vadd.f32 %v2424_v54, %v2328_v3  ;;  %v2434_v57 = vmul.f32 0.1, %v2386_v62 }
 0x31e   :  { %v2475_v8 = vadd.f32 %v2427_v1, %v2331_v45  ;;  %v2008_v52 = vpop.f32.mrb[108].mxu1  ;;  %v4952_v1 = vld [vmem:[#allocation6] ss:$12 sps:$4 sm:$0xff]  }
 0x31f   :  { %3071 = vmatpush1.bf16.msra.mxu1 %v2507_v12  ;;  %v2473_v32 = vadd.f32 %v2425_v7, %v2329_v2  ;;  %v4587_v30 = vpop.f32.mrb[124].mxu0  ;;  %v2010_v11 = vpop.f32.mrb[109].mxu1  ;;  %v4955_v2 = vld [vmem:[#allocation6 + $0x1c] ss:$12 sps:$4 sm:$0xff]  }
 0x320   :  { %v2509_v5 = vpack.c.bf16 %v2475_v8, %v2474_v37  ;;  %3072 = vmatprep.subr.bf16.mxu1 %v5184_v0  ;;  %v2225_v13 = vpop.f32.mrb[125].mxu0  ;;  %v2234_v15 = vadd.f32 %v4587_v30, %v2008_v52  ;;  %v2011_v49 = vpop.f32.mrb[110].mxu1 }
 0x321   :  { %v2508_v28 = vpack.c.bf16 %v2473_v32, %v2472_v16  ;;  %v2226_v39 = vadd.f32 %v2225_v13, %v2000_v21  ;;  %v4588_v10 = vpop.f32.mrb[126].mxu0  ;;  %v2013_v4 = vpop.f32.mrb[111].mxu1  ;;  %v2435_v32 = vmul.f32 0.1, %v2387_v42  ;;  %v2388_v13 = vld [vmem:[#allocation3 + $0x120] sm:$0xff]  ;;  %v2393_v42 = vld [vmem:[#allocation3 + $0x148] sm:$0xff] }
 0x322   :  { %v2228_v36 = vpop.f32.mrb[127].mxu0  ;;  %v2334_v38 = vmul.f32 0.9, %v2234_v15  ;;  %v2237_v40 = vadd.f32 %v4588_v10, %v2011_v49  ;;  %v2389_v15 = vld [vmem:[#allocation3 + $0x128] sm:$0xff]  ;;  %v4957_v49 = vld [vmem:[#allocation6 + $0x18] ss:$12 sps:$4 sm:$0xff]  }
 0x323   :  { %3073 = vmatpush1.bf16.msra.mxu1 %v2508_v28  ;;  %v2332_v43 = vmul.f32 0.9, %v2226_v39  ;;  %v2229_v9 = vadd.f32 %v2228_v36, %v2003_v55  ;;  %v2436_v10 = vmul.f32 0.1, %v2388_v13  ;;  %v4958_v36 = vld [vmem:[#allocation6 + $0x34] ss:$12 sps:$4 sm:$0xff]  }
 0x324   :  { %3074 = vmatprep.subr.bf16.mxu1 %v5184_v0  ;;  %v2335_v26 = vmul.f32 0.9, %v2237_v40  ;;  %v2478_v17 = vadd.f32 %v2430_v22, %v2334_v38 }
 0x325   :  { %v2333_v31 = vmul.f32 0.9, %v2229_v9  ;;  %v2476_v6 = vadd.f32 %v2428_v27, %v2332_v43  ;;  %v2437_v27 = vmul.f32 0.1, %v2389_v15 }
 0x326   :  { %v2479_v51 = vadd.f32 %v2431_v41, %v2335_v26  ;;  %v2016_v48 = vpop.f32.mrb[112].mxu1 }
 0x327   :  { %v2477_v35 = vadd.f32 %v2429_v63, %v2333_v31  ;;  %3075 = vmatpush1.bf16.msra.mxu1 %v2509_v5  ;;  %v4591_v21 = vpop.f32.mrb[128].mxu0  ;;  %v2018_v34 = vpop.f32.mrb[113].mxu1 }
 0x328   :  { %v2511_v29 = vpack.c.bf16 %v2479_v51, %v2478_v17  ;;  %v2241_v58 = vpop.f32.mrb[129].mxu0  ;;  %v2019_v20 = vpop.f32.mrb[114].mxu1  ;;  %3076 = vmatprep.subr.bf16.mxu1 %v5184_v0  ;;  %v2390_v51 = vld [vmem:[#allocation3 + $0x130] sm:$0xff] }
 0x329   :  { %v2510_v12 = vpack.c.bf16 %v2477_v35, %v2476_v6  ;;  %v2242_v47 = vadd.f32 %v2241_v58, %v2016_v48  ;;  %v4592_v14 = vpop.f32.mrb[130].mxu0  ;;  %v2021_v53 = vpop.f32.mrb[115].mxu1  ;;  %v2391_v6 = vld [vmem:[#allocation3 + $0x138] sm:$0xff] }
 0x32a   :  { %v2244_v55 = vpop.f32.mrb[131].mxu0  ;;  %v4960_v35 = vld [vmem:[#allocation6 + $0x30] ss:$12 sps:$4 sm:$0xff]   ;;  %v2439_v53 = vmul.f32 0.1, %v2391_v6 }
 0x32b   :  { %v2336_v24 = vmul.f32 0.9, %v2242_v47  ;;  %v2245_v61 = vadd.f32 %v2244_v55, %v2019_v20  ;;  %3077 = vmatpush1.bf16.msra.mxu1 %v2510_v12 }
 0x32c   :  { %3078 = vmatprep.subr.bf16.mxu1 %v5184_v0 }
 0x32d   :  { %v2480_v44 = vadd.f32 %v2432_v23, %v2336_v24  ;;  %v2337_v25 = vmul.f32 0.9, %v2245_v61 }
 0x32e   :  { %v2024_v60 = vpop.f32.mrb[116].mxu1 }
 0x32f   :  { %v2481_v3 = vadd.f32 %v2433_v56, %v2337_v25  ;;  %v2250_v54 = vadd.f32 %v4591_v21, %v2024_v60  ;;  %v2026_v7 = vpop.f32.mrb[117].mxu1  ;;  %v4595_v45 = vpop.f32.mrb[132].mxu0  ;;  %3079 = vmatpush1.bf16.msra.mxu1 %v2511_v29  ;;  %v2438_v29 = vmul.f32 0.1, %v2390_v51  ;;  %v4972_v51 = vld [vmem:[#allocation6 + $0x94] ss:$12 sps:$4 sm:$0xff]  }
 0x330   :  { %v2027_v37 = vpop.f32.mrb[118].mxu1  ;;  %v2257_v8 = vpop.f32.mrb[133].mxu0 }
 0x331   :  { %v2512_v52 = vpack.c.bf16 %v2481_v3, %v2480_v44  ;;  %v2338_v18 = vmul.f32 0.9, %v2250_v54  ;;  %v2253_v16 = vadd.f32 %v4592_v14, %v2027_v37  ;;  %v2029_v30 = vpop.f32.mrb[119].mxu1  ;;  %v4596_v0 = vpop.f32.mrb[134].mxu0  ;;  %v2392_v44 = vld [vmem:[#allocation3 + $0x140] sm:$0xff] }
 0x332   :  { %v2260_v11 = vpop.f32.mrb[135].mxu0  ;;  %3081 = vmatmul.mubr.bf16.vlgmr.msra.gmra.mrb[144].mxu1 %v4952_v1  ;;  %v4963_v1 = vld [vmem:[#allocation6 + $0x48] ss:$12 sps:$4 sm:$0xff]  }
 0x333   :  { %v2482_v33 = vadd.f32 %v2434_v57, %v2338_v18  ;;  %v2339_v5 = vmul.f32 0.9, %v2253_v16  ;;  %4605 = vmatprep.subr.bf16.mxu0 %v2512_v52  ;;  %3088 = vmatprep.mubr.bf16.mxu1 %v4955_v2  ;;  %v2440_v57 = vmul.f32 0.1, %v2392_v44  ;;  %v2394_v30 = vld [vmem:[#allocation3 + $0x150] sm:$0xff] }
 0x334   :  { %4606 = vmatpush3.bf16.msra.mxu0 %v2512_v52  ;;  %4733 = vmatprep.subr.bf16.mxu1 %v2512_v52 }
 0x335   :  { %v2483_v59 = vadd.f32 %v2435_v32, %v2339_v5  ;;  %4741 = vmatpush3.bf16.msra.mxu1 %v2512_v52  ;;  %v2441_v52 = vmul.f32 0.1, %v2393_v42  ;;  %v4967_v5 = vld [vmem:[#allocation6 + $0x60] ss:$12 sps:$4 sm:$0xff]  }
 0x336   :  { %v2032_v19 = vpop.f32.mrb[120].mxu1 }
 0x337   :  { %v2513_v28 = vpack.c.bf16 %v2483_v59, %v2482_v33  ;;  %v2258_v39 = vadd.f32 %v2257_v8, %v2032_v19  ;;  %v2034_v22 = vpop.f32.mrb[121].mxu1  ;;  %v5487_v4 = vpop.f32.mrb[136].mxu0  ;;  %v2395_v33 = vld [vmem:[#allocation3 + $0x158] sm:$0xff]  ;;  %v2442_v19 = vmul.f32 0.1, %v2394_v30 }
 0x338   :  { %v2035_v38 = vpop.f32.mrb[122].mxu1  ;;  %v2273_v40 = vpop.f32.mrb[137].mxu0  ;;  %v2443_v22 = vmul.f32 0.1, %v2395_v33  ;;  %v4990_v30 = vld [vmem:[#allocation6 + $0x98] ss:$12 sps:$4 sm:$0xff]  }
 0x339   :  { %v2340_v41 = vmul.f32 0.9, %v2258_v39  ;;  %v2261_v43 = vadd.f32 %v2260_v11, %v2035_v38  ;;  %v2037_v9 = vpop.f32.mrb[123].mxu1  ;;  %4607 = vmatprep.subr.bf16.mxu0 %v2513_v28  ;;  %v5489_v63 = vpop.f32.mrb[138].mxu0  ;;  %4734 = vmatprep.subr.bf16.mxu1 %v2513_v28  ;;  %v4991_v33 = vld [vmem:[#allocation6 + $0xf0] ss:$12 sps:$4 sm:$0xff]  }
 0x33a   :  { %4608 = vmatpush3.bf16.msra.mxu0 %v2513_v28  ;;  %v2276_v26 = vpop.f32.mrb[139].mxu0  ;;  %3089 = vmatmul.mubr.bf16.gmra.mrb[148].mxu1 %v4957_v49  ;;  %v4969_v49 = vld [vmem:[#allocation6 + $0x7c] ss:$12 sps:$4 sm:$0xff]   ;;  %v4971_v9 = vld [vmem:[#allocation6 + $0x78] ss:$12 sps:$4 sm:$0xff]  }
 0x33b   :  { %v2484_v31 = vadd.f32 %v2436_v10, %v2340_v41  ;;  %v2341_v17 = vmul.f32 0.9, %v2261_v43  ;;  %3096 = vmatprep.mubr.bf16.mxu1 %v4958_v36  ;;  %4742 = vmatpush3.bf16.msra.mxu1 %v2513_v28  ;;  %v2396_v41 = vld [vmem:[#allocation3 + $0x160] sm:$0xff] }
 0x33d   :  { %v2485_v48 = vadd.f32 %v2437_v27, %v2341_v17  ;;  %v2397_v27 = vld [vmem:[#allocation3 + $0x168] sm:$0xff]  ;;  %v2444_v17 = vmul.f32 0.1, %v2396_v41  ;;  %v5003_v41 = vld [vmem:[#allocation6 + $0x138] ss:$12 sps:$4 sm:$0xff]  }
 0x33e   :  { %v2040_v46 = vpop.f32.mrb[124].mxu1 }
 0x33f   :  { %v2514_v21 = vpack.c.bf16 %v2485_v48, %v2484_v31  ;;  %v2266_v34 = vadd.f32 %v4595_v45, %v2040_v46  ;;  %v2042_v58 = vpop.f32.mrb[125].mxu1  ;;  %v5491_v20 = vpop.f32.mrb[140].mxu0  ;;  %v4964_v45 = vld [vmem:[#allocation6 + $0x64] ss:$12 sps:$4 sm:$0xff]  }
 0x340   :  { %v2043_v12 = vpop.f32.mrb[126].mxu1  ;;  %v5493_v47 = vpop.f32.mrb[141].mxu0  ;;  %v2398_v58 = vld [vmem:[#allocation3 + $0x170] sm:$0xff] }
 0x341   :  { %v2342_v23 = vmul.f32 0.9, %v2266_v34  ;;  %v2269_v14 = vadd.f32 %v4596_v0, %v2043_v12  ;;  %v2045_v55 = vpop.f32.mrb[127].mxu1  ;;  %4609 = vmatprep.subr.bf16.mxu0 %v2514_v21  ;;  %v5495_v24 = vpop.f32.mrb[142].mxu0  ;;  %4735 = vmatprep.subr.bf16.mxu1 %v2514_v21 }
 0x342   :  { %4610 = vmatpush3.bf16.msra.mxu0 %v2514_v21  ;;  %v5497_v61 = vpop.f32.mrb[143].mxu0  ;;  %3097 = vmatmul.mubr.bf16.gmra.mrb[152].mxu1 %v4960_v35  ;;  %v2445_v35 = vmul.f32 0.1, %v2397_v27  ;;  %v2446_v55 = vmul.f32 0.1, %v2398_v58  ;;  %v5052_v58 = vld [vmem:[#allocation8 + $0x20] sm:$0xff]  }
 0x343   :  { %v2486_v56 = vadd.f32 %v2438_v29, %v2342_v23  ;;  %v2343_v62 = vmul.f32 0.9, %v2269_v14  ;;  %3104 = vmatprep.mubr.bf16.mxu1 %v4961_v50  ;;  %4743 = vmatpush3.bf16.msra.mxu1 %v2514_v21  ;;  %v4975_v23 = vld [vmem:[#allocation6 + $0x90] ss:$12 sps:$4 sm:$0xff]   ;;  %v5022_v27 = vld [vmem:[#allocation6 + $0x158] ss:$12 sps:$4 sm:$0xff]  }
 0x345   :  { %v2487_v25 = vadd.f32 %v2439_v53, %v2343_v62 }
 0x346   :  { %v2048_v60 = vpop.f32.mrb[128].mxu1 }
 0x347   :  { %v2515_v3 = vpack.c.bf16 %v2487_v25, %v2486_v56  ;;  %v2274_v54 = vadd.f32 %v2273_v40, %v2048_v60  ;;  %v2050_v7 = vpop.f32.mrb[129].mxu1  ;;  %v4977_v56 = vld [vmem:[#allocation6 + $0xac] ss:$12 sps:$4 sm:$0xff]  }
 0x348   :  { %v2051_v2 = vpop.f32.mrb[130].mxu1  ;;  %v4980_v7 = vld [vmem:[#allocation6 + $0xc4] ss:$12 sps:$4 sm:$0xff]  }
 0x349   :  { %v2344_v37 = vmul.f32 0.9, %v2274_v54  ;;  %v2277_v8 = vadd.f32 %v2276_v26, %v2051_v2  ;;  %v2053_v18 = vpop.f32.mrb[131].mxu1  ;;  %4611 = vmatprep.subr.bf16.mxu0 %v2515_v3  ;;  %4736 = vmatprep.subr.bf16.mxu1 %v2515_v3  ;;  %v4974_v2 = vld [vmem:[#allocation6 + $0x38] ss:$12 sps:$4 sm:$0xff]  }
 0x34a   :  { %4612 = vmatpush3.bf16.msra.mxu0 %v2515_v3  ;;  %3105 = vmatmul.mubr.bf16.gmra.mrb[156].mxu1 %v4963_v1  ;;  %v4987_v18 = vld [vmem:[#allocation6 + $0xd8] ss:$12 sps:$4 sm:$0xff]  }
 0x34b   :  { %v2488_v16 = vadd.f32 %v2440_v57, %v2344_v37  ;;  %v2345_v32 = vmul.f32 0.9, %v2277_v8  ;;  %3112 = vmatprep.mubr.bf16.mxu1 %v4964_v45  ;;  %4744 = vmatpush3.bf16.msra.mxu1 %v2515_v3  ;;  %v4979_v57 = vld [vmem:[#allocation6 + $0xa8] ss:$12 sps:$4 sm:$0xff]   ;;  %v4968_v45 = vld [vmem:[#allocation6 + $0x20] ss:$12 sps:$4 sm:$0xff]  }
 0x34c   :  { %v4985_v37 = vld [vmem:[#allocation6 + $0xdc] ss:$12 sps:$4 sm:$0xff]  }
 0x34d   :  { %v2489_v0 = vadd.f32 %v2441_v52, %v2345_v32  ;;  %v4976_v8 = vld [vmem:[#allocation6 + $0x50] ss:$12 sps:$4 sm:$0xff]   ;;  %v4982_v52 = vld [vmem:[#allocation6 + $0x68] ss:$12 sps:$4 sm:$0xff]   ;;  %v4984_v32 = vld [vmem:[#allocation6 + $0x80] ss:$12 sps:$4 sm:$0xff]  }
 0x34e   :  { %v2056_v11 = vpop.f32.mrb[132].mxu1 }
 0x34f   :  { %v2516_v13 = vpack.c.bf16 %v2489_v0, %v2488_v16  ;;  %v2282_v59 = vadd.f32 %v5487_v4, %v2056_v11  ;;  %v2058_v15 = vpop.f32.mrb[133].mxu1  ;;  %v4988_v16 = vld [vmem:[#allocation6 + $0xf4] ss:$12 sps:$4 sm:$0xff]   ;;  %v5049_v11 = vld [vmem:[#allocation8 + $0x8] sm:$0xff]  }
 0x350   :  { %v2059_v28 = vpop.f32.mrb[134].mxu1  ;;  %v5048_v0 = vld [vmem:[#allocation8] sm:$0xff]   ;;  %v5051_v15 = vld [vmem:[#allocation8 + $0x18] sm:$0xff]  }
 0x351   :  { %v2346_v39 = vmul.f32 0.9, %v2282_v59  ;;  %v2285_v10 = vadd.f32 %v5489_v63, %v2059_v28  ;;  %v2061_v36 = vpop.f32.mrb[135].mxu1  ;;  %4613 = vmatprep.subr.bf16.mxu0 %v2516_v13  ;;  %4737 = vmatprep.subr.bf16.mxu1 %v2516_v13  ;;  %v4992_v59 = vld [vmem:[#allocation6 + $0xb0] ss:$12 sps:$4 sm:$0xff]  }
 0x352   :  { %4614 = vmatpush3.bf16.msra.mxu0 %v2516_v13  ;;  %3113 = vmatmul.mubr.bf16.gmra.mrb[160].mxu1 %v4967_v5  ;;  %v4993_v5 = vld [vmem:[#allocation6 + $0x10c] ss:$12 sps:$4 sm:$0xff]   ;;  %v4996_v28 = vld [vmem:[#allocation6 + $0x124] ss:$12 sps:$4 sm:$0xff]   ;;  %v5001_v36 = vld [vmem:[#allocation6 + $0x13c] ss:$12 sps:$4 sm:$0xff]  }
 0x353   :  { %v2490_v38 = vadd.f32 %v2442_v19, %v2346_v39  ;;  %v2347_v40 = vmul.f32 0.9, %v2285_v10  ;;  %3120 = vmatprep.mubr.bf16.mxu1 %v4969_v49  ;;  %4745 = vmatpush3.bf16.msra.mxu1 %v2516_v13  ;;  %v5050_v13 = vld [vmem:[#allocation8 + $0x10] sm:$0xff]   ;;  %v5000_v39 = vld [vmem:[#allocation6 + $0xe0] ss:$12 sps:$4 sm:$0xff]  }
 0x354   :  { %v4998_v19 = vld [vmem:[#allocation6 + $0xc8] ss:$12 sps:$4 sm:$0xff]   ;;  %v5006_v10 = vld [vmem:[#allocation6 + $0xf8] ss:$12 sps:$4 sm:$0xff]  }
 0x355   :  { %v2491_v43 = vadd.f32 %v2443_v22, %v2347_v40  ;;  %v4995_v49 = vld [vmem:[#allocation6 + $0x108] ss:$12 sps:$4 sm:$0xff]   ;;  %v4999_v22 = vld [vmem:[#allocation6 + $0x120] ss:$12 sps:$4 sm:$0xff]  }
 0x356   :  { %v2064_v4 = vpop.f32.mrb[136].mxu1  ;;  %v5014_v40 = vld [vmem:[#allocation6 + $0x128] ss:$12 sps:$4 sm:$0xff]  }
 0x357   :  { %v2517_v26 = vpack.c.bf16 %v2491_v43, %v2490_v38  ;;  %v2290_v31 = vadd.f32 %v5493_v47, %v2064_v4  ;;  %v2066_v63 = vpop.f32.mrb[137].mxu1  ;;  %v2399_v47 = vld [vmem:[#allocation3 + $0x178] sm:$0xff]  ;;  %v5004_v43 = vld [vmem:[#allocation6 + $0x154] ss:$12 sps:$4 sm:$0xff]  }
 0x358   :  { %v2067_v48 = vpop.f32.mrb[138].mxu1  ;;  %v2447_v60 = vmul.f32 0.1, %v2399_v47  ;;  %v5008_v38 = vld [vmem:[#allocation6 + $0x110] ss:$12 sps:$4 sm:$0xff]   ;;  %v5053_v47 = vld [vmem:[#allocation8 + $0x28] sm:$0xff]  }
 0x359   :  { %v2348_v46 = vmul.f32 0.9, %v2290_v31  ;;  %v2293_v6 = vadd.f32 %v5497_v61, %v2067_v48  ;;  %v2069_v21 = vpop.f32.mrb[139].mxu1  ;;  %4615 = vmatprep.subr.bf16.mxu0 %v2517_v26  ;;  %4738 = vmatprep.subr.bf16.mxu1 %v2517_v26  ;;  %v5016_v4 = vld [vmem:[#allocation6 + $0x140] ss:$12 sps:$4 sm:$0xff]  }
 0x35a   :  { %4616 = vmatpush3.bf16.msra.mxu0 %v2517_v26  ;;  %3121 = vmatmul.mubr.bf16.gmra.mrb[164].mxu1 %v4971_v9  ;;  %v5007_v9 = vld [vmem:[#allocation6 + $0x150] ss:$12 sps:$4 sm:$0xff]   ;;  %v5011_v63 = vld [vmem:[#allocation6 + $0x168] ss:$12 sps:$4 sm:$0xff]   ;;  %v5032_v48 = vld [vmem:[#allocation6 + $0x1a0] ss:$12 sps:$4 sm:$0xff]  }
 0x35b   :  { %v2492_v34 = vadd.f32 %v2444_v17, %v2348_v46  ;;  %v2349_v29 = vmul.f32 0.9, %v2293_v6  ;;  %3128 = vmatprep.mubr.bf16.mxu1 %v4972_v51  ;;  %4746 = vmatpush3.bf16.msra.mxu1 %v2517_v26  ;;  %v5009_v26 = vld [vmem:[#allocation6 + $0x16c] ss:$12 sps:$4 sm:$0xff]   ;;  %v5024_v31 = vld [vmem:[#allocation6 + $0x170] ss:$12 sps:$4 sm:$0xff]  }
 0x35c   :  { %v5030_v17 = vld [vmem:[#allocation6 + $0x188] ss:$12 sps:$4 sm:$0xff]   ;;  %v5012_v51 = vld [vmem:[#allocation6 + $0x184] ss:$12 sps:$4 sm:$0xff]   ;;  %v5015_v6 = vld [vmem:[#allocation6 + $0x180] ss:$12 sps:$4 sm:$0xff]  }
 0x35d   :  { %v2493_v50 = vadd.f32 %v2445_v35, %v2349_v29  ;;  %v5038_v46 = vld [vmem:[#allocation6 + $0x1b8] ss:$12 sps:$4 sm:$0xff]   ;;  %v5017_v35 = vld [vmem:[#allocation6 + $0x19c] ss:$12 sps:$4 sm:$0xff]   ;;  %v5020_v29 = vld [vmem:[#allocation6 + $0x1b4] ss:$12 sps:$4 sm:$0xff]  }
 0x35e   :  { %v2072_v12 = vpop.f32.mrb[140].mxu1  ;;  %v5040_v21 = vld [vmem:[#allocation6 + $0x1d0] ss:$12 sps:$4 sm:$0xff]  }
 0x35f   :  { %v2518_v14 = vpack.c.bf16 %v2493_v50, %v2492_v34  ;;  %v2298_v53 = vadd.f32 %v5491_v20, %v2072_v12  ;;  %v2074_v61 = vpop.f32.mrb[141].mxu1  ;;  %v5019_v34 = vld [vmem:[#allocation6 + $0x198] ss:$12 sps:$4 sm:$0xff]   ;;  %v5023_v50 = vld [vmem:[#allocation6 + $0x1b0] ss:$12 sps:$4 sm:$0xff]  }
 0x360   :  { %v2075_v62 = vpop.f32.mrb[142].mxu1  ;;  %v5025_v12 = vld [vmem:[#allocation6 + $0x1cc] ss:$12 sps:$4 sm:$0xff]  }
 0x361   :  { %v2350_v44 = vmul.f32 0.9, %v2298_v53  ;;  %v2301_v25 = vadd.f32 %v5495_v24, %v2075_v62  ;;  %4617 = vmatprep.subr.bf16.mxu0 %v2518_v14  ;;  %4739 = vmatprep.subr.bf16.mxu1 %v2518_v14  ;;  %v2077_v42 = vpop.f32.mrb[143].mxu1  ;;  %v4983_v24 = vld [vmem:[#allocation6 + $0xc0] ss:$12 sps:$4 sm:$0xff]  }
 0x362   :  { %4618 = vmatpush3.bf16.msra.mxu0 %v2518_v14  ;;  %3129 = vmatmul.mubr.bf16.gmra.mrb[168].mxu1 %v4975_v23  ;;  %v5054_v23 = vld [vmem:[#allocation8 + $0x30] sm:$0xff]   ;;  %v5031_v61 = vld [vmem:[#allocation6 + $0x1e0] ss:$12 sps:$4 sm:$0xff]   ;;  %v5035_v62 = vld [vmem:[#allocation6 + $0x1f8] ss:$12 sps:$4 sm:$0xff]  }
 0x363   :  { %v2494_v1 = vadd.f32 %v2446_v55, %v2350_v44  ;;  %v2351_v3 = vmul.f32 0.9, %v2301_v25  ;;  %3136 = vmatprep.mubr.bf16.mxu1 %v4977_v56  ;;  %4747 = vmatpush3.bf16.msra.mxu1 %v2518_v14  ;;  %v5027_v14 = vld [vmem:[#allocation6 + $0x1c8] ss:$12 sps:$4 sm:$0xff]   ;;  %v5028_v53 = vld [vmem:[#allocation6 + $0x1e4] ss:$12 sps:$4 sm:$0xff]  }
 0x364   :  { %v5055_v55 = vld [vmem:[#allocation8 + $0x38] sm:$0xff]   ;;  %v5036_v44 = vld [vmem:[#allocation6 + $0x214] ss:$12 sps:$4 sm:$0xff]  }
 0x365   :  { %v2495_v54 = vadd.f32 %v2447_v60, %v2351_v3  ;;  %v5033_v56 = vld [vmem:[#allocation6 + $0x1fc] ss:$12 sps:$4 sm:$0xff]   ;;  %v5041_v60 = vld [vmem:[#allocation6 + $0x22c] ss:$12 sps:$4 sm:$0xff]  }
 0x366   :  { %v5039_v25 = vld [vmem:[#allocation6 + $0x210] ss:$12 sps:$4 sm:$0xff]   ;;  %v5043_v42 = vld [vmem:[#allocation6 + $0x228] ss:$12 sps:$4 sm:$0xff]   ;;  %v5045_v3 = vld [vmem:[#allocation6 + $0x200] ss:$12 sps:$4 sm:$0xff]  }
 0x367   :  { %v2519_v20 = vpack.c.bf16 %v2495_v54, %v2494_v1  ;;  %v5044_v1 = vld [vmem:[#allocation6 + $0x1e8] ss:$12 sps:$4 sm:$0xff]   ;;  %v5046_v54 = vld [vmem:[#allocation6 + $0x218] ss:$12 sps:$4 sm:$0xff]  }
 0x369   :  { %4619 = vmatprep.subr.bf16.mxu0 %v2519_v20  ;;  %4740 = vmatprep.subr.bf16.mxu1 %v2519_v20 }
 0x36a   :  { %4620 = vmatpush3.bf16.msra.mxu0 %v2519_v20  ;;  %3137 = vmatmul.mubr.bf16.gmra.mrb[172].mxu1 %v4979_v57  ;;  %v5047_v57 = vld [vmem:[#allocation6 + $0x230] ss:$12 sps:$4 sm:$0xff]  }
 0x36b   :  { %3144 = vmatprep.mubr.bf16.mxu1 %v4980_v7  ;;  %4748 = vmatpush3.bf16.msra.mxu1 %v2519_v20 }
 0x36c   :  { %4669 = vmatprep.subr.bf16.mxu0 %v5048_v0 }
 0x36d   :  { %4622 = vmatmul.mubr.bf16.vlgmr.msra.gmra.mrb[144].mxu0 %v4968_v45 }
 0x36e   :  { %4625 = vmatprep.mubr.bf16.mxu0 %v4974_v2  ;;  %4670 = vmatpush3.bf16.msra.mxu0 %v5048_v0 }
 0x36f   :  { %4671 = vmatprep.subr.bf16.mxu0 %v5049_v11 }
 0x372   :  { %3145 = vmatmul.mubr.bf16.gmra.mrb[176].mxu1 %v4983_v24  ;;  %4672 = vmatpush3.bf16.msra.mxu0 %v5049_v11 }
 0x373   :  { %3152 = vmatprep.mubr.bf16.mxu1 %v4985_v37  ;;  %4673 = vmatprep.subr.bf16.mxu0 %v5050_v13 }
 0x375   :  { %4626 = vmatmul.mubr.bf16.gmra.mrb[148].mxu0 %v4976_v8 }
 0x376   :  { %4629 = vmatprep.mubr.bf16.mxu0 %v4982_v52  ;;  %4674 = vmatpush3.bf16.msra.mxu0 %v5050_v13 }
 0x377   :  { %4675 = vmatprep.subr.bf16.mxu0 %v5051_v15 }
 0x37a   :  { %3153 = vmatmul.mubr.bf16.gmra.mrb[180].mxu1 %v4987_v18  ;;  %4676 = vmatpush3.bf16.msra.mxu0 %v5051_v15 }
 0x37b   :  { %3160 = vmatprep.mubr.bf16.mxu1 %v4988_v16  ;;  %4677 = vmatprep.subr.bf16.mxu0 %v5052_v58 }
 0x37d   :  { %4630 = vmatmul.mubr.bf16.gmra.mrb[152].mxu0 %v4984_v32 }
 0x37e   :  { %4633 = vmatprep.mubr.bf16.mxu0 %v4990_v30  ;;  %4678 = vmatpush3.bf16.msra.mxu0 %v5052_v58 }
 0x37f   :  { %4679 = vmatprep.subr.bf16.mxu0 %v5053_v47 }
 0x382   :  { %3161 = vmatmul.mubr.bf16.gmra.mrb[184].mxu1 %v4991_v33  ;;  %4680 = vmatpush3.bf16.msra.mxu0 %v5053_v47 }
 0x383   :  { %3168 = vmatprep.mubr.bf16.mxu1 %v4993_v5  ;;  %4681 = vmatprep.subr.bf16.mxu0 %v5054_v23 }
 0x385   :  { %4634 = vmatmul.mubr.bf16.gmra.mrb[156].mxu0 %v4992_v59 }
 0x386   :  { %4637 = vmatprep.mubr.bf16.mxu0 %v4998_v19  ;;  %4682 = vmatpush3.bf16.msra.mxu0 %v5054_v23 }
 0x387   :  { %4683 = vmatprep.subr.bf16.mxu0 %v5055_v55 }
 0x38a   :  { %3169 = vmatmul.mubr.bf16.gmra.mrb[188].mxu1 %v4995_v49  ;;  %4684 = vmatpush3.bf16.msra.mxu0 %v5055_v55 }
 0x38b   :  { %3176 = vmatprep.mubr.bf16.mxu1 %v4996_v28 }
 0x38d   :  { %4638 = vmatmul.mubr.bf16.gmra.mrb[160].mxu0 %v5000_v39 }
 0x38e   :  { %4641 = vmatprep.mubr.bf16.mxu0 %v5006_v10 }
 0x392   :  { %3177 = vmatmul.mubr.bf16.gmra.mrb[192].mxu1 %v4999_v22 }
 0x393   :  { %3184 = vmatprep.mubr.bf16.mxu1 %v5001_v36 }
 0x395   :  { %4642 = vmatmul.mubr.bf16.gmra.mrb[164].mxu0 %v5008_v38 }
 0x396   :  { %4645 = vmatprep.mubr.bf16.mxu0 %v5014_v40 }
 0x39a   :  { %3185 = vmatmul.mubr.bf16.gmra.mrb[196].mxu1 %v5003_v41 }
 0x39b   :  { %3192 = vmatprep.mubr.bf16.mxu1 %v5004_v43 }
 0x39d   :  { %4646 = vmatmul.mubr.bf16.gmra.mrb[168].mxu0 %v5016_v4  ;;  %v3548_v4 = vld [vmem:[#allocation3 + $0x10] sm:$0xff] }
 0x39e   :  { %4649 = vmatprep.mubr.bf16.mxu0 %v5022_v27 }
 0x3a2   :  { %3193 = vmatmul.mubr.bf16.gmra.mrb[200].mxu1 %v5007_v9 }
 0x3a3   :  { %3200 = vmatprep.mubr.bf16.mxu1 %v5009_v26  ;;  %v3549_v26 = vld [vmem:[#allocation3 + $0x18] sm:$0xff] }
 0x3a4   :  { %v3597_v58 = vmul.f32 0.1, %v3549_v26 }
 0x3a5   :  { %4650 = vmatmul.mubr.bf16.gmra.mrb[172].mxu0 %v5024_v31 }
 0x3a6   :  { %4653 = vmatprep.mubr.bf16.mxu0 %v5030_v17 }
 0x3aa   :  { %3201 = vmatmul.mubr.bf16.gmra.mrb[204].mxu1 %v5011_v63  ;;  %v3546_v63 = vld [vmem:[#allocation3] sm:$0xff] }
 0x3ab   :  { %3208 = vmatprep.mubr.bf16.mxu1 %v5012_v51  ;;  %v3547_v51 = vld [vmem:[#allocation3 + $0x8] sm:$0xff] }
 0x3ac   :  { %v3595_v23 = vmul.f32 0.1, %v3547_v51 }
 0x3ad   :  { %4654 = vmatmul.mubr.bf16.gmra.mrb[176].mxu0 %v5032_v48 }
 0x3ae   :  { %4657 = vmatprep.mubr.bf16.mxu0 %v5038_v46 }
 0x3b2   :  { %3209 = vmatmul.mubr.bf16.gmra.mrb[208].mxu1 %v5015_v6 }
 0x3b3   :  { %3216 = vmatprep.mubr.bf16.mxu1 %v5017_v35  ;;  %v3596_v35 = vmul.f32 0.1, %v3548_v4 }
 0x3b5   :  { %4658 = vmatmul.mubr.bf16.gmra.mrb[180].mxu0 %v5040_v21 }
 0x3ba   :  { %3217 = vmatmul.mubr.bf16.gmra.mrb[212].mxu1 %v5019_v34 }
 0x3bb   :  { %3224 = vmatprep.mubr.bf16.mxu1 %v5020_v29 }
 0x3c2   :  { %3225 = vmatmul.mubr.bf16.gmra.mrb[216].mxu1 %v5023_v50 }
 0x3c3   :  { %3232 = vmatprep.mubr.bf16.mxu1 %v5025_v12  ;;  %v3594_v12 = vmul.f32 0.1, %v3546_v63  ;;  %v3557_v63 = vld [vmem:[#allocation3 + $0x58] sm:$0xff] }
 0x3ca   :  { %3233 = vmatmul.mubr.bf16.gmra.mrb[220].mxu1 %v5027_v14 }
 0x3cb   :  { %3240 = vmatprep.mubr.bf16.mxu1 %v5028_v53 }
 0x3d2   :  { %3241 = vmatmul.mubr.bf16.gmra.mrb[224].mxu1 %v5031_v61 }
 0x3d3   :  { %3248 = vmatprep.mubr.bf16.mxu1 %v5033_v56 }
 0x3da   :  { %3249 = vmatmul.mubr.bf16.gmra.mrb[228].mxu1 %v5035_v62 }
 0x3db   :  { %3256 = vmatprep.mubr.bf16.mxu1 %v5036_v44  ;;  %v3552_v44 = vld [vmem:[#allocation3 + $0x30] sm:$0xff] }
 0x3e2   :  { %3257 = vmatmul.mubr.bf16.gmra.mrb[232].mxu1 %v5039_v25 }
 0x3e3   :  { %3264 = vmatprep.mubr.bf16.mxu1 %v5041_v60 }
 0x3ea   :  { %3265 = vmatmul.mubr.bf16.gmra.mrb[236].mxu1 %v5043_v42 }
 0x3eb   :  { %4661 = vmatprep.mubr.bf16.mxu1 %v5044_v1 }
 0x3f2   :  { %4662 = vmatmul.mubr.bf16.vlgmr.msra.gmra.mrb[240].mxu1 %v5045_v3  ;;  %v3553_v3 = vld [vmem:[#allocation3 + $0x38] sm:$0xff] }
 0x3f3   :  { %4665 = vmatprep.mubr.bf16.mxu1 %v5046_v54 }
 0x3fa   :  { %4666 = vmatmul.mubr.bf16.gmra.mrb[244].mxu1 %v5047_v57 }
 0x405   :  { %v3082_v20 = vpop.f32.mrb[144].mxu1 }
 0x406   :  { %v3084_v7 = vpop.f32.mrb[145].mxu1 }
 0x407   :  { %v3085_v45 = vpop.f32.mrb[146].mxu1  ;;  %v3550_v7 = vld [vmem:[#allocation3 + $0x20] sm:$0xff] }
 0x408   :  { %v3087_v2 = vpop.f32.mrb[147].mxu1 }
 0x40d   :  { %v3090_v24 = vpop.f32.mrb[148].mxu1 }
 0x40e   :  { %v3092_v37 = vpop.f32.mrb[149].mxu1 }
 0x40f   :  { %v3093_v8 = vpop.f32.mrb[150].mxu1 }
 0x410   :  { %v3095_v52 = vpop.f32.mrb[151].mxu1 }
 0x411   :  { %v3600_v52 = vmul.f32 0.1, %v3552_v44 }
 0x415   :  { %v3098_v18 = vpop.f32.mrb[152].mxu1 }
 0x416   :  { %v3100_v16 = vpop.f32.mrb[153].mxu1 }
 0x417   :  { %v5505_v32 = vpop.f32.mrb[154].mxu1 }
 0x418   :  { %v3103_v30 = vpop.f32.mrb[155].mxu1 }
 0x41d   :  { %v3106_v0 = vpop.f32.mrb[156].mxu1 }
 0x41e   :  { %v3108_v11 = vpop.f32.mrb[157].mxu1 }
 0x41f   :  { %v3109_v33 = vpop.f32.mrb[158].mxu1 }
 0x420   :  { %v3111_v5 = vpop.f32.mrb[159].mxu1 }
 0x421   :  { %v3601_v5 = vmul.f32 0.1, %v3553_v3 }
 0x425   :  { %v5507_v13 = vpop.f32.mrb[160].mxu1 }
 0x426   :  { %v3116_v59 = vpop.f32.mrb[161].mxu1 }
 0x427   :  { %v5509_v19 = vpop.f32.mrb[162].mxu1 }
 0x428   :  { %v3119_v15 = vpop.f32.mrb[163].mxu1 }
 0x429   :  { %v3598_v15 = vmul.f32 0.1, %v3550_v7 }
 0x42d   :  { %v5511_v49 = vpop.f32.mrb[164].mxu1 }
 0x42e   :  { %v3124_v28 = vpop.f32.mrb[165].mxu1 }
 0x42f   :  { %v5513_v39 = vpop.f32.mrb[166].mxu1 }
 0x430   :  { %v3127_v10 = vpop.f32.mrb[167].mxu1 }
 0x435   :  { %v5515_v22 = vpop.f32.mrb[168].mxu1 }
 0x436   :  { %v3132_v36 = vpop.f32.mrb[169].mxu1 }
 0x437   :  { %v5517_v38 = vpop.f32.mrb[170].mxu1 }
 0x438   :  { %v3135_v40 = vpop.f32.mrb[171].mxu1 }
 0x43d   :  { %v5519_v41 = vpop.f32.mrb[172].mxu1 }
 0x43e   :  { %v3140_v43 = vpop.f32.mrb[173].mxu1 }
 0x43f   :  { %v5521_v27 = vpop.f32.mrb[174].mxu1 }
 0x440   :  { %v4623_v9 = vpop.f32.mrb[144].mxu0  ;;  %v3143_v31 = vpop.f32.mrb[175].mxu1 }
 0x441   :  { %v3307_v17 = vpop.f32.mrb[145].mxu0  ;;  %v3316_v48 = vadd.f32 %v4623_v9, %v3090_v24  ;;  %v3556_v9 = vld [vmem:[#allocation3 + $0x50] sm:$0xff] }
 0x442   :  { %v3308_v46 = vadd.f32 %v3307_v17, %v3082_v20  ;;  %v4624_v6 = vpop.f32.mrb[146].mxu0 }
 0x443   :  { %v3310_v21 = vpop.f32.mrb[147].mxu0  ;;  %v3500_v34 = vmul.f32 0.9, %v3316_v48  ;;  %v3319_v29 = vadd.f32 %v4624_v6, %v3093_v8  ;;  %v3555_v6 = vld [vmem:[#allocation3 + $0x48] sm:$0xff] }
 0x444   :  { %v3498_v50 = vmul.f32 0.9, %v3308_v46  ;;  %v3311_v47 = vadd.f32 %v3310_v21, %v3085_v45  ;;  %v3551_v45 = vld [vmem:[#allocation3 + $0x28] sm:$0xff]  ;;  %v3554_v46 = vld [vmem:[#allocation3 + $0x40] sm:$0xff] }
 0x445   :  { %v3501_v14 = vmul.f32 0.9, %v3319_v29  ;;  %v5523_v53 = vpop.f32.mrb[176].mxu1  ;;  %v3644_v56 = vadd.f32 %v3596_v35, %v3500_v34  ;;  %v3599_v10 = vmul.f32 0.1, %v3551_v45 }
 0x446   :  { %v3499_v55 = vmul.f32 0.9, %v3311_v47  ;;  %v3148_v61 = vpop.f32.mrb[177].mxu1  ;;  %v3642_v60 = vadd.f32 %v3594_v12, %v3498_v50 }
 0x447   :  { %v3645_v62 = vadd.f32 %v3597_v58, %v3501_v14  ;;  %v5525_v25 = vpop.f32.mrb[178].mxu1  ;;  %v3604_v58 = vmul.f32 0.1, %v3556_v9 }
 0x448   :  { %v3643_v42 = vadd.f32 %v3595_v23, %v3499_v55  ;;  %v4627_v1 = vpop.f32.mrb[148].mxu0  ;;  %v3151_v54 = vpop.f32.mrb[179].mxu1  ;;  %v3605_v23 = vmul.f32 0.1, %v3557_v63  ;;  %v3602_v55 = vmul.f32 0.1, %v3554_v46 }
 0x449   :  { %v3691_v57 = vpack.c.bf16 %v3645_v62, %v3644_v56  ;;  %v3323_v20 = vpop.f32.mrb[149].mxu0  ;;  %v3332_v2 = vadd.f32 %v4627_v1, %v3106_v0  ;;  %v3603_v56 = vmul.f32 0.1, %v3555_v6  ;;  %v3560_v1 = vld [vmem:[#allocation3 + $0x70] sm:$0xff] }
 0x44a   :  { %v3690_v24 = vpack.c.bf16 %v3643_v42, %v3642_v60  ;;  %v3324_v37 = vadd.f32 %v3323_v20, %v3098_v18  ;;  %v4628_v8 = vpop.f32.mrb[150].mxu0  ;;  %v3561_v20 = vld [vmem:[#allocation3 + $0x78] sm:$0xff] }
 0x44b   :  { %v3326_v16 = vpop.f32.mrb[151].mxu0  ;;  %v3504_v30 = vmul.f32 0.9, %v3332_v2  ;;  %v3335_v11 = vadd.f32 %v4628_v8, %v3109_v33  ;;  %v3558_v2 = vld [vmem:[#allocation3 + $0x60] sm:$0xff] }
 0x44c   :  { %4685 = vmatprep.mubr.bf16.mxu0 %v3690_v24  ;;  %v3502_v59 = vmul.f32 0.9, %v3324_v37  ;;  %v3327_v28 = vadd.f32 %v3326_v16, %v5505_v32  ;;  %v3559_v24 = vld [vmem:[#allocation3 + $0x68] sm:$0xff] }
 0x44d   :  { %4686 = vmatmul.mubr.bf16.vlgmr.msra.gmra.mrb[184].mxu0 %v3691_v57  ;;  %v3505_v36 = vmul.f32 0.9, %v3335_v11  ;;  %v5528_v40 = vpop.f32.mrb[180].mxu1  ;;  %v3648_v4 = vadd.f32 %v3600_v52, %v3504_v30  ;;  %v3608_v30 = vmul.f32 0.1, %v3560_v1 }
 0x44e   :  { %v3503_v43 = vmul.f32 0.9, %v3327_v28  ;;  %v3156_v0 = vpop.f32.mrb[181].mxu1  ;;  %v3646_v31 = vadd.f32 %v3598_v15, %v3502_v59  ;;  %v3609_v15 = vmul.f32 0.1, %v3561_v20 }
 0x44f   :  { %v3649_v18 = vadd.f32 %v3601_v5, %v3505_v36  ;;  %v5530_v26 = vpop.f32.mrb[182].mxu1 }
 0x450   :  { %v3647_v33 = vadd.f32 %v3599_v10, %v3503_v43  ;;  %v4631_v17 = vpop.f32.mrb[152].mxu0  ;;  %v3159_v51 = vpop.f32.mrb[183].mxu1  ;;  %v3606_v10 = vmul.f32 0.1, %v3558_v2  ;;  %v3607_v43 = vmul.f32 0.1, %v3559_v24 }
 0x451   :  { %v3339_v48 = vpop.f32.mrb[153].mxu0  ;;  %v3693_v32 = vpack.c.bf16 %v3649_v18, %v3648_v4  ;;  %v3348_v35 = vadd.f32 %v4631_v17, %v5511_v49 }
 0x452   :  { %v3692_v21 = vpack.c.bf16 %v3647_v33, %v3646_v31  ;;  %v3340_v34 = vadd.f32 %v3339_v48, %v5507_v13  ;;  %v4632_v29 = vpop.f32.mrb[154].mxu0  ;;  %v3564_v31 = vld [vmem:[#allocation3 + $0x90] sm:$0xff] }
 0x453   :  { %v3342_v50 = vpop.f32.mrb[155].mxu0  ;;  %v3508_v12 = vmul.f32 0.9, %v3348_v35  ;;  %v3351_v47 = vadd.f32 %v4632_v29, %v5513_v39  ;;  %v3563_v35 = vld [vmem:[#allocation3 + $0x88] sm:$0xff] }
 0x454   :  { %4689 = vmatprep.mubr.bf16.mxu0 %v3692_v21  ;;  %v3506_v14 = vmul.f32 0.9, %v3340_v34  ;;  %v3343_v61 = vadd.f32 %v3342_v50, %v5509_v19 }
 0x455   :  { %4690 = vmatmul.mubr.bf16.gmra.mrb[188].mxu0 %v3693_v32  ;;  %v3509_v62 = vmul.f32 0.9, %v3351_v47  ;;  %v5536_v44 = vpop.f32.mrb[184].mxu1  ;;  %v3652_v13 = vadd.f32 %v3604_v58, %v3508_v12  ;;  %v3562_v32 = vld [vmem:[#allocation3 + $0x80] sm:$0xff]  ;;  %v3612_v58 = vmul.f32 0.1, %v3564_v31 }
 0x456   :  { %v3507_v49 = vmul.f32 0.9, %v3343_v61  ;;  %v3164_v60 = vpop.f32.mrb[185].mxu1  ;;  %v3650_v54 = vadd.f32 %v3602_v55, %v3506_v14  ;;  %v3610_v55 = vmul.f32 0.1, %v3562_v32 }
 0x457   :  { %v3653_v42 = vadd.f32 %v3605_v23, %v3509_v62  ;;  %v5538_v3 = vpop.f32.mrb[186].mxu1 }
 0x458   :  { %v3651_v39 = vadd.f32 %v3603_v56, %v3507_v49  ;;  %v4635_v57 = vpop.f32.mrb[156].mxu0  ;;  %v3167_v7 = vpop.f32.mrb[187].mxu1  ;;  %v3611_v56 = vmul.f32 0.1, %v3563_v35 }
 0x459   :  { %v3355_v45 = vpop.f32.mrb[157].mxu0  ;;  %v3695_v19 = vpack.c.bf16 %v3653_v42, %v3652_v13  ;;  %v3364_v37 = vadd.f32 %v4635_v57, %v5519_v41  ;;  %v3568_v42 = vld [vmem:[#allocation3 + $0xb0] sm:$0xff] }
 0x45a   :  { %v3694_v8 = vpack.c.bf16 %v3651_v39, %v3650_v54  ;;  %v3356_v52 = vadd.f32 %v3355_v45, %v5515_v22  ;;  %v4636_v16 = vpop.f32.mrb[158].mxu0  ;;  %v3566_v45 = vld [vmem:[#allocation3 + $0xa0] sm:$0xff] }
 0x45b   :  { %v3358_v11 = vpop.f32.mrb[159].mxu0  ;;  %v3512_v5 = vmul.f32 0.9, %v3364_v37  ;;  %v3367_v59 = vadd.f32 %v4636_v16, %v5521_v27  ;;  %v3565_v27 = vld [vmem:[#allocation3 + $0x98] sm:$0xff] }
 0x45c   :  { %4693 = vmatprep.mubr.bf16.mxu0 %v3694_v8  ;;  %v3510_v28 = vmul.f32 0.9, %v3356_v52  ;;  %v3359_v36 = vadd.f32 %v3358_v11, %v5517_v38  ;;  %v3613_v23 = vmul.f32 0.1, %v3565_v27  ;;  %v3616_v52 = vmul.f32 0.1, %v3568_v42 }
 0x45d   :  { %4694 = vmatmul.mubr.bf16.gmra.mrb[192].mxu0 %v3695_v19  ;;  %v3513_v0 = vmul.f32 0.9, %v3367_v59  ;;  %v3170_v4 = vpop.f32.mrb[188].mxu1  ;;  %v3656_v9 = vadd.f32 %v3608_v30, %v3512_v5  ;;  %v3567_v19 = vld [vmem:[#allocation3 + $0xa8] sm:$0xff]  ;;  %v3570_v27 = vld [vmem:[#allocation3 + $0xc0] sm:$0xff] }
 0x45e   :  { %v3511_v41 = vmul.f32 0.9, %v3359_v36  ;;  %v3172_v18 = vpop.f32.mrb[189].mxu1  ;;  %v3654_v17 = vadd.f32 %v3606_v10, %v3510_v28  ;;  %v3615_v10 = vmul.f32 0.1, %v3567_v19  ;;  %v3574_v42 = vld [vmem:[#allocation3 + $0xe0] sm:$0xff] }
 0x45f   :  { %v3657_v22 = vadd.f32 %v3609_v15, %v3513_v0  ;;  %v3173_v33 = vpop.f32.mrb[190].mxu1  ;;  %v3614_v15 = vmul.f32 0.1, %v3566_v45  ;;  %v3622_v45 = vmul.f32 0.1, %v3574_v42 }
 0x460   :  { %v3655_v63 = vadd.f32 %v3607_v43, %v3511_v41  ;;  %v4639_v51 = vpop.f32.mrb[160].mxu0  ;;  %v3175_v48 = vpop.f32.mrb[191].mxu1 }
 0x461   :  { %v3371_v46 = vpop.f32.mrb[161].mxu0  ;;  %v3697_v6 = vpack.c.bf16 %v3657_v22, %v3656_v9  ;;  %v3380_v38 = vadd.f32 %v4639_v51, %v5528_v40 }
 0x462   :  { %v3696_v21 = vpack.c.bf16 %v3655_v63, %v3654_v17  ;;  %v3372_v34 = vadd.f32 %v3371_v46, %v5523_v53  ;;  %v4640_v29 = vpop.f32.mrb[162].mxu0  ;;  %v3571_v46 = vld [vmem:[#allocation3 + $0xc8] sm:$0xff] }
 0x463   :  { %v3374_v50 = vpop.f32.mrb[163].mxu0  ;;  %v3516_v12 = vmul.f32 0.9, %v3380_v38  ;;  %v3383_v47 = vadd.f32 %v4640_v29, %v5530_v26  ;;  %v3569_v26 = vld [vmem:[#allocation3 + $0xb8] sm:$0xff] }
 0x464   :  { %4697 = vmatprep.mubr.bf16.mxu0 %v3696_v21  ;;  %v3514_v14 = vmul.f32 0.9, %v3372_v34  ;;  %v3375_v61 = vadd.f32 %v3374_v50, %v5525_v25  ;;  %v3617_v5 = vmul.f32 0.1, %v3569_v26  ;;  %v3575_v26 = vld [vmem:[#allocation3 + $0xe8] sm:$0xff] }
 0x465   :  { %4698 = vmatmul.mubr.bf16.gmra.mrb[196].mxu0 %v3697_v6  ;;  %v3517_v62 = vmul.f32 0.9, %v3383_v47  ;;  %v3178_v49 = vpop.f32.mrb[192].mxu1  ;;  %v3660_v13 = vadd.f32 %v3612_v58, %v3516_v12  ;;  %v3618_v12 = vmul.f32 0.1, %v3570_v27 }
 0x466   :  { %v3515_v40 = vmul.f32 0.9, %v3375_v61  ;;  %v3180_v60 = vpop.f32.mrb[193].mxu1  ;;  %v3658_v54 = vadd.f32 %v3610_v55, %v3514_v14 }
 0x467   :  { %v3661_v53 = vadd.f32 %v3613_v23, %v3517_v62  ;;  %v3181_v1 = vpop.f32.mrb[194].mxu1  ;;  %v3619_v23 = vmul.f32 0.1, %v3571_v46 }
 0x468   :  { %v3659_v39 = vadd.f32 %v3611_v56, %v3515_v40  ;;  %v4643_v57 = vpop.f32.mrb[164].mxu0  ;;  %v3183_v20 = vpop.f32.mrb[195].mxu1 }
 0x469   :  { %v3387_v7 = vpop.f32.mrb[165].mxu0  ;;  %v3699_v2 = vpack.c.bf16 %v3661_v53, %v3660_v13  ;;  %v3396_v25 = vadd.f32 %v4643_v57, %v3170_v4 }
 0x46a   :  { %v3698_v24 = vpack.c.bf16 %v3659_v39, %v3658_v54  ;;  %v3388_v37 = vadd.f32 %v3387_v7, %v5536_v44  ;;  %v4644_v8 = vpop.f32.mrb[166].mxu0  ;;  %v3572_v44 = vld [vmem:[#allocation3 + $0xd0] sm:$0xff] }
 0x46b   :  { %v3390_v16 = vpop.f32.mrb[167].mxu0  ;;  %v3520_v30 = vmul.f32 0.9, %v3396_v25  ;;  %v3399_v11 = vadd.f32 %v4644_v8, %v3173_v33  ;;  %v3573_v33 = vld [vmem:[#allocation3 + $0xd8] sm:$0xff]  ;;  %v3620_v38 = vmul.f32 0.1, %v3572_v44 }
 0x46c   :  { %4701 = vmatprep.mubr.bf16.mxu0 %v3698_v24  ;;  %v3518_v59 = vmul.f32 0.9, %v3388_v37  ;;  %v3391_v28 = vadd.f32 %v3390_v16, %v5538_v3  ;;  %v3621_v58 = vmul.f32 0.1, %v3573_v33  ;;  %v3623_v24 = vmul.f32 0.1, %v3575_v26 }
 0x46d   :  { %4702 = vmatmul.mubr.bf16.gmra.mrb[200].mxu0 %v3699_v2  ;;  %v3521_v36 = vmul.f32 0.9, %v3399_v11  ;;  %v3186_v43 = vpop.f32.mrb[196].mxu1  ;;  %v3664_v41 = vadd.f32 %v3616_v52, %v3520_v30  ;;  %v3576_v37 = vld [vmem:[#allocation3 + $0xf0] sm:$0xff]  ;;  %v3577_v8 = vld [vmem:[#allocation3 + $0xf8] sm:$0xff]  ;;  %v3578_v33 = vld [vmem:[#allocation3 + $0x100] sm:$0xff] }
 0x46e   :  { %v3519_v0 = vmul.f32 0.9, %v3391_v28  ;;  %v3188_v4 = vpop.f32.mrb[197].mxu1  ;;  %v3662_v22 = vadd.f32 %v3614_v15, %v3518_v59  ;;  %v3625_v15 = vmul.f32 0.1, %v3577_v8 }
 0x46f   :  { %v3665_v18 = vadd.f32 %v3617_v5, %v3521_v36  ;;  %v3189_v9 = vpop.f32.mrb[198].mxu1  ;;  %v3624_v5 = vmul.f32 0.1, %v3576_v37 }
 0x470   :  { %v3663_v31 = vadd.f32 %v3615_v10, %v3519_v0  ;;  %v4647_v17 = vpop.f32.mrb[168].mxu0  ;;  %v3191_v63 = vpop.f32.mrb[199].mxu1 }
 0x471   :  { %v3403_v51 = vpop.f32.mrb[169].mxu0  ;;  %v3701_v48 = vpack.c.bf16 %v3665_v18, %v3664_v41  ;;  %v3412_v3 = vadd.f32 %v4647_v17, %v3186_v43 }
 0x472   :  { %v3700_v32 = vpack.c.bf16 %v3663_v31, %v3662_v22  ;;  %v3404_v6 = vadd.f32 %v3403_v51, %v3178_v49  ;;  %v4648_v35 = vpop.f32.mrb[170].mxu0  ;;  %v3579_v51 = vld [vmem:[#allocation3 + $0x108] sm:$0xff] }
 0x473   :  { %v3406_v21 = vpop.f32.mrb[171].mxu0  ;;  %v3524_v34 = vmul.f32 0.9, %v3412_v3  ;;  %v3415_v29 = vadd.f32 %v4648_v35, %v3189_v9  ;;  %v3626_v3 = vmul.f32 0.1, %v3578_v33 }
 0x474   :  { %4705 = vmatprep.mubr.bf16.mxu0 %v3700_v32  ;;  %v3522_v50 = vmul.f32 0.9, %v3404_v6  ;;  %v3407_v47 = vadd.f32 %v3406_v21, %v3181_v1  ;;  %v3627_v21 = vmul.f32 0.1, %v3579_v51 }
 0x475   :  { %4706 = vmatmul.mubr.bf16.gmra.mrb[204].mxu0 %v3701_v48  ;;  %v3525_v14 = vmul.f32 0.9, %v3415_v29  ;;  %v3194_v55 = vpop.f32.mrb[200].mxu1  ;;  %v3668_v62 = vadd.f32 %v3620_v38, %v3524_v34 }
 0x476   :  { %v3523_v61 = vmul.f32 0.9, %v3407_v47  ;;  %v3196_v56 = vpop.f32.mrb[201].mxu1  ;;  %v3666_v49 = vadd.f32 %v3618_v12, %v3522_v50 }
 0x477   :  { %v3669_v40 = vadd.f32 %v3621_v58, %v3525_v14  ;;  %v3197_v60 = vpop.f32.mrb[202].mxu1  ;;  %v3580_v14 = vld [vmem:[#allocation3 + $0x110] sm:$0xff] }
 0x478   :  { %v3667_v13 = vadd.f32 %v3619_v23, %v3523_v61  ;;  %v4651_v53 = vpop.f32.mrb[172].mxu0  ;;  %v3199_v54 = vpop.f32.mrb[203].mxu1  ;;  %v3581_v61 = vld [vmem:[#allocation3 + $0x118] sm:$0xff] }
 0x479   :  { %v3419_v39 = vpop.f32.mrb[173].mxu0  ;;  %v3703_v57 = vpack.c.bf16 %v3669_v40, %v3668_v62  ;;  %v3629_v42 = vmul.f32 0.1, %v3581_v61 }
 0x47a   :  { %v3702_v20 = vpack.c.bf16 %v3667_v13, %v3666_v49  ;;  %v3420_v7 = vadd.f32 %v3419_v39, %v3194_v55  ;;  %v4652_v1 = vpop.f32.mrb[174].mxu0 }
 0x47b   :  { %v3422_v2 = vpop.f32.mrb[175].mxu0 }
 0x47c   :  { %4709 = vmatprep.mubr.bf16.mxu0 %v3702_v20  ;;  %v3526_v19 = vmul.f32 0.9, %v3420_v7  ;;  %v3423_v25 = vadd.f32 %v3422_v2, %v3197_v60  ;;  %v3628_v60 = vmul.f32 0.1, %v3580_v14  ;;  %v3582_v20 = vld [vmem:[#allocation3 + $0x120] sm:$0xff]  ;;  %v3589_v14 = vld [vmem:[#allocation3 + $0x158] sm:$0xff] }
 0x47d   :  { %4710 = vmatmul.mubr.bf16.gmra.mrb[208].mxu0 %v3703_v57  ;;  %v3202_v52 = vpop.f32.mrb[204].mxu1 }
 0x47e   :  { %v3527_v16 = vmul.f32 0.9, %v3423_v25  ;;  %v3428_v30 = vadd.f32 %v4651_v53, %v3202_v52  ;;  %v3204_v11 = vpop.f32.mrb[205].mxu1  ;;  %v3670_v28 = vadd.f32 %v3622_v45, %v3526_v19 }
 0x47f   :  { %v3205_v59 = vpop.f32.mrb[206].mxu1  ;;  %v3584_v11 = vld [vmem:[#allocation3 + $0x130] sm:$0xff] }
 0x480   :  { %v3671_v10 = vadd.f32 %v3623_v24, %v3527_v16  ;;  %v3528_v36 = vmul.f32 0.9, %v3428_v30  ;;  %v3431_v43 = vadd.f32 %v4652_v1, %v3205_v59  ;;  %v3207_v0 = vpop.f32.mrb[207].mxu1  ;;  %v4655_v4 = vpop.f32.mrb[176].mxu0  ;;  %v3583_v1 = vld [vmem:[#allocation3 + $0x128] sm:$0xff] }
 0x481   :  { %v3435_v41 = vpop.f32.mrb[177].mxu0  ;;  %v3630_v24 = vmul.f32 0.1, %v3582_v20  ;;  %v3631_v16 = vmul.f32 0.1, %v3583_v1 }
 0x482   :  { %v3529_v18 = vmul.f32 0.9, %v3431_v43  ;;  %v3704_v44 = vpack.c.bf16 %v3671_v10, %v3670_v28  ;;  %v4656_v9 = vpop.f32.mrb[178].mxu0  ;;  %v3672_v31 = vadd.f32 %v3624_v5, %v3528_v36  ;;  %v3585_v28 = vld [vmem:[#allocation3 + $0x138] sm:$0xff] }
 0x483   :  { %v3438_v22 = vpop.f32.mrb[179].mxu0 }
 0x484   :  { %v3673_v17 = vadd.f32 %v3625_v15, %v3529_v18  ;;  %4713 = vmatprep.mubr.bf16.mxu0 %v3704_v44 }
 0x485   :  { %v3210_v63 = vpop.f32.mrb[208].mxu1 }
 0x486   :  { %v3212_v27 = vpop.f32.mrb[209].mxu1  ;;  %v3436_v48 = vadd.f32 %v3435_v41, %v3210_v63  ;;  %v3705_v46 = vpack.c.bf16 %v3673_v17, %v3672_v31 }
 0x487   :  { %v3213_v32 = vpop.f32.mrb[210].mxu1 }
 0x488   :  { %v3530_v6 = vmul.f32 0.9, %v3436_v48  ;;  %4714 = vmatmul.mubr.bf16.gmra.mrb[212].mxu0 %v3705_v46  ;;  %v3215_v35 = vpop.f32.mrb[211].mxu1  ;;  %v3439_v38 = vadd.f32 %v3438_v22, %v3213_v32  ;;  %v4659_v34 = vpop.f32.mrb[180].mxu0 }
 0x489   :  { %v3451_v29 = vpop.f32.mrb[181].mxu0 }
 0x48a   :  { %v3531_v58 = vmul.f32 0.9, %v3439_v38  ;;  %v4660_v50 = vpop.f32.mrb[182].mxu0  ;;  %v3674_v47 = vadd.f32 %v3626_v3, %v3530_v6 }
 0x48b   :  { %v3454_v12 = vpop.f32.mrb[183].mxu0 }
 0x48c   :  { %v3675_v23 = vadd.f32 %v3627_v21, %v3531_v58 }
 0x48d   :  { %v3218_v55 = vpop.f32.mrb[212].mxu1 }
 0x48e   :  { %v3444_v56 = vadd.f32 %v4655_v4, %v3218_v55  ;;  %v3220_v62 = vpop.f32.mrb[213].mxu1  ;;  %v3706_v40 = vpack.c.bf16 %v3675_v23, %v3674_v47  ;;  %v3632_v4 = vmul.f32 0.1, %v3584_v11  ;;  %v3588_v47 = vld [vmem:[#allocation3 + $0x150] sm:$0xff] }
 0x48f   :  { %v3221_v49 = vpop.f32.mrb[214].mxu1  ;;  %v3587_v62 = vld [vmem:[#allocation3 + $0x148] sm:$0xff] }
 0x490   :  { %v3532_v13 = vmul.f32 0.9, %v3444_v56  ;;  %v3447_v53 = vadd.f32 %v4656_v9, %v3221_v49  ;;  %v3223_v54 = vpop.f32.mrb[215].mxu1  ;;  %4717 = vmatprep.mubr.bf16.mxu0 %v3706_v40  ;;  %v3633_v9 = vmul.f32 0.1, %v3585_v28  ;;  %v3586_v56 = vld [vmem:[#allocation3 + $0x140] sm:$0xff] }
 0x491   :  { %v3636_v40 = vmul.f32 0.1, %v3588_v47  ;;  %v3635_v20 = vmul.f32 0.1, %v3587_v62 }
 0x492   :  { %v3533_v39 = vmul.f32 0.9, %v3447_v53  ;;  %v3676_v57 = vadd.f32 %v3628_v60, %v3532_v13 }
 0x494   :  { %v3677_v26 = vadd.f32 %v3629_v42, %v3533_v39  ;;  %v3637_v42 = vmul.f32 0.1, %v3589_v14 }
 0x495   :  { %v3226_v7 = vpop.f32.mrb[216].mxu1 }
 0x496   :  { %v3228_v45 = vpop.f32.mrb[217].mxu1  ;;  %v3452_v2 = vadd.f32 %v3451_v29, %v3226_v7  ;;  %v3707_v19 = vpack.c.bf16 %v3677_v26, %v3676_v57  ;;  %v3634_v57 = vmul.f32 0.1, %v3586_v56 }
 0x497   :  { %v3229_v25 = vpop.f32.mrb[218].mxu1 }
 0x498   :  { %v3231_v37 = vpop.f32.mrb[219].mxu1  ;;  %v3534_v8 = vmul.f32 0.9, %v3452_v2  ;;  %4718 = vmatmul.mubr.bf16.gmra.mrb[216].mxu0 %v3707_v19  ;;  %v3455_v52 = vadd.f32 %v3454_v12, %v3229_v25  ;;  %v3592_v19 = vld [vmem:[#allocation3 + $0x170] sm:$0xff] }
 0x49a   :  { %v3535_v30 = vmul.f32 0.9, %v3455_v52  ;;  %v3678_v5 = vadd.f32 %v3630_v24, %v3534_v8  ;;  %v3593_v8 = vld [vmem:[#allocation3 + $0x178] sm:$0xff] }
 0x49c   :  { %v3679_v59 = vadd.f32 %v3631_v16, %v3535_v30  ;;  %v3590_v30 = vld [vmem:[#allocation3 + $0x160] sm:$0xff] }
 0x49d   :  { %v3234_v15 = vpop.f32.mrb[220].mxu1 }
 0x49e   :  { %v3236_v10 = vpop.f32.mrb[221].mxu1  ;;  %v3460_v36 = vadd.f32 %v4659_v34, %v3234_v15  ;;  %v3708_v43 = vpack.c.bf16 %v3679_v59, %v3678_v5  ;;  %v3591_v5 = vld [vmem:[#allocation3 + $0x168] sm:$0xff]  ;;  %v3640_v15 = vmul.f32 0.1, %v3592_v19 }
 0x49f   :  { %v3237_v0 = vpop.f32.mrb[222].mxu1 }
 0x4a0   :  { %v3239_v41 = vpop.f32.mrb[223].mxu1  ;;  %v3536_v18 = vmul.f32 0.9, %v3460_v36  ;;  %v3463_v44 = vadd.f32 %v4660_v50, %v3237_v0  ;;  %4721 = vmatprep.mubr.bf16.mxu0 %v3708_v43  ;;  %v3641_v0 = vmul.f32 0.1, %v3593_v8 }
 0x4a2   :  { %v3537_v22 = vmul.f32 0.9, %v3463_v44  ;;  %v3680_v31 = vadd.f32 %v3632_v4, %v3536_v18  ;;  %v3638_v18 = vmul.f32 0.1, %v3590_v30 }
 0x4a4   :  { %v3681_v17 = vadd.f32 %v3633_v9, %v3537_v22  ;;  %v3639_v9 = vmul.f32 0.1, %v3591_v5 }
 0x4a5   :  { %v3242_v33 = vpop.f32.mrb[224].mxu1 }
 0x4a6   :  { %v3244_v63 = vpop.f32.mrb[225].mxu1  ;;  %v3709_v51 = vpack.c.bf16 %v3681_v17, %v3680_v31 }
 0x4a7   :  { %v3245_v27 = vpop.f32.mrb[226].mxu1 }
 0x4a8   :  { %v3247_v48 = vpop.f32.mrb[227].mxu1  ;;  %4722 = vmatmul.mubr.bf16.gmra.mrb[220].mxu0 %v3709_v51 }
 0x4ad   :  { %v3250_v46 = vpop.f32.mrb[228].mxu1 }
 0x4ae   :  { %v3252_v3 = vpop.f32.mrb[229].mxu1 }
 0x4af   :  { %v3253_v32 = vpop.f32.mrb[230].mxu1 }
 0x4b0   :  { %v3255_v6 = vpop.f32.mrb[231].mxu1 }
 0x4b5   :  { %v3258_v35 = vpop.f32.mrb[232].mxu1 }
 0x4b6   :  { %v3260_v38 = vpop.f32.mrb[233].mxu1 }
 0x4b7   :  { %v3261_v21 = vpop.f32.mrb[234].mxu1 }
 0x4b8   :  { %v3263_v34 = vpop.f32.mrb[235].mxu1 }
 0x4bd   :  { %v3266_v29 = vpop.f32.mrb[236].mxu1 }
 0x4be   :  { %v3268_v58 = vpop.f32.mrb[237].mxu1 }
 0x4bf   :  { %v3269_v50 = vpop.f32.mrb[238].mxu1 }
 0x4c0   :  { %v3271_v12 = vpop.f32.mrb[239].mxu1 }
 0x4c5   :  { %v4663_v23 = vpop.f32.mrb[240].mxu1 }
 0x4c6   :  { %v3476_v55 = vadd.f32 %v4663_v23, %v3250_v46  ;;  %v3467_v61 = vpop.f32.mrb[241].mxu1  ;;  %v5553_v46 = vld [vmem:[%s5621_s3] ss:$0 sm:$0xff]  ;;  %s5185_s3 = smov [#allocation9]  }
 0x4c7   :  { %v3468_v60 = vadd.f32 %v3467_v61, %v3242_v33  ;;  %v4664_v49 = vpop.f32.mrb[242].mxu1  ;;  %s4111_s30 = sshll.u32 %s5185_s3, 4  ;;  %s4112_s30 = int_to_ptr.vmem [resolvable:$true] %s4111_s30 }
 0x4c8   :  { %v3540_v13 = vmul.f32 0.9, %v3476_v55  ;;  %v3479_v53 = vadd.f32 %v4664_v49, %v3253_v32  ;;  %v3470_v54 = vpop.f32.mrb[243].mxu1  ;;  %s5147_s5 = scalar_lea.vmem %s4112_s30, 6144  ;;  %p5152_p11 = scmp.lt.s32.totalorder %s4112_s30, %s4112_s30 }
 0x4c9   :  { %v3538_v39 = vmul.f32 0.9, %v3468_v60  ;;  %v3471_v26 = vadd.f32 %v3470_v54, %v3245_v27  ;;  %p5148_p10 = scmp.ne.s32.totalorder %s4112_s30, %s5147_s5  ;;  %p5153_p12 = scmp.lt.s32.totalorder %s5147_s5, %s5147_s5 }
 0x4ca   :  { %v3541_v7 = vmul.f32 0.9, %v3479_v53  ;;  %v3684_v45 = vadd.f32 %v3636_v40, %v3540_v13 }
 0x4cb   :  { %v3539_v1 = vmul.f32 0.9, %v3471_v26  ;;  %v3682_v25 = vadd.f32 %v3634_v57, %v3538_v39  ;;  %p5154_p13 = por %p5153_p12, %p5152_p11 }
 0x4cc   :  { %v3685_v2 = vadd.f32 %v3637_v42, %v3541_v7 }
 0x4cd   :  { %v3683_v24 = vadd.f32 %v3635_v20, %v3539_v1  ;;  %v4667_v37 = vpop.f32.mrb[244].mxu1  ;;  %p5155_p0 = pnand %p5154_p13, %p5148_p10 }
 0x4ce   :  { %v3492_v52 = vadd.f32 %v4667_v37, %v3266_v29  ;;  %v3483_v16 = vpop.f32.mrb[245].mxu1  ;;  %v3711_v11 = vpack.c.bf16 %v3685_v2, %v3684_v45 }
 0x4cf   :  { %v3710_v59 = vpack.c.bf16 %v3683_v24, %v3682_v25  ;;  %v3484_v28 = vadd.f32 %v3483_v16, %v3258_v35  ;;  %v4668_v10 = vpop.f32.mrb[246].mxu1 }
 0x4d0   :  { %v3544_v36 = vmul.f32 0.9, %v3492_v52  ;;  %v3495_v43 = vadd.f32 %v4668_v10, %v3269_v50  ;;  %v3486_v4 = vpop.f32.mrb[247].mxu1 }
 0x4d1   :  { %4725 = vmatprep.mubr.bf16.mxu0 %v3710_v59  ;;  %v3542_v41 = vmul.f32 0.9, %v3484_v28  ;;  %v3487_v44 = vadd.f32 %v3486_v4, %v3261_v21 }
 0x4d2   :  { %4726 = vmatmul.mubr.bf16.gmra.mrb[224].mxu0 %v3711_v11  ;;  %v3545_v22 = vmul.f32 0.9, %v3495_v43  ;;  %v3688_v17 = vadd.f32 %v3640_v15, %v3544_v36 }
 0x4d3   :  { %v3543_v31 = vmul.f32 0.9, %v3487_v44  ;;  %v3686_v63 = vadd.f32 %v3638_v18, %v3542_v41 }
 0x4d4   :  { %v3689_v33 = vadd.f32 %v3641_v0, %v3545_v22 }
 0x4d5   :  { %v3687_v51 = vadd.f32 %v3639_v9, %v3543_v31 }
 0x4d6   :  { %v3713_v27 = vpack.c.bf16 %v3689_v33, %v3688_v17 }
 0x4d7   :  { %v3712_v48 = vpack.c.bf16 %v3687_v51, %v3686_v63 }
 0x4d9   :  { %4729 = vmatprep.mubr.bf16.mxu0 %v3712_v48 }
 0x4da   :  { %4730 = vmatmul.mubr.bf16.gmra.mrb[228].mxu0 %v3713_v27 }
 0x520   :  { %v4687_v3 = vpop.f32.mrb[184].mxu0 }
 0x521   :  { %v3876_v32 = vadd.f32 %v4687_v3, %v5553_v46  ;;  %v3867_v6 = vpop.f32.mrb[185].mxu0 }
 0x522   :  { %v3868_v35 = vadd.f32 %v5553_v46, %v3867_v6  ;;  %v4688_v38 = vpop.f32.mrb[186].mxu0 }
 0x523   :  { %4060 = vst [vmem:[#allocation9 + $0x10] sm:$0xff] %v3876_v32  ;;  %v3879_v21 = vadd.f32 %v4688_v38, %v5553_v46  ;;  %v3870_v34 = vpop.f32.mrb[187].mxu0 }
 0x524   :  { %4058 = vst [vmem:[#allocation9] sm:$0xff] %v3868_v35  ;;  %v3871_v29 = vadd.f32 %v5553_v46, %v3870_v34 }
 0x525   :  { %4061 = vst [vmem:[#allocation9 + $0x18] sm:$0xff] %v3879_v21 }
 0x526   :  { %4059 = vst [vmem:[#allocation9 + $0x8] sm:$0xff] %v3871_v29 }
 0x528   :  { %v4691_v58 = vpop.f32.mrb[188].mxu0 }
 0x529   :  { %v3892_v50 = vadd.f32 %v4691_v58, %v5553_v46  ;;  %v3883_v12 = vpop.f32.mrb[189].mxu0 }
 0x52a   :  { %v3884_v47 = vadd.f32 %v5553_v46, %v3883_v12  ;;  %v4692_v23 = vpop.f32.mrb[190].mxu0 }
 0x52b   :  { %4064 = vst [vmem:[#allocation9 + $0x30] sm:$0xff] %v3892_v50  ;;  %v3895_v14 = vadd.f32 %v4692_v23, %v5553_v46  ;;  %v3886_v55 = vpop.f32.mrb[191].mxu0 }
 0x52c   :  { %4062 = vst [vmem:[#allocation9 + $0x20] sm:$0xff] %v3884_v47  ;;  %v3887_v61 = vadd.f32 %v5553_v46, %v3886_v55 }
 0x52d   :  { %4065 = vst [vmem:[#allocation9 + $0x38] sm:$0xff] %v3895_v14 }
 0x52e   :  { %4063 = vst [vmem:[#allocation9 + $0x28] sm:$0xff] %v3887_v61 }
 0x530   :  { %v4695_v56 = vpop.f32.mrb[192].mxu0 }
 0x531   :  { %v3908_v62 = vadd.f32 %v4695_v56, %v5553_v46  ;;  %v3899_v40 = vpop.f32.mrb[193].mxu0 }
 0x532   :  { %v3900_v60 = vadd.f32 %v5553_v46, %v3899_v40  ;;  %v4696_v49 = vpop.f32.mrb[194].mxu0 }
 0x533   :  { %4068 = vst [vmem:[#allocation9 + $0x50] sm:$0xff] %v3908_v62  ;;  %v3911_v13 = vadd.f32 %v4696_v49, %v5553_v46  ;;  %v3902_v53 = vpop.f32.mrb[195].mxu0 }
 0x534   :  { %4066 = vst [vmem:[#allocation9 + $0x40] sm:$0xff] %v3900_v60  ;;  %v3903_v42 = vadd.f32 %v5553_v46, %v3902_v53 }
 0x535   :  { %4069 = vst [vmem:[#allocation9 + $0x58] sm:$0xff] %v3911_v13 }
 0x536   :  { %4067 = vst [vmem:[#allocation9 + $0x48] sm:$0xff] %v3903_v42 }
 0x538   :  { %v4699_v54 = vpop.f32.mrb[196].mxu0 }
 0x539   :  { %v3924_v39 = vadd.f32 %v4699_v54, %v5553_v46  ;;  %v3915_v57 = vpop.f32.mrb[197].mxu0 }
 0x53a   :  { %v3916_v26 = vadd.f32 %v5553_v46, %v3915_v57  ;;  %v4700_v20 = vpop.f32.mrb[198].mxu0 }
 0x53b   :  { %4072 = vst [vmem:[#allocation9 + $0x70] sm:$0xff] %v3924_v39  ;;  %v3927_v7 = vadd.f32 %v4700_v20, %v5553_v46  ;;  %v3918_v1 = vpop.f32.mrb[199].mxu0 }
 0x53c   :  { %4070 = vst [vmem:[#allocation9 + $0x60] sm:$0xff] %v3916_v26  ;;  %v3919_v45 = vadd.f32 %v5553_v46, %v3918_v1 }
 0x53d   :  { %4073 = vst [vmem:[#allocation9 + $0x78] sm:$0xff] %v3927_v7 }
 0x53e   :  { %4071 = vst [vmem:[#allocation9 + $0x68] sm:$0xff] %v3919_v45 }
 0x540   :  { %v4703_v2 = vpop.f32.mrb[200].mxu0 }
 0x541   :  { %v3940_v19 = vadd.f32 %v4703_v2, %v5553_v46  ;;  %v3931_v25 = vpop.f32.mrb[201].mxu0 }
 0x542   :  { %v3932_v24 = vadd.f32 %v5553_v46, %v3931_v25  ;;  %v4704_v37 = vpop.f32.mrb[202].mxu0 }
 0x543   :  { %4076 = vst [vmem:[#allocation9 + $0x90] sm:$0xff] %v3940_v19  ;;  %v3943_v8 = vadd.f32 %v4704_v37, %v5553_v46  ;;  %v3934_v52 = vpop.f32.mrb[203].mxu0 }
 0x544   :  { %4074 = vst [vmem:[#allocation9 + $0x80] sm:$0xff] %v3932_v24  ;;  %v3935_v16 = vadd.f32 %v5553_v46, %v3934_v52 }
 0x545   :  { %4077 = vst [vmem:[#allocation9 + $0x98] sm:$0xff] %v3943_v8 }
 0x546   :  { %4075 = vst [vmem:[#allocation9 + $0x88] sm:$0xff] %v3935_v16 }
 0x548   :  { %v4707_v30 = vpop.f32.mrb[204].mxu0 }
 0x549   :  { %v3956_v11 = vadd.f32 %v4707_v30, %v5553_v46  ;;  %v3947_v5 = vpop.f32.mrb[205].mxu0 }
 0x54a   :  { %v3948_v59 = vadd.f32 %v5553_v46, %v3947_v5  ;;  %v4708_v15 = vpop.f32.mrb[206].mxu0 }
 0x54b   :  { %4080 = vst [vmem:[#allocation9 + $0xb0] sm:$0xff] %v3956_v11  ;;  %v3959_v28 = vadd.f32 %v4708_v15, %v5553_v46  ;;  %v3950_v10 = vpop.f32.mrb[207].mxu0 }
 0x54c   :  { %4078 = vst [vmem:[#allocation9 + $0xa0] sm:$0xff] %v3948_v59  ;;  %v3951_v36 = vadd.f32 %v5553_v46, %v3950_v10 }
 0x54d   :  { %4081 = vst [vmem:[#allocation9 + $0xb8] sm:$0xff] %v3959_v28 }
 0x54e   :  { %4079 = vst [vmem:[#allocation9 + $0xa8] sm:$0xff] %v3951_v36 }
 0x550   :  { %v4711_v43 = vpop.f32.mrb[208].mxu0 }
 0x551   :  { %v3972_v0 = vadd.f32 %v4711_v43, %v5553_v46  ;;  %v3963_v4 = vpop.f32.mrb[209].mxu0 }
 0x552   :  { %v3964_v41 = vadd.f32 %v5553_v46, %v3963_v4  ;;  %v4712_v18 = vpop.f32.mrb[210].mxu0 }
 0x553   :  { %4084 = vst [vmem:[#allocation9 + $0xd0] sm:$0xff] %v3972_v0  ;;  %v3975_v44 = vadd.f32 %v4712_v18, %v5553_v46  ;;  %v3966_v9 = vpop.f32.mrb[211].mxu0 }
 0x554   :  { %4082 = vst [vmem:[#allocation9 + $0xc0] sm:$0xff] %v3964_v41  ;;  %v3967_v22 = vadd.f32 %v5553_v46, %v3966_v9 }
 0x555   :  { %4085 = vst [vmem:[#allocation9 + $0xd8] sm:$0xff] %v3975_v44 }
 0x556   :  { %4083 = vst [vmem:[#allocation9 + $0xc8] sm:$0xff] %v3967_v22 }
 0x55b   :  { %v4715_v31 = vpop.f32.mrb[212].mxu0 }
 0x55c   :  { %v3988_v17 = vadd.f32 %v4715_v31, %v5553_v46  ;;  %v3979_v33 = vpop.f32.mrb[213].mxu0 }
 0x55d   :  { %v3980_v63 = vadd.f32 %v5553_v46, %v3979_v33  ;;  %v4716_v51 = vpop.f32.mrb[214].mxu0 }
 0x55e   :  { %4088 = vst [vmem:[#allocation9 + $0xf0] sm:$0xff] %v3988_v17  ;;  %v3991_v27 = vadd.f32 %v4716_v51, %v5553_v46  ;;  %v3982_v48 = vpop.f32.mrb[215].mxu0 }
 0x55f   :  { %4086 = vst [vmem:[#allocation9 + $0xe0] sm:$0xff] %v3980_v63  ;;  %v3983_v3 = vadd.f32 %v5553_v46, %v3982_v48 }
 0x560   :  { %4089 = vst [vmem:[#allocation9 + $0xf8] sm:$0xff] %v3991_v27 }
 0x561   :  { %4087 = vst [vmem:[#allocation9 + $0xe8] sm:$0xff] %v3983_v3 }
 0x56b   :  { %v4719_v32 = vpop.f32.mrb[216].mxu0 }
 0x56c   :  { %v4004_v6 = vadd.f32 %v4719_v32, %v5553_v46  ;;  %v3995_v35 = vpop.f32.mrb[217].mxu0 }
 0x56d   :  { %v3996_v38 = vadd.f32 %v5553_v46, %v3995_v35  ;;  %v4720_v21 = vpop.f32.mrb[218].mxu0 }
 0x56e   :  { %4092 = vst [vmem:[#allocation9 + $0x110] sm:$0xff] %v4004_v6  ;;  %v4007_v34 = vadd.f32 %v4720_v21, %v5553_v46  ;;  %v3998_v29 = vpop.f32.mrb[219].mxu0 }
 0x56f   :  { %4090 = vst [vmem:[#allocation9 + $0x100] sm:$0xff] %v3996_v38  ;;  %v3999_v58 = vadd.f32 %v5553_v46, %v3998_v29 }
 0x570   :  { %4093 = vst [vmem:[#allocation9 + $0x118] sm:$0xff] %v4007_v34 }
 0x571   :  { %4091 = vst [vmem:[#allocation9 + $0x108] sm:$0xff] %v3999_v58 }
 0x57b   :  { %v4723_v50 = vpop.f32.mrb[220].mxu0 }
 0x57c   :  { %v4020_v12 = vadd.f32 %v4723_v50, %v5553_v46  ;;  %v4011_v47 = vpop.f32.mrb[221].mxu0 }
 0x57d   :  { %v4012_v23 = vadd.f32 %v5553_v46, %v4011_v47  ;;  %v4724_v14 = vpop.f32.mrb[222].mxu0 }
 0x57e   :  { %4096 = vst [vmem:[#allocation9 + $0x130] sm:$0xff] %v4020_v12  ;;  %v4023_v55 = vadd.f32 %v4724_v14, %v5553_v46  ;;  %v4014_v61 = vpop.f32.mrb[223].mxu0 }
 0x57f   :  { %4094 = vst [vmem:[#allocation9 + $0x120] sm:$0xff] %v4012_v23  ;;  %v4015_v56 = vadd.f32 %v5553_v46, %v4014_v61 }
 0x580   :  { %4097 = vst [vmem:[#allocation9 + $0x138] sm:$0xff] %v4023_v55 }
 0x581   :  { %4095 = vst [vmem:[#allocation9 + $0x128] sm:$0xff] %v4015_v56 }
 0x5a5   :  { %v4727_v62 = vpop.f32.mrb[224].mxu0 }
 0x5a6   :  { %v4036_v40 = vadd.f32 %v4727_v62, %v5553_v46  ;;  %v4027_v60 = vpop.f32.mrb[225].mxu0 }
 0x5a7   :  { %v4028_v49 = vadd.f32 %v5553_v46, %v4027_v60  ;;  %v4728_v13 = vpop.f32.mrb[226].mxu0 }
 0x5a8   :  { %4100 = vst [vmem:[#allocation9 + $0x150] sm:$0xff] %v4036_v40  ;;  %v4039_v53 = vadd.f32 %v4728_v13, %v5553_v46  ;;  %v4030_v42 = vpop.f32.mrb[227].mxu0 }
 0x5a9   :  { %4098 = vst [vmem:[#allocation9 + $0x140] sm:$0xff] %v4028_v49  ;;  %v4031_v54 = vadd.f32 %v5553_v46, %v4030_v42 }
 0x5aa   :  { %4101 = vst [vmem:[#allocation9 + $0x158] sm:$0xff] %v4039_v53 }
 0x5ab   :  { %4099 = vst [vmem:[#allocation9 + $0x148] sm:$0xff] %v4031_v54 }
 0x5ad   :  { %v4731_v39 = vpop.f32.mrb[228].mxu0 }
 0x5ae   :  { %v4052_v57 = vadd.f32 %v4731_v39, %v5553_v46  ;;  %v4043_v26 = vpop.f32.mrb[229].mxu0 }
 0x5af   :  { %v4044_v20 = vadd.f32 %v5553_v46, %v4043_v26  ;;  %v4732_v7 = vpop.f32.mrb[230].mxu0 }
 0x5b0   :  { %4104 = vst [vmem:[#allocation9 + $0x170] sm:$0xff] %v4052_v57  ;;  %v4055_v1 = vadd.f32 %v4732_v7, %v5553_v46  ;;  %v4046_v45 = vpop.f32.mrb[231].mxu0 }
 0x5b1   :  { %4102 = vst [vmem:[#allocation9 + $0x160] sm:$0xff] %v4044_v20  ;;  %v4047_v2 = vadd.f32 %v5553_v46, %v4046_v45 }
 0x5b2   :  { %4105 = vst [vmem:[#allocation9 + $0x178] sm:$0xff] %v4055_v1 }
 0x5b3   :  { %4103 = vst [vmem:[#allocation9 + $0x168] sm:$0xff] %v4047_v2 }
 0x5b4   :  { %5158 = shalt.err (!%p5155_p0)
}
 0x5b5   :  { %s5159_s8 = scalar_lea.hbm %s5622_s4, 6144 }
 0x5b6   :  { %p5160_p1 = scmp.ne.s32.totalorder %s5622_s4, %s5159_s8  ;;  %p5163_p2 = scmp.lt.u32.totalorder %s5159_s8, %s5622_s4 }
 0x5b8   :  { %p5165_p3 = pnand %p5163_p2, %p5160_p1 }
 0x5ba   :  { %5168 = shalt.err (!%p5165_p3)
}
 0x5bb   :  { %4117 = dma.vmem_to_hbm [thread:$0]  %s4112_s30, 6144, %s5622_s4, [#allocation5], %s5179_s1, %s5179_s1, %s5180_s13  }
 0x5bc   :  { %5173 = dma.done.wait [#allocation5], 6144  }
 0x5bd   :  { %5174 = vsyncadd [#allocation5], 4294961152 }
 0x5be   :  { %4121 = vsyncpa [#allocation4], 1 }
 0x5bf   :  { %4122 = vsyncpa [#allocation7], 1 }
 0x5c0   :  { %4123 = vsyncpa [#allocation5], 1 }

</bundles_post_ra>
